<compile_context>
chip_gen: v6e
topology: v6e:2x2x1
jax: 0.10.0
libtpu: 0.0.40
codegen_flags: <defaults>
</compile_context>

<pallas_src>
import functools

import numpy as np
import jax
import jax.numpy as jnp
from jax import lax
from jax.experimental import pallas as pl
from jax.experimental.pallas import tpu as pltpu


# -----------------------------------------------------------------------------
# Fused kernel: BN stats -> BN affine -> conv3x3 -> tanh -> conv3x3 -> tanh.
# The whole batch lives in VMEM; lane layout is (rows = H, lanes = (n, w, c)).
# -----------------------------------------------------------------------------
def _fused_block_kernel(x_ref, par_ref, pch_ref, w1_ref, w2_ref, out_ref,
                        xpad_ref, hpad_ref, *, H, L1, L2, Lo, inv_count, eps):
    # Precision note: Mosaic's dot lowering supports DEFAULT/HIGHEST only;
    # HIGHEST keeps the 5e-3 check comfortable and is not on the critical path
    # at these (launch/DMA-bound) sizes.
    dot = functools.partial(jnp.dot, preferred_element_type=jnp.float32,
                            precision=lax.Precision.HIGHEST)

    x = x_ref[...]                                            # (H, L1)

    # ---- BatchNorm2d training statistics (two-pass, matches reference) ------
    # Reduce rows on the VPU/XLU, then one tiny MXU matmul against the 0/1
    # channel-equality matrix both reduces over the (n, w) lanes and broadcasts
    # the per-channel result back to every lane (no in-kernel reshapes).
    srow = jnp.sum(x, axis=0, keepdims=True)                  # (1, L1)
    mean = dot(srow, pch_ref[...]) * inv_count                # per-channel mean, per lane
    xc = x - mean                                             # centered
    qrow = jnp.sum(xc * xc, axis=0, keepdims=True)            # (1, L1)
    var = dot(qrow, pch_ref[...]) * inv_count                 # per-channel var, per lane
    scale = par_ref[0:1, :L1] * lax.rsqrt(var + eps)          # gamma * rsqrt(var+eps)
    xn = xc * scale + par_ref[1:2, :L1]                       # + beta

    # ---- ConvTranspose2d(inc, inc, 3, 1, 1) == 'same' conv, flipped kernel ---
    # kx taps, input channels, horizontal padding and the batch block-diagonal
    # are folded into w1_ref; only the two vertical halo rows need zeros.
    xpad_ref[0:1, :] = jnp.zeros((1, L1), jnp.float32)
    xpad_ref[H + 1:H + 2, :] = jnp.zeros((1, L1), jnp.float32)
    xpad_ref[1:H + 1, :] = xn
    acc = dot(xpad_ref[0:H, :], w1_ref[0])                    # value accumulation,
    acc = acc + dot(xpad_ref[1:H + 1, :], w1_ref[1])          # no VMEM accumulator
    acc = acc + dot(xpad_ref[2:H + 2, :], w1_ref[2])
    h1 = jnp.tanh(acc + par_ref[2:3, :L2])

    # ---- Conv2d(inc, outc, 3, 1, 1) ------------------------------------------
    hpad_ref[0:1, :] = jnp.zeros((1, L2), jnp.float32)
    hpad_ref[H + 1:H + 2, :] = jnp.zeros((1, L2), jnp.float32)
    hpad_ref[1:H + 1, :] = h1
    acc2 = dot(hpad_ref[0:H, :], w2_ref[0])
    acc2 = acc2 + dot(hpad_ref[1:H + 1, :], w2_ref[1])
    acc2 = acc2 + dot(hpad_ref[2:H + 2, :], w2_ref[2])

    # Lane-dense, 128-wide unmasked store.
    out_ref[...] = jnp.tanh(acc2 + par_ref[3:4, :Lo])


# -----------------------------------------------------------------------------
# Host-side (numpy, OUTSIDE jit): fold kx taps, input channels, horizontal
# 'same' padding and the per-sample block-diagonal packing of a 3x3 conv into
# per-ky dense matrices:  (3, 3, Ci, Co) -> (3, N*W*Ci, N*W*Co).
#
# NOTE (v7x VMEM): this form is O((N*W)^2 * Ci * Co); at N=2, W=16, C=4 it is
# ~200 KB per conv.  For large W / C / N switch to per-tap (M, Ci) @ (Ci, Co)
# matmuls or tile W so the weights stay well under v7x's 64 MiB VMEM.
# -----------------------------------------------------------------------------
def _band_weights_packed(w_hwio, W, N):
    w = np.asarray(w_hwio, np.float32)
    kh, kw, Ci, Co = w.shape
    band = np.zeros((kh, N * W * Ci, N * W * Co), np.float32)
    for ky in range(kh):
        for kx in range(kw):
            for n in range(N):
                for wo in range(W):
                    wi = wo + kx - 1                          # pad=1 folded here
                    if 0 <= wi < W:
                        band[ky,
                             (n * W + wi) * Ci:(n * W + wi + 1) * Ci,
                             (n * W + wo) * Co:(n * W + wo + 1) * Co] = w[ky, kx]
    return band


def make_convt_block(gamma, beta, wt, b1, wc, b2, *, N, H, W):
    """Pre-folds parameters (numpy, outside jit) and returns a jitted
    forward(fx, x, ind) -> (N, outc, H, W) matching ConvTBlock.forward."""
    inc = int(np.asarray(gamma).shape[0])
    outc = int(np.asarray(wc).shape[0])
    L1 = N * W * inc                  # lanes after BN / conv1 input
    L2 = N * W * inc                  # lanes after conv1 (ConvTranspose keeps inc)
    Lo = N * W * outc                 # output lanes
    Lmax = max(L1, L2, Lo)

    # ConvTranspose2d(stride=1, pad=1) == 'same' conv with spatially flipped
    # kernel; weight (in, out, kh, kw) -> HWIO.
    # TODO(synk): equivalence validated against the in-script JAX reference
    # only, not against a live torch ConvTranspose2d.
    w1_hwio = np.transpose(np.asarray(wt, np.float32)[:, :, ::-1, ::-1], (2, 3, 0, 1))
    w2_hwio = np.transpose(np.asarray(wc, np.float32), (2, 3, 1, 0))   # OIHW -> HWIO
    w1b = jnp.asarray(_band_weights_packed(w1_hwio, W, N))             # (3, L1, L2)
    w2b = jnp.asarray(_band_weights_packed(w2_hwio, W, N))             # (3, L2, Lo)

    # All per-channel vectors merged into ONE lane-tiled input (feedback #10).
    par = np.zeros((4, Lmax), np.float32)
    par[0, :L1] = np.tile(np.asarray(gamma, np.float32), N * W)        # BN gamma
    par[1, :L1] = np.tile(np.asarray(beta, np.float32), N * W)         # BN beta
    par[2, :L2] = np.tile(np.asarray(b1, np.float32), N * W)           # conv1 bias
    par[3, :Lo] = np.tile(np.asarray(b2, np.float32), N * W)           # conv2 bias
    par = jnp.asarray(par)

    # 0/1 channel-equality matrix (lanes ordered (n, w, c), c innermost):
    # (row_sums @ pch) reduces over (n, w) and broadcasts back to every lane.
    lane_ch = np.arange(L1) % inc
    pch = jnp.asarray((lane_ch[:, None] == lane_ch[None, :]).astype(np.float32))

    kernel = functools.partial(_fused_block_kernel, H=H, L1=L1, L2=L2, Lo=Lo,
                               inv_count=1.0 / float(N * H * W), eps=1e-5)
    fused = pl.pallas_call(
        kernel,
        out_shape=jax.ShapeDtypeStruct((H, Lo), jnp.float32),
        grid=(1,),                                              # whole batch fits in VMEM
        in_specs=[
            pl.BlockSpec((H, L1), lambda i: (0, 0)),            # lane-dense input
            pl.BlockSpec((4, Lmax), lambda i: (0, 0)),          # merged per-channel params
            pl.BlockSpec((L1, L1), lambda i: (0, 0)),           # channel-equality matrix
            pl.BlockSpec((3, L1, L2), lambda i: (0, 0, 0)),     # banded conv1 weights
            pl.BlockSpec((3, L2, Lo), lambda i: (0, 0, 0)),     # banded conv2 weights
        ],
        out_specs=pl.BlockSpec((H, Lo), lambda i: (0, 0)),      # 128-lane dense output
        scratch_shapes=[
            pltpu.VMEM((H + 2, L1), jnp.float32),               # row-padded BN output
            pltpu.VMEM((H + 2, L2), jnp.float32),               # row-padded tanh(conv1)
        ],
        compiler_params=pltpu.CompilerParams(
            dimension_semantics=("arbitrary",)),
    )

    @jax.jit
    def forward(fx, x, ind):
        Nb, c_x, Hx, Wx = x.shape
        _, c_fx, Hh, Wh = fx.shape
        C = c_x + c_fx
        # cat([x, MaxUnpool2d(2)(fx, ind)], dim=1), built directly in the
        # kernel's lane-dense (H, n, w, c) layout (no extra HBM round trips).
        # TODO(synk): the MaxUnpool2d index scatter is data-dependent; kept as
        # XLA glue (an in-kernel version would need a manual DMA scatter).
        buf = jnp.zeros((Hx, Nb, Wx, C), jnp.float32)
        buf = buf.at[:, :, :, :c_x].set(
            jnp.transpose(x.astype(jnp.float32), (2, 0, 3, 1)))
        n_i = jnp.arange(Nb)[:, None, None, None]
        c_i = jnp.arange(c_fx)[None, :, None, None]
        h_i = ind // Wx
        w_i = ind % Wx
        buf = buf.at[h_i, n_i, w_i, c_x + c_i].set(fx.astype(jnp.float32))
        x2d = buf.reshape(Hx, Nb * Wx * C)                      # (H, N*W*C) = (16, 128)

        out2d = fused(x2d, par, pch, w1b, w2b)                  # (H, N*W*outc)

        # Module contract is NCHW; the transpose stays inside the jitted graph.
        # A fused consumer should take the lane-dense NHWC output directly.
        return jnp.transpose(out2d.reshape(Hx, Nb, Wx, outc), (1, 3, 0, 2))

    return forward


# ------------------------------ reference path --------------------------------
def build_input_nhwc(x_nchw, fx_nchw, ind):
    N, Cx, H, W = x_nchw.shape
    _, Cf, Hh, Wh = fx_nchw.shape
    buf = jnp.zeros((N, H, W, Cx + Cf), jnp.float32)
    buf = buf.at[:, :, :, :Cx].set(jnp.transpose(x_nchw, (0, 2, 3, 1)))
    n_i = jnp.arange(N)[:, None, None, None]
    c_i = jnp.arange(Cf)[None, :, None, None]
    h_i = ind // W
    w_i = ind % W
    buf = buf.at[n_i, h_i, w_i, Cx + c_i].set(fx_nchw)
    return buf


def reference_forward(x_nhwc, gamma, beta, w1_hwio, b1, w2_hwio, b2):
    x = x_nhwc.astype(jnp.float32)
    mean = jnp.mean(x, axis=(0, 1, 2), keepdims=True)
    var = jnp.mean((x - mean) ** 2, axis=(0, 1, 2), keepdims=True)
    xn = (x - mean) * lax.rsqrt(var + 1e-5) * gamma + beta
    dn = ('NHWC', 'HWIO', 'NHWC')
    y1 = jnp.tanh(lax.conv_general_dilated(
        xn, w1_hwio, (1, 1), ((1, 1), (1, 1)), dimension_numbers=dn,
        precision=lax.Precision.HIGHEST) + b1)
    y2 = jnp.tanh(lax.conv_general_dilated(
        y1, w2_hwio, (1, 1), ((1, 1), (1, 1)), dimension_numbers=dn,
        precision=lax.Precision.HIGHEST) + b2)
    return jnp.transpose(y2, (0, 3, 1, 2))


if __name__ == "__main__":
    key = jax.random.PRNGKey(0)
    N, c_x, c_fx, H, W, outc = 2, 2, 2, 16, 16, 4
    inc = c_x + c_fx                      # BatchNorm2d(inc) sees cat([x, unpool(fx)])
    Hh, Wh = H // 2, W // 2
    ks = jax.random.split(key, 10)

    # inputs: fx (pre-unpool feature map), x (skip), ind (MaxPool2d(2) indices)
    fx = jax.random.normal(ks[0], (N, c_fx, Hh, Wh), jnp.float32)
    x = jax.random.normal(ks[1], (N, c_x, H, W), jnp.float32)
    di = jax.random.randint(ks[2], (N, c_fx, Hh, Wh), 0, 2)
    dj = jax.random.randint(ks[3], (N, c_fx, Hh, Wh), 0, 2)
    row = jnp.arange(Hh)[:, None] * 2 + di
    col = jnp.arange(Wh)[None, :] * 2 + dj
    ind = (row * W + col).astype(jnp.int32)          # valid flat indices into HxW planes

    # parameters (shapes match the PyTorch module)
    gamma = 1.0 + 0.1 * jax.random.normal(ks[4], (inc,), jnp.float32)     # BN weight
    beta = 0.1 * jax.random.normal(ks[5], (inc,), jnp.float32)            # BN bias
    wt = 0.2 * jax.random.normal(ks[6], (inc, inc, 3, 3), jnp.float32)    # ConvTranspose2d (in,out,kh,kw)
    b1 = 0.05 * jax.random.normal(ks[7], (inc,), jnp.float32)
    wc = 0.2 * jax.random.normal(ks[8], (outc, inc, 3, 3), jnp.float32)   # Conv2d (out,in,kh,kw)
    b2 = 0.05 * jax.random.normal(ks[9], (outc,), jnp.float32)

    # fused, jitted Pallas forward
    forward = make_convt_block(gamma, beta, wt, b1, wc, b2, N=N, H=H, W=W)
    out = jax.block_until_ready(forward(fx, x, ind))

    # reference
    w1_hwio = jnp.transpose(wt[:, :, ::-1, ::-1], (2, 3, 0, 1))
    w2_hwio = jnp.transpose(wc, (2, 3, 1, 0))
    xin_nhwc = build_input_nhwc(x, fx, ind)
    ref = reference_forward(xin_nhwc, gamma, beta, w1_hwio, b1, w2_hwio, b2)

    assert out.shape == (N, outc, H, W)
    err = float(jnp.max(jnp.abs(out - ref)))
    assert err < 5e-3, err
    print("KERNEL_OK")
</pallas_src>

<mosaic_0001>
module attributes {stable_mosaic.version = 11 : i64} {
  func.func @_fused_block_kernel(%arg0: i32, %arg1: memref<16x128xf32, #tpu.memory_space<vmem>>, %arg2: memref<4x128xf32, #tpu.memory_space<vmem>>, %arg3: memref<128x128xf32, #tpu.memory_space<vmem>>, %arg4: memref<3x128x128xf32, #tpu.memory_space<vmem>>, %arg5: memref<3x128x128xf32, #tpu.memory_space<vmem>>, %arg6: memref<16x128xf32, #tpu.memory_space<vmem>>, %arg7: memref<18x128xf32, #tpu.memory_space<vmem>>, %arg8: memref<18x128xf32, #tpu.memory_space<vmem>>) attributes {dimension_semantics = [#tpu.dimension_semantics<arbitrary>], iteration_bounds = array<i64: 1>, scalar_prefetch = 0 : i64, scratch_operands = 2 : i64, tpu.core_type = #tpu.core_type<tc>, window_params = [{pipeline_mode = #tpu.pipeline_mode<synchronous>, transform_indices = @transform_0, window_bounds = array<i64: 16, 128>}, {pipeline_mode = #tpu.pipeline_mode<synchronous>, transform_indices = @transform_1, window_bounds = array<i64: 4, 128>}, {pipeline_mode = #tpu.pipeline_mode<synchronous>, transform_indices = @transform_2, window_bounds = array<i64: 128, 128>}, {pipeline_mode = #tpu.pipeline_mode<synchronous>, transform_indices = @transform_3, window_bounds = array<i64: 3, 128, 128>}, {pipeline_mode = #tpu.pipeline_mode<synchronous>, transform_indices = @transform_4, window_bounds = array<i64: 3, 128, 128>}, {pipeline_mode = #tpu.pipeline_mode<synchronous>, transform_indices = @transform_5, window_bounds = array<i64: 16, 128>}]} {
    %c0 = arith.constant 0 : index
    %c0_0 = arith.constant 0 : index
    %0 = vector.load %arg1[%c0, %c0_0] : memref<16x128xf32, #tpu.memory_space<vmem>>, vector<16x128xf32>
    %cst = arith.constant dense<0.000000e+00> : vector<128xf32>
    %1 = vector.multi_reduction <add>, %0, %cst [0] : vector<16x128xf32> to vector<128xf32>
    %2 = vector.shape_cast %1 : vector<128xf32> to vector<1x128xf32>
    %c0_1 = arith.constant 0 : index
    %c0_2 = arith.constant 0 : index
    %3 = vector.load %arg3[%c0_1, %c0_2] : memref<128x128xf32, #tpu.memory_space<vmem>>, vector<128x128xf32>
    %cst_3 = arith.constant dense<0.000000e+00> : vector<1x128xf32>
    %4 = tpu.matmul %2, %3, %cst_3 {dimension_numbers = #tpu.dot_dimension_numbers<[1], [0], [0], [1], [0, 0, 1, 1], [], []>, precision = #tpu.contract_precision<fp32>} : vector<1x128xf32>, vector<128x128xf32>, vector<1x128xf32> -> vector<1x128xf32>
    %cst_4 = arith.constant 0.001953125 : f32
    %5 = vector.broadcast %cst_4 : f32 to vector<1x128xf32>
    %6 = arith.mulf %4, %5 : vector<1x128xf32>
    %7 = vector.broadcast %6 : vector<1x128xf32> to vector<16x128xf32>
    %8 = arith.subf %0, %7 : vector<16x128xf32>
    %9 = arith.mulf %8, %8 : vector<16x128xf32>
    %cst_5 = arith.constant dense<0.000000e+00> : vector<128xf32>
    %10 = vector.multi_reduction <add>, %9, %cst_5 [0] : vector<16x128xf32> to vector<128xf32>
    %11 = vector.shape_cast %10 : vector<128xf32> to vector<1x128xf32>
    %c0_6 = arith.constant 0 : index
    %c0_7 = arith.constant 0 : index
    %12 = vector.load %arg3[%c0_6, %c0_7] : memref<128x128xf32, #tpu.memory_space<vmem>>, vector<128x128xf32>
    %cst_8 = arith.constant dense<0.000000e+00> : vector<1x128xf32>
    %13 = tpu.matmul %11, %12, %cst_8 {dimension_numbers = #tpu.dot_dimension_numbers<[1], [0], [0], [1], [0, 0, 1, 1], [], []>, precision = #tpu.contract_precision<fp32>} : vector<1x128xf32>, vector<128x128xf32>, vector<1x128xf32> -> vector<1x128xf32>
    %cst_9 = arith.constant 0.001953125 : f32
    %14 = vector.broadcast %cst_9 : f32 to vector<1x128xf32>
    %15 = arith.mulf %13, %14 : vector<1x128xf32>
    %c0_10 = arith.constant 0 : index
    %c0_11 = arith.constant 0 : index
    %16 = vector.load %arg2[%c0_10, %c0_11] : memref<4x128xf32, #tpu.memory_space<vmem>>, vector<1x128xf32>
    %cst_12 = arith.constant 9.99999974E-6 : f32
    %17 = vector.broadcast %cst_12 : f32 to vector<1x128xf32>
    %18 = arith.addf %15, %17 : vector<1x128xf32>
    %19 = math.rsqrt %18 : vector<1x128xf32>
    %20 = arith.mulf %16, %19 : vector<1x128xf32>
    %21 = vector.broadcast %20 : vector<1x128xf32> to vector<16x128xf32>
    %22 = arith.mulf %8, %21 : vector<16x128xf32>
    %c1 = arith.constant 1 : index
    %c0_13 = arith.constant 0 : index
    %23 = vector.load %arg2[%c1, %c0_13] : memref<4x128xf32, #tpu.memory_space<vmem>>, vector<1x128xf32>
    %24 = vector.broadcast %23 : vector<1x128xf32> to vector<16x128xf32>
    %25 = arith.addf %22, %24 : vector<16x128xf32>
    %cst_14 = arith.constant 0.000000e+00 : f32
    %26 = vector.broadcast %cst_14 : f32 to vector<1x128xf32>
    %c0_15 = arith.constant 0 : index
    %c0_16 = arith.constant 0 : index
    %27 = vector.load %arg7[%c0_15, %c0_16] : memref<18x128xf32, #tpu.memory_space<vmem>>, vector<1x128xf32>
    tpu.vector_store %arg7[%c0_15, %c0_16], %26 {strides = array<i32>} : memref<18x128xf32, #tpu.memory_space<vmem>>, vector<1x128xf32>,
    %cst_17 = arith.constant 0.000000e+00 : f32
    %28 = vector.broadcast %cst_17 : f32 to vector<1x128xf32>
    %c17 = arith.constant 17 : index
    %c0_18 = arith.constant 0 : index
    %29 = vector.load %arg7[%c17, %c0_18] : memref<18x128xf32, #tpu.memory_space<vmem>>, vector<1x128xf32>
    tpu.vector_store %arg7[%c17, %c0_18], %28 {strides = array<i32>} : memref<18x128xf32, #tpu.memory_space<vmem>>, vector<1x128xf32>,
    %c1_19 = arith.constant 1 : index
    %c0_20 = arith.constant 0 : index
    %30 = vector.load %arg7[%c1_19, %c0_20] : memref<18x128xf32, #tpu.memory_space<vmem>>, vector<16x128xf32>
    tpu.vector_store %arg7[%c1_19, %c0_20], %25 {strides = array<i32>} : memref<18x128xf32, #tpu.memory_space<vmem>>, vector<16x128xf32>,
    %c0_21 = arith.constant 0 : index
    %c0_22 = arith.constant 0 : index
    %31 = vector.load %arg7[%c0_21, %c0_22] : memref<18x128xf32, #tpu.memory_space<vmem>>, vector<16x128xf32>
    %c0_23 = arith.constant 0 : index
    %c0_24 = arith.constant 0 : index
    %c0_25 = arith.constant 0 : index
    %32 = vector.load %arg4[%c0_23, %c0_24, %c0_25] : memref<3x128x128xf32, #tpu.memory_space<vmem>>, vector<1x128x128xf32>
    %33 = vector.shape_cast %32 : vector<1x128x128xf32> to vector<128x128xf32>
    %cst_26 = arith.constant dense<0.000000e+00> : vector<16x128xf32>
    %34 = tpu.matmul %31, %33, %cst_26 {dimension_numbers = #tpu.dot_dimension_numbers<[1], [0], [0], [1], [0, 0, 1, 1], [], []>, precision = #tpu.contract_precision<fp32>} : vector<16x128xf32>, vector<128x128xf32>, vector<16x128xf32> -> vector<16x128xf32>
    %c1_27 = arith.constant 1 : index
    %c0_28 = arith.constant 0 : index
    %35 = vector.load %arg7[%c1_27, %c0_28] : memref<18x128xf32, #tpu.memory_space<vmem>>, vector<16x128xf32>
    %c1_29 = arith.constant 1 : index
    %c0_30 = arith.constant 0 : index
    %c0_31 = arith.constant 0 : index
    %36 = vector.load %arg4[%c1_29, %c0_30, %c0_31] : memref<3x128x128xf32, #tpu.memory_space<vmem>>, vector<1x128x128xf32>
    %37 = vector.shape_cast %36 : vector<1x128x128xf32> to vector<128x128xf32>
    %cst_32 = arith.constant dense<0.000000e+00> : vector<16x128xf32>
    %38 = tpu.matmul %35, %37, %cst_32 {dimension_numbers = #tpu.dot_dimension_numbers<[1], [0], [0], [1], [0, 0, 1, 1], [], []>, precision = #tpu.contract_precision<fp32>} : vector<16x128xf32>, vector<128x128xf32>, vector<16x128xf32> -> vector<16x128xf32>
    %39 = arith.addf %34, %38 : vector<16x128xf32>
    %c2 = arith.constant 2 : index
    %c0_33 = arith.constant 0 : index
    %40 = vector.load %arg7[%c2, %c0_33] : memref<18x128xf32, #tpu.memory_space<vmem>>, vector<16x128xf32>
    %c2_34 = arith.constant 2 : index
    %c0_35 = arith.constant 0 : index
    %c0_36 = arith.constant 0 : index
    %41 = vector.load %arg4[%c2_34, %c0_35, %c0_36] : memref<3x128x128xf32, #tpu.memory_space<vmem>>, vector<1x128x128xf32>
    %42 = vector.shape_cast %41 : vector<1x128x128xf32> to vector<128x128xf32>
    %cst_37 = arith.constant dense<0.000000e+00> : vector<16x128xf32>
    %43 = tpu.matmul %40, %42, %cst_37 {dimension_numbers = #tpu.dot_dimension_numbers<[1], [0], [0], [1], [0, 0, 1, 1], [], []>, precision = #tpu.contract_precision<fp32>} : vector<16x128xf32>, vector<128x128xf32>, vector<16x128xf32> -> vector<16x128xf32>
    %44 = arith.addf %39, %43 : vector<16x128xf32>
    %c2_38 = arith.constant 2 : index
    %c0_39 = arith.constant 0 : index
    %45 = vector.load %arg2[%c2_38, %c0_39] : memref<4x128xf32, #tpu.memory_space<vmem>>, vector<1x128xf32>
    %46 = vector.broadcast %45 : vector<1x128xf32> to vector<16x128xf32>
    %47 = arith.addf %44, %46 : vector<16x128xf32>
    %48 = math.tanh %47 : vector<16x128xf32>
    %cst_40 = arith.constant 0.000000e+00 : f32
    %49 = vector.broadcast %cst_40 : f32 to vector<1x128xf32>
    %c0_41 = arith.constant 0 : index
    %c0_42 = arith.constant 0 : index
    %50 = vector.load %arg8[%c0_41, %c0_42] : memref<18x128xf32, #tpu.memory_space<vmem>>, vector<1x128xf32>
    tpu.vector_store %arg8[%c0_41, %c0_42], %49 {strides = array<i32>} : memref<18x128xf32, #tpu.memory_space<vmem>>, vector<1x128xf32>,
    %cst_43 = arith.constant 0.000000e+00 : f32
    %51 = vector.broadcast %cst_43 : f32 to vector<1x128xf32>
    %c17_44 = arith.constant 17 : index
    %c0_45 = arith.constant 0 : index
    %52 = vector.load %arg8[%c17_44, %c0_45] : memref<18x128xf32, #tpu.memory_space<vmem>>, vector<1x128xf32>
    tpu.vector_store %arg8[%c17_44, %c0_45], %51 {strides = array<i32>} : memref<18x128xf32, #tpu.memory_space<vmem>>, vector<1x128xf32>,
    %c1_46 = arith.constant 1 : index
    %c0_47 = arith.constant 0 : index
    %53 = vector.load %arg8[%c1_46, %c0_47] : memref<18x128xf32, #tpu.memory_space<vmem>>, vector<16x128xf32>
    tpu.vector_store %arg8[%c1_46, %c0_47], %48 {strides = array<i32>} : memref<18x128xf32, #tpu.memory_space<vmem>>, vector<16x128xf32>,
    %c0_48 = arith.constant 0 : index
    %c0_49 = arith.constant 0 : index
    %54 = vector.load %arg8[%c0_48, %c0_49] : memref<18x128xf32, #tpu.memory_space<vmem>>, vector<16x128xf32>
    %c0_50 = arith.constant 0 : index
    %c0_51 = arith.constant 0 : index
    %c0_52 = arith.constant 0 : index
    %55 = vector.load %arg5[%c0_50, %c0_51, %c0_52] : memref<3x128x128xf32, #tpu.memory_space<vmem>>, vector<1x128x128xf32>
    %56 = vector.shape_cast %55 : vector<1x128x128xf32> to vector<128x128xf32>
    %cst_53 = arith.constant dense<0.000000e+00> : vector<16x128xf32>
    %57 = tpu.matmul %54, %56, %cst_53 {dimension_numbers = #tpu.dot_dimension_numbers<[1], [0], [0], [1], [0, 0, 1, 1], [], []>, precision = #tpu.contract_precision<fp32>} : vector<16x128xf32>, vector<128x128xf32>, vector<16x128xf32> -> vector<16x128xf32>
    %c1_54 = arith.constant 1 : index
    %c0_55 = arith.constant 0 : index
    %58 = vector.load %arg8[%c1_54, %c0_55] : memref<18x128xf32, #tpu.memory_space<vmem>>, vector<16x128xf32>
    %c1_56 = arith.constant 1 : index
    %c0_57 = arith.constant 0 : index
    %c0_58 = arith.constant 0 : index
    %59 = vector.load %arg5[%c1_56, %c0_57, %c0_58] : memref<3x128x128xf32, #tpu.memory_space<vmem>>, vector<1x128x128xf32>
    %60 = vector.shape_cast %59 : vector<1x128x128xf32> to vector<128x128xf32>
    %cst_59 = arith.constant dense<0.000000e+00> : vector<16x128xf32>
    %61 = tpu.matmul %58, %60, %cst_59 {dimension_numbers = #tpu.dot_dimension_numbers<[1], [0], [0], [1], [0, 0, 1, 1], [], []>, precision = #tpu.contract_precision<fp32>} : vector<16x128xf32>, vector<128x128xf32>, vector<16x128xf32> -> vector<16x128xf32>
    %62 = arith.addf %57, %61 : vector<16x128xf32>
    %c2_60 = arith.constant 2 : index
    %c0_61 = arith.constant 0 : index
    %63 = vector.load %arg8[%c2_60, %c0_61] : memref<18x128xf32, #tpu.memory_space<vmem>>, vector<16x128xf32>
    %c2_62 = arith.constant 2 : index
    %c0_63 = arith.constant 0 : index
    %c0_64 = arith.constant 0 : index
    %64 = vector.load %arg5[%c2_62, %c0_63, %c0_64] : memref<3x128x128xf32, #tpu.memory_space<vmem>>, vector<1x128x128xf32>
    %65 = vector.shape_cast %64 : vector<1x128x128xf32> to vector<128x128xf32>
    %cst_65 = arith.constant dense<0.000000e+00> : vector<16x128xf32>
    %66 = tpu.matmul %63, %65, %cst_65 {dimension_numbers = #tpu.dot_dimension_numbers<[1], [0], [0], [1], [0, 0, 1, 1], [], []>, precision = #tpu.contract_precision<fp32>} : vector<16x128xf32>, vector<128x128xf32>, vector<16x128xf32> -> vector<16x128xf32>
    %67 = arith.addf %62, %66 : vector<16x128xf32>
    %c3 = arith.constant 3 : index
    %c0_66 = arith.constant 0 : index
    %68 = vector.load %arg2[%c3, %c0_66] : memref<4x128xf32, #tpu.memory_space<vmem>>, vector<1x128xf32>
    %69 = vector.broadcast %68 : vector<1x128xf32> to vector<16x128xf32>
    %70 = arith.addf %67, %69 : vector<16x128xf32>
    %71 = math.tanh %70 : vector<16x128xf32>
    %c0_67 = arith.constant 0 : index
    %c0_68 = arith.constant 0 : index
    %72 = vector.load %arg6[%c0_67, %c0_68] : memref<16x128xf32, #tpu.memory_space<vmem>>, vector<16x128xf32>
    tpu.vector_store %arg6[%c0_67, %c0_68], %71 {strides = array<i32>} : memref<16x128xf32, #tpu.memory_space<vmem>>, vector<16x128xf32>,
    return
  }
  func.func @transform_0(%arg0: i32) -> (i32, i32) {
    %c0_i32 = arith.constant 0 : i32
    %c0_i32_0 = arith.constant 0 : i32
    %c0_i32_1 = arith.constant 0 : i32
    return %c0_i32, %c0_i32_0 : i32, i32
  }
  func.func @transform_1(%arg0: i32) -> (i32, i32) {
    %c0_i32 = arith.constant 0 : i32
    %c0_i32_0 = arith.constant 0 : i32
    %c0_i32_1 = arith.constant 0 : i32
    return %c0_i32, %c0_i32_0 : i32, i32
  }
  func.func @transform_2(%arg0: i32) -> (i32, i32) {
    %c0_i32 = arith.constant 0 : i32
    %c0_i32_0 = arith.constant 0 : i32
    %c0_i32_1 = arith.constant 0 : i32
    return %c0_i32, %c0_i32_0 : i32, i32
  }
  func.func @transform_3(%arg0: i32) -> (i32, i32, i32) {
    %c0_i32 = arith.constant 0 : i32
    %c0_i32_0 = arith.constant 0 : i32
    %c0_i32_1 = arith.constant 0 : i32
    %c0_i32_2 = arith.constant 0 : i32
    return %c0_i32, %c0_i32_0, %c0_i32_1 : i32, i32, i32
  }
  func.func @transform_4(%arg0: i32) -> (i32, i32, i32) {
    %c0_i32 = arith.constant 0 : i32
    %c0_i32_0 = arith.constant 0 : i32
    %c0_i32_1 = arith.constant 0 : i32
    %c0_i32_2 = arith.constant 0 : i32
    return %c0_i32, %c0_i32_0, %c0_i32_1 : i32, i32, i32
  }
  func.func @transform_5(%arg0: i32) -> (i32, i32) {
    %c0_i32 = arith.constant 0 : i32
    %c0_i32_0 = arith.constant 0 : i32
    %c0_i32_1 = arith.constant 0 : i32
    return %c0_i32, %c0_i32_0 : i32, i32
  }
}

</mosaic_0001>

<bundles_post_ra>
// kernel: forward.1
= control target key start
LH: loop header
LB: loop body
LE: loop exit
PB: predicated region body
PF: predicated region fallthrough
CT: control target
= control target key end

     0   :  { %v11368_v0 = vmov 0.0   ;;  %vm8225_vm0 = vmmov 0   ;;  %s11349_s2 = inlined_call_operand.vmem [shape: f32[128,128], index: 2, kind: input, shape index: {}]   ;;  %s11350_s0 = inlined_call_operand.vmem [shape: f32[16,128], index: 0, kind: input, shape index: {}]   ;;  %s11351_s3 = inlined_call_operand.vmem [shape: f32[3,128,128], index: 3, kind: input, shape index: {}]   ;;  %s11352_s1 = inlined_call_operand.vmem [shape: f32[4,128], index: 1, kind: input, shape index: {}]   ;;  %s11353_s4 = inlined_call_operand.vmem [shape: f32[3,128,128], index: 4, kind: input, shape index: {}]   ;;  %s11354_s5 = inlined_call_operand.vmem [shape: f32[16,128], index: 5, kind: output, shape index: {}]  }
   0x1   :  { %6532 = vmatprep.subr.mxu0 %v11368_v0  ;;  %1361 = vst [vmem:[#allocation2] sm:$0x1] %v11368_v0  ;;  %1362 = vst [vmem:[#allocation2 + $0x11] sm:$0x1] %v11368_v0  ;;  %v44_v1 = vld [vmem:[%s11349_s2 + $0x78] sm:$0xff]  ;;  %v43_v2 = vld [vmem:[%s11349_s2 + $0x70] sm:$0xff]  ;;  %6567 = vmatprep.subr.mxu1 %v11368_v0 }
   0x2   :  { %3484 = vst [vmem:[#allocation3] sm:$0x1] %v11368_v0  ;;  %3485 = vst [vmem:[#allocation3 + $0x11] sm:$0x1] %v11368_v0  ;;  %v42_v3 = vld [vmem:[%s11349_s2 + $0x68] sm:$0xff]  ;;  %v8271_v4 = vand.u32 4294901760, %v44_v1  ;;  %6564 = vmatprep.mubr.msk.f32.mxu0 %vm8225_vm0, %v11368_v0  ;;  %6599 = vmatprep.mubr.msk.f32.mxu1 %vm8225_vm0, %v11368_v0 }
   0x3   :  { %v8273_v5 = vand.u32 4294901760, %v43_v2  ;;  %v8275_v6 = vand.u32 4294901760, %v42_v3  ;;  %v41_v7 = vld [vmem:[%s11349_s2 + $0x60] sm:$0xff]  ;;  %v40_v8 = vld [vmem:[%s11349_s2 + $0x58] sm:$0xff]  ;;  %v39_v9 = vld [vmem:[%s11349_s2 + $0x50] sm:$0xff] }
   0x4   :  { %v8290_v10 = vand.u32 4294901760, %v41_v7  ;;  %v8292_v11 = vand.u32 4294901760, %v40_v8  ;;  %v8294_v12 = vand.u32 4294901760, %v39_v9  ;;  %v38_v13 = vld [vmem:[%s11349_s2 + $0x48] sm:$0xff]  ;;  %v37_v14 = vld [vmem:[%s11349_s2 + $0x40] sm:$0xff]  ;;  %6533 = vmatpush3.msra.mxu0 %v8271_v4  ;;  %v8304_v15 = vsub.f32 %v44_v1, %v8271_v4  ;;  %v36_v19 = vld [vmem:[%s11349_s2 + $0x38] sm:$0xff] }
   0x5   :  { %v8307_v16 = vsub.f32 %v43_v2, %v8273_v5  ;;  %v8309_v17 = vand.u32 4294901760, %v38_v13  ;;  %v8312_v18 = vsub.f32 %v42_v3, %v8275_v6  ;;  %6534 = vmatprep.subr.mxu0 %v11368_v0  ;;  %v8334_v25 = vand.u32 4294901760, %v37_v14  ;;  %v35_v26 = vld [vmem:[%s11349_s2 + $0x30] sm:$0xff]  ;;  %v34_v36 = vld [vmem:[%s11349_s2 + $0x28] sm:$0xff]  ;;  %v33_v41 = vld [vmem:[%s11349_s2 + $0x20] sm:$0xff] }
   0x6   :  { %v8319_v20 = vsub.f32 %v41_v7, %v8290_v10  ;;  %v8322_v21 = vsub.f32 %v40_v8, %v8292_v11  ;;  %6535 = vmatpush3.msra.mxu0 %v8273_v5  ;;  %v8326_v22 = vand.u32 4294901760, %v8304_v15  ;;  %v8343_v28 = vand.u32 4294901760, %v36_v19  ;;  %v8401_v48 = vld [vmem:[%s11350_s0] sm:$0xff]  ;;  %v8406_v49 = vld [vmem:[%s11350_s0 + $0x8] sm:$0xff]  ;;  %v32_v51 = vld [vmem:[%s11349_s2 + $0x18] sm:$0xff] }
   0x7   :  { %v8329_v23 = vand.u32 4294901760, %v8307_v16  ;;  %v8332_v24 = vand.u32 4294901760, %v8312_v18  ;;  %6536 = vmatprep.subr.mxu0 %v11368_v0  ;;  %v8349_v30 = vsub.f32 %v39_v9, %v8294_v12  ;;  %v8359_v34 = vsub.f32 %v38_v13, %v8309_v17  ;;  %11426 = vst [vmem:[#allocation4_spill] sm:$0xff] %v8401_v48  ;;  %11427 = vst [vmem:[#allocation5_spill] sm:$0xff] %v8406_v49  ;;  %v31_v55 = vld [vmem:[%s11349_s2 + $0x10] sm:$0xff]  ;;  %v30_v62 = vld [vmem:[%s11349_s2 + $0x8] sm:$0xff] }
   0x8   :  { %v8341_v27 = vand.u32 4294901760, %v8319_v20  ;;  %v8346_v29 = vand.u32 4294901760, %v8322_v21  ;;  %6537 = vmatpush3.msra.mxu0 %v8275_v6  ;;  %v140_v31 = vsub.f32 %v8304_v15, %v8326_v22  ;;  %v8362_v35 = vand.u32 4294901760, %v35_v26  ;;  %v29_v9 = vld [vmem:[%s11349_s2] sm:$0xff] }
   0x9   :  { %v147_v32 = vsub.f32 %v8307_v16, %v8329_v23  ;;  %v154_v33 = vsub.f32 %v8312_v18, %v8332_v24  ;;  %6538 = vmatprep.subr.mxu0 %v11368_v0  ;;  %v8375_v40 = vand.u32 4294901760, %v8349_v30  ;;  %v8384_v43 = vsub.f32 %v37_v14, %v8334_v25 }
   0xa   :  { %6539 = vmatpush3.msra.mxu0 %v8290_v10  ;;  %v8368_v37 = vand.u32 4294901760, %v140_v31  ;;  %v161_v39 = vsub.f32 %v8319_v20, %v8341_v27  ;;  %v168_v42 = vsub.f32 %v8322_v21, %v8346_v29  ;;  %v8390_v45 = vand.u32 4294901760, %v34_v36 }
   0xb   :  { %v8370_v38 = vand.u32 4294901760, %v147_v32  ;;  %6540 = vmatprep.subr.mxu0 %v11368_v0  ;;  %v8388_v44 = vand.u32 4294901760, %v154_v33  ;;  %v8393_v46 = vand.u32 4294901760, %v8359_v34  ;;  %v8396_v47 = vsub.f32 %v36_v19, %v8343_v28 }
   0xc   :  { %6541 = vmatpush3.msra.mxu0 %v8292_v11  ;;  %6568 = vmatpush3.msra.mxu1 %v8368_v37  ;;  %v8410_v50 = vand.u32 4294901760, %v33_v41  ;;  %v8417_v52 = vand.u32 4294901760, %v161_v39  ;;  %v175_v53 = vsub.f32 %v8349_v30, %v8375_v40  ;;  %v8422_v54 = vand.u32 4294901760, %v8384_v43 }
   0xd   :  { %6542 = vmatprep.subr.mxu0 %v11368_v0  ;;  %6569 = vmatprep.subr.mxu1 %v11368_v0  ;;  %v8428_v56 = vsub.f32 %v35_v26, %v8362_v35  ;;  %v8432_v57 = vand.u32 4294901760, %v168_v42  ;;  %v22_v58 = vadd.f32 %v8406_v49, %v8401_v48  ;;  %v182_v59 = vsub.f32 %v8359_v34, %v8393_v46 }
   0xe   :  { %6543 = vmatpush3.msra.mxu0 %v8294_v12  ;;  %6570 = vmatpush3.msra.mxu1 %v8370_v38  ;;  %11428 = vst [vmem:[#allocation6_spill] sm:$0xff] %v8417_v52  ;;  %v8440_v60 = vand.u32 4294901760, %v32_v51  ;;  %v8443_v61 = vand.u32 4294901760, %v8396_v47  ;;  %v8449_v63 = vsub.f32 %v34_v36, %v8390_v45  ;;  %v8453_v1 = vand.u32 4294901760, %v31_v55 }
   0xf   :  { %6544 = vmatprep.subr.mxu0 %v11368_v0  ;;  %6571 = vmatprep.subr.mxu1 %v11368_v0  ;;  %11429 = vst [vmem:[#allocation7_spill] sm:$0xff] %v8432_v57  ;;  %v23_v2 = vrot.slane %v22_v58, 4  ;;  %v8457_v3 = vand.u32 4294901760, %v175_v53  ;;  %v189_v7 = vsub.f32 %v8384_v43, %v8422_v54  ;;  %v8462_v8 = vand.u32 4294901760, %v8428_v56 }
  0x10   :  { %6545 = vmatpush3.msra.mxu0 %v8309_v17  ;;  %6572 = vmatpush3.msra.mxu1 %v8388_v44  ;;  %v8468_v13 = vsub.f32 %v33_v41, %v8410_v50  ;;  %v8472_v14 = vand.u32 4294901760, %v30_v62  ;;  %v8476_v26 = vand.u32 4294901760, %v182_v59  ;;  %v196_v31 = vsub.f32 %v8396_v47, %v8443_v61 }
  0x11   :  { %6546 = vmatprep.subr.mxu0 %v11368_v0  ;;  %6573 = vmatprep.subr.mxu1 %v11368_v0  ;;  %11430 = vst [vmem:[#allocation8_spill] sm:$0xff] %v8457_v3  ;;  %v24_v19 = vadd.f32 %v23_v2, %v22_v58  ;;  %v8481_v32 = vand.u32 4294901760, %v8449_v63  ;;  %v8484_v33 = vsub.f32 %v32_v51, %v8440_v60  ;;  %v8488_v36 = vand.u32 4294901760, %v29_v9 }
  0x12   :  { %6547 = vmatpush3.msra.mxu0 %v8334_v25  ;;  %6574 = vmatpush3.msra.mxu1 %v8417_v52  ;;  %11431 = vst [vmem:[#allocation9_spill] sm:$0xff] %v8476_v26  ;;  %v8492_v41 = vand.u32 4294901760, %v189_v7  ;;  %v203_v42 = vsub.f32 %v8428_v56, %v8462_v8  ;;  %v8497_v53 = vand.u32 4294901760, %v8468_v13  ;;  %v8500_v51 = vsub.f32 %v31_v55, %v8453_v1 }
  0x13   :  { %6548 = vmatprep.subr.mxu0 %v11368_v0  ;;  %6575 = vmatprep.subr.mxu1 %v11368_v0  ;;  %v25_v39 = vrot.slane %v24_v19, 2  ;;  %v8506_v59 = vand.u32 4294901760, %v196_v31  ;;  %v210_v2 = vsub.f32 %v8449_v63, %v8481_v32  ;;  %v8511_v7 = vand.u32 4294901760, %v8484_v33 }
  0x14   :  { %6549 = vmatpush3.msra.mxu0 %v8343_v28  ;;  %6576 = vmatpush3.msra.mxu1 %v8432_v57  ;;  %11432 = vst [vmem:[#allocation10_spill] sm:$0xff] %v8492_v41  ;;  %v8514_v55 = vsub.f32 %v30_v62, %v8472_v14  ;;  %v8520_v31 = vand.u32 4294901760, %v203_v42  ;;  %v8525_v49 = vand.u32 4294901760, %v8500_v51  ;;  %v8528_v62 = vsub.f32 %v29_v9, %v8488_v36 }
  0x15   :  { %6550 = vmatprep.subr.mxu0 %v11368_v0  ;;  %6577 = vmatprep.subr.mxu1 %v11368_v0  ;;  %v26_v58 = vadd.f32 %v25_v39, %v24_v19  ;;  %11433 = vst [vmem:[#allocation11_spill] sm:$0xff] %v8506_v59  ;;  %11434 = vst [vmem:[#allocation12_spill] sm:$0xff] %v8511_v7  ;;  %v217_v39 = vsub.f32 %v8468_v13, %v8497_v53  ;;  %v8534_v42 = vand.u32 4294901760, %v210_v2 }
  0x16   :  { %6551 = vmatpush3.msra.mxu0 %v8362_v35  ;;  %6578 = vmatpush3.msra.mxu1 %v8457_v3  ;;  %11435 = vst [vmem:[#allocation13_spill] sm:$0xff] %v8520_v31  ;;  %11436 = vst [vmem:[#allocation14_spill] sm:$0xff] %v8525_v49  ;;  %v231_v2 = vsub.f32 %v8500_v51, %v8525_v49 }
  0x17   :  { %6552 = vmatprep.subr.mxu0 %v11368_v0  ;;  %6579 = vmatprep.subr.mxu1 %v11368_v0  ;;  %v27_v19 = vrot.slane %v26_v58, 1  ;;  %11437 = vst [vmem:[#allocation15_spill] sm:$0xff] %v8534_v42 }
  0x18   :  { %6553 = vmatpush3.msra.mxu0 %v8390_v45  ;;  %6580 = vmatpush3.msra.mxu1 %v8476_v26  ;;  %v8539_v26 = vand.u32 4294901760, %v8514_v55 }
  0x19   :  { %6554 = vmatprep.subr.mxu0 %v11368_v0  ;;  %6581 = vmatprep.subr.mxu1 %v11368_v0  ;;  %v28_v48 = vadd.f32 %v27_v19, %v26_v58  ;;  %v8547_v58 = vand.u32 4294901760, %v217_v39  ;;  %v8552_v19 = vand.u32 4294901760, %v8528_v62 }
  0x1a   :  { %6555 = vmatpush3.msra.mxu0 %v8410_v50  ;;  %6582 = vmatpush3.msra.mxu1 %v8492_v41  ;;  %v224_v41 = vsub.f32 %v8484_v33, %v8511_v7  ;;  %11438 = vst [vmem:[#allocation16_spill] sm:$0xff] %v8539_v26  ;;  %v238_v39 = vsub.f32 %v8514_v55, %v8539_v26 }
  0x1b   :  { %6556 = vmatprep.subr.mxu0 %v11368_v0  ;;  %6583 = vmatprep.subr.mxu1 %v11368_v0  ;;  %v8543_v9 = vand.u32 4294901760, %v28_v48  ;;  %11439 = vst [vmem:[#allocation17_spill] sm:$0xff] %v8552_v19 }
  0x1c   :  { %6557 = vmatpush3.msra.mxu0 %v8440_v60  ;;  %6584 = vmatpush3.msra.mxu1 %v8506_v59  ;;  %v8580_v57 = vand.u32 4294901760, %v238_v39 }
  0x1d   :  { %6558 = vmatprep.subr.mxu0 %v11368_v0  ;;  %6585 = vmatprep.subr.mxu1 %v11368_v0  ;;  %v8557_v59 = vsub.f32 %v28_v48, %v8543_v9  ;;  %v8570_v48 = vand.u32 4294901760, %v231_v2 }
  0x1e   :  { %6559 = vmatpush3.msra.mxu0 %v8453_v1  ;;  %6586 = vmatpush3.msra.mxu1 %v8520_v31  ;;  %v8561_v31 = vand.u32 4294901760, %v224_v41 }
  0x1f   :  { %6560 = vmatprep.subr.mxu0 %v11368_v0  ;;  %6587 = vmatprep.subr.mxu1 %v11368_v0  ;;  %v128_v3 = vand.u32 4294901760, %v8557_v59 }
  0x20   :  { %6561 = vmatpush3.msra.mxu0 %v8472_v14  ;;  %6588 = vmatpush3.msra.mxu1 %v8534_v42  ;;  %v245_v42 = vsub.f32 %v8528_v62, %v8552_v19 }
  0x21   :  { %6562 = vmatprep.subr.mxu0 %v11368_v0  ;;  %6589 = vmatprep.subr.mxu1 %v11368_v0  ;;  %v129_v41 = vsub.f32 %v8557_v59, %v128_v3 }
  0x22   :  { %6563 = vmatpush3.msra.mxu0 %v8488_v36  ;;  %6590 = vmatpush3.msra.mxu1 %v8547_v58  ;;  %v8584_v2 = vand.u32 4294901760, %v245_v42  ;;  %v11446_v42 = vld [vmem:[#allocation13_spill] sm:$0xff] }
  0x23   :  { %6591 = vmatprep.subr.mxu1 %v11368_v0  ;;  %6602 = vmatprep.subr.mxu0 %v11368_v0  ;;  %v130_v52 = vand.u32 4294901760, %v129_v41 }
  0x24   :  { %6592 = vmatpush3.msra.mxu1 %v8561_v31 }
  0x25   :  { %6593 = vmatprep.subr.mxu1 %v11368_v0  ;;  %6565 = vmatmul.mubr.f32.vlgmr.msra.gmra.mxu0 %v130_v52  ;;  %v11443_v52 = vld [vmem:[#allocation9_spill] sm:$0xff] }
  0x26   :  { %6594 = vmatpush3.msra.mxu1 %v8570_v48  ;;  %6603 = vmatpush3.msra.mxu0 %v8304_v15 }
  0x27   :  { %6595 = vmatprep.subr.mxu1 %v11368_v0  ;;  %6604 = vmatprep.subr.mxu0 %v11368_v0 }
  0x28   :  { %6596 = vmatpush3.msra.mxu1 %v8580_v57  ;;  %6605 = vmatpush3.msra.mxu0 %v8307_v16 }
  0x29   :  { %6597 = vmatprep.subr.mxu1 %v11368_v0  ;;  %6606 = vmatprep.subr.mxu0 %v11368_v0 }
  0x2a   :  { %6598 = vmatpush3.msra.mxu1 %v8584_v2  ;;  %6607 = vmatpush3.msra.mxu0 %v8312_v18 }
  0x2b   :  { %6600 = vmatmul.mubr.f32.vlgmr.msra.gmra.mxu1 %v8543_v9  ;;  %6637 = vmatprep.subr.mxu1 %v11368_v0 }
  0x2c   :  { %6608 = vmatprep.subr.mxu0 %v11368_v0  ;;  %6638 = vmatpush3.msra.mxu1 %v8271_v4 }
  0x2d   :  { %6609 = vmatpush3.msra.mxu0 %v8319_v20  ;;  %6639 = vmatprep.subr.mxu1 %v11368_v0 }
  0x2e   :  { %6610 = vmatprep.subr.mxu0 %v11368_v0  ;;  %6640 = vmatpush3.msra.mxu1 %v8273_v5 }
  0x2f   :  { %6611 = vmatpush3.msra.mxu0 %v8322_v21  ;;  %6641 = vmatprep.subr.mxu1 %v11368_v0 }
  0x30   :  { %6612 = vmatprep.subr.mxu0 %v11368_v0  ;;  %6642 = vmatpush3.msra.mxu1 %v8275_v6 }
  0x31   :  { %6613 = vmatpush3.msra.mxu0 %v8349_v30  ;;  %6643 = vmatprep.subr.mxu1 %v11368_v0 }
  0x32   :  { %6614 = vmatprep.subr.mxu0 %v11368_v0  ;;  %6644 = vmatpush3.msra.mxu1 %v8290_v10 }
  0x33   :  { %6615 = vmatpush3.msra.mxu0 %v8359_v34  ;;  %6645 = vmatprep.subr.mxu1 %v11368_v0 }
  0x34   :  { %6616 = vmatprep.subr.mxu0 %v11368_v0  ;;  %6646 = vmatpush3.msra.mxu1 %v8292_v11 }
  0x35   :  { %6617 = vmatpush3.msra.mxu0 %v8384_v43  ;;  %6647 = vmatprep.subr.mxu1 %v11368_v0 }
  0x36   :  { %6618 = vmatprep.subr.mxu0 %v11368_v0  ;;  %6648 = vmatpush3.msra.mxu1 %v8294_v12 }
  0x37   :  { %6619 = vmatpush3.msra.mxu0 %v8396_v47  ;;  %6649 = vmatprep.subr.mxu1 %v11368_v0 }
  0x38   :  { %6620 = vmatprep.subr.mxu0 %v11368_v0  ;;  %6650 = vmatpush3.msra.mxu1 %v8309_v17 }
  0x39   :  { %6621 = vmatpush3.msra.mxu0 %v8428_v56  ;;  %6651 = vmatprep.subr.mxu1 %v11368_v0 }
  0x3a   :  { %6622 = vmatprep.subr.mxu0 %v11368_v0  ;;  %6652 = vmatpush3.msra.mxu1 %v8334_v25 }
  0x3b   :  { %6623 = vmatpush3.msra.mxu0 %v8449_v63  ;;  %6653 = vmatprep.subr.mxu1 %v11368_v0 }
  0x3c   :  { %6624 = vmatprep.subr.mxu0 %v11368_v0  ;;  %6654 = vmatpush3.msra.mxu1 %v8343_v28 }
  0x3d   :  { %6625 = vmatpush3.msra.mxu0 %v8468_v13  ;;  %6655 = vmatprep.subr.mxu1 %v11368_v0 }
  0x3e   :  { %6626 = vmatprep.subr.mxu0 %v11368_v0  ;;  %6656 = vmatpush3.msra.mxu1 %v8362_v35 }
  0x3f   :  { %6627 = vmatpush3.msra.mxu0 %v8484_v33  ;;  %6657 = vmatprep.subr.mxu1 %v11368_v0 }
  0x40   :  { %6628 = vmatprep.subr.mxu0 %v11368_v0  ;;  %6658 = vmatpush3.msra.mxu1 %v8390_v45 }
  0x41   :  { %6629 = vmatpush3.msra.mxu0 %v8500_v51  ;;  %6659 = vmatprep.subr.mxu1 %v11368_v0 }
  0x42   :  { %6630 = vmatprep.subr.mxu0 %v11368_v0  ;;  %6634 = vmatprep.mubr.msk.f32.mxu0 %vm8225_vm0, %v11368_v0 }
  0x43   :  { %6631 = vmatpush3.msra.mxu0 %v8514_v55  ;;  %6660 = vmatpush3.msra.mxu1 %v8410_v50 }
  0x44   :  { %6632 = vmatprep.subr.mxu0 %v11368_v0  ;;  %6661 = vmatprep.subr.mxu1 %v11368_v0 }
  0x45   :  { %6633 = vmatpush3.msra.mxu0 %v8528_v62  ;;  %6662 = vmatpush3.msra.mxu1 %v8440_v60 }
  0x46   :  { %6635 = vmatmul.mubr.f32.vlgmr.msra.gmra.mxu0 %v8557_v59  ;;  %6672 = vmatprep.subr.mxu0 %v11368_v0  ;;  %v11445_v59 = vld [vmem:[#allocation11_spill] sm:$0xff] }
  0x47   :  { %6673 = vmatpush3.msra.mxu0 %v8326_v22  ;;  %6663 = vmatprep.subr.mxu1 %v11368_v0 }
  0x48   :  { %6674 = vmatprep.subr.mxu0 %v11368_v0  ;;  %6664 = vmatpush3.msra.mxu1 %v8453_v1 }
  0x49   :  { %6675 = vmatpush3.msra.mxu0 %v8329_v23  ;;  %6665 = vmatprep.subr.mxu1 %v11368_v0 }
  0x4a   :  { %6676 = vmatprep.subr.mxu0 %v11368_v0  ;;  %6666 = vmatpush3.msra.mxu1 %v8472_v14 }
  0x4b   :  { %6677 = vmatpush3.msra.mxu0 %v8332_v24  ;;  %6667 = vmatprep.subr.mxu1 %v11368_v0 }
  0x4c   :  { %6678 = vmatprep.subr.mxu0 %v11368_v0  ;;  %6668 = vmatpush3.msra.mxu1 %v8488_v36 }
  0x4d   :  { %6669 = vmatprep.mubr.msk.f32.mxu1 %vm8225_vm0, %v11368_v0  ;;  %6679 = vmatpush3.msra.mxu0 %v8341_v27 }
  0x4e   :  { %6670 = vmatmul.mubr.f32.vlgmr.msra.gmra.mxu1 %v128_v3  ;;  %6680 = vmatprep.subr.mxu0 %v11368_v0  ;;  %v11444_v3 = vld [vmem:[#allocation10_spill] sm:$0xff] }
  0x4f   :  { %6707 = vmatprep.subr.mxu1 %v11368_v0  ;;  %6681 = vmatpush3.msra.mxu0 %v8346_v29 }
  0x50   :  { %6708 = vmatpush3.msra.mxu1 %v8271_v4  ;;  %6682 = vmatprep.subr.mxu0 %v11368_v0 }
  0x51   :  { %6709 = vmatprep.subr.mxu1 %v11368_v0  ;;  %6683 = vmatpush3.msra.mxu0 %v8375_v40 }
  0x52   :  { %6710 = vmatpush3.msra.mxu1 %v8273_v5  ;;  %6684 = vmatprep.subr.mxu0 %v11368_v0 }
  0x53   :  { %6711 = vmatprep.subr.mxu1 %v11368_v0  ;;  %6685 = vmatpush3.msra.mxu0 %v8393_v46 }
  0x54   :  { %6712 = vmatpush3.msra.mxu1 %v8275_v6  ;;  %6686 = vmatprep.subr.mxu0 %v11368_v0 }
  0x55   :  { %6713 = vmatprep.subr.mxu1 %v11368_v0  ;;  %6687 = vmatpush3.msra.mxu0 %v8422_v54 }
  0x56   :  { %6714 = vmatpush3.msra.mxu1 %v8290_v10  ;;  %6688 = vmatprep.subr.mxu0 %v11368_v0 }
  0x57   :  { %6715 = vmatprep.subr.mxu1 %v11368_v0  ;;  %6689 = vmatpush3.msra.mxu0 %v8443_v61 }
  0x58   :  { %6716 = vmatpush3.msra.mxu1 %v8292_v11  ;;  %6690 = vmatprep.subr.mxu0 %v11368_v0 }
  0x59   :  { %6717 = vmatprep.subr.mxu1 %v11368_v0  ;;  %6691 = vmatpush3.msra.mxu0 %v8462_v8 }
  0x5a   :  { %6718 = vmatpush3.msra.mxu1 %v8294_v12  ;;  %6692 = vmatprep.subr.mxu0 %v11368_v0 }
  0x5b   :  { %6719 = vmatprep.subr.mxu1 %v11368_v0  ;;  %6693 = vmatpush3.msra.mxu0 %v8481_v32 }
  0x5c   :  { %6720 = vmatpush3.msra.mxu1 %v8309_v17  ;;  %6694 = vmatprep.subr.mxu0 %v11368_v0 }
  0x5d   :  { %6721 = vmatprep.subr.mxu1 %v11368_v0  ;;  %6695 = vmatpush3.msra.mxu0 %v8497_v53 }
  0x5e   :  { %6722 = vmatpush3.msra.mxu1 %v8334_v25  ;;  %6696 = vmatprep.subr.mxu0 %v11368_v0 }
  0x5f   :  { %6723 = vmatprep.subr.mxu1 %v11368_v0  ;;  %6697 = vmatpush3.msra.mxu0 %v8511_v7 }
  0x60   :  { %6724 = vmatpush3.msra.mxu1 %v8343_v28  ;;  %6698 = vmatprep.subr.mxu0 %v11368_v0 }
  0x61   :  { %6725 = vmatprep.subr.mxu1 %v11368_v0  ;;  %6699 = vmatpush3.msra.mxu0 %v8525_v49 }
  0x62   :  { %6726 = vmatpush3.msra.mxu1 %v8362_v35  ;;  %6700 = vmatprep.subr.mxu0 %v11368_v0 }
  0x63   :  { %6727 = vmatprep.subr.mxu1 %v11368_v0  ;;  %6701 = vmatpush3.msra.mxu0 %v8539_v26 }
  0x64   :  { %6728 = vmatpush3.msra.mxu1 %v8390_v45  ;;  %6702 = vmatprep.subr.mxu0 %v11368_v0 }
  0x65   :  { %6729 = vmatprep.subr.mxu1 %v11368_v0  ;;  %6703 = vmatpush3.msra.mxu0 %v8552_v19 }
  0x66   :  { %6704 = vmatprep.mubr.msk.f32.mxu0 %vm8225_vm0, %v11368_v0  ;;  %6730 = vmatpush3.msra.mxu1 %v8410_v50 }
  0x67   :  { %6705 = vmatmul.mubr.f32.vlgmr.msra.gmra.mxu0 %v8543_v9  ;;  %6731 = vmatprep.subr.mxu1 %v11368_v0 }
  0x68   :  { %6732 = vmatpush3.msra.mxu1 %v8440_v60  ;;  %6739 = vmatprep.mubr.msk.f32.mxu1 %vm8225_vm0, %v11368_v0 }
  0x69   :  { %6733 = vmatprep.subr.mxu1 %v11368_v0  ;;  %6742 = vmatprep.subr.mxu0 %v11368_v0 }
  0x6a   :  { %6734 = vmatpush3.msra.mxu1 %v8453_v1  ;;  %6743 = vmatpush3.msra.mxu0 %v8271_v4 }
  0x6b   :  { %6735 = vmatprep.subr.mxu1 %v11368_v0  ;;  %6744 = vmatprep.subr.mxu0 %v11368_v0 }
  0x6c   :  { %6736 = vmatpush3.msra.mxu1 %v8472_v14  ;;  %6745 = vmatpush3.msra.mxu0 %v8273_v5 }
  0x6d   :  { %6737 = vmatprep.subr.mxu1 %v11368_v0  ;;  %6746 = vmatprep.subr.mxu0 %v11368_v0 }
  0x6e   :  { %6738 = vmatpush3.msra.mxu1 %v8488_v36  ;;  %6747 = vmatpush3.msra.mxu0 %v8275_v6 }
  0x6f   :  { %6740 = vmatmul.mubr.f32.vlgmr.msra.gmra.mxu1 %v8543_v9  ;;  %6777 = vmatprep.subr.mxu1 %v11368_v0  ;;  %v11447_v9 = vld [vmem:[#allocation15_spill] sm:$0xff] }
  0x70   :  { %6778 = vmatpush3.msra.mxu1 %v8368_v37  ;;  %6748 = vmatprep.subr.mxu0 %v11368_v0  ;;  %v11440_v37 = vld [vmem:[#allocation6_spill] sm:$0xff] }
  0x71   :  { %6779 = vmatprep.subr.mxu1 %v11368_v0  ;;  %6749 = vmatpush3.msra.mxu0 %v8290_v10 }
  0x72   :  { %6780 = vmatpush3.msra.mxu1 %v8370_v38  ;;  %6750 = vmatprep.subr.mxu0 %v11368_v0  ;;  %v11441_v38 = vld [vmem:[#allocation7_spill] sm:$0xff] }
  0x73   :  { %6781 = vmatprep.subr.mxu1 %v11368_v0  ;;  %6751 = vmatpush3.msra.mxu0 %v8292_v11 }
  0x74   :  { %6782 = vmatpush3.msra.mxu1 %v8388_v44  ;;  %6752 = vmatprep.subr.mxu0 %v11368_v0  ;;  %v11442_v44 = vld [vmem:[#allocation8_spill] sm:$0xff] }
  0x75   :  { %6783 = vmatprep.subr.mxu1 %v11368_v0  ;;  %6753 = vmatpush3.msra.mxu0 %v8294_v12 }
  0x76   :  { %6784 = vmatpush3.msra.mxu1 %v11440_v37  ;;  %6754 = vmatprep.subr.mxu0 %v11368_v0 }
  0x77   :  { %6785 = vmatprep.subr.mxu1 %v11368_v0  ;;  %6755 = vmatpush3.msra.mxu0 %v8309_v17 }
  0x78   :  { %6786 = vmatpush3.msra.mxu1 %v11441_v38  ;;  %6756 = vmatprep.subr.mxu0 %v11368_v0 }
  0x79   :  { %6787 = vmatprep.subr.mxu1 %v11368_v0  ;;  %6757 = vmatpush3.msra.mxu0 %v8334_v25 }
  0x7a   :  { %6788 = vmatpush3.msra.mxu1 %v11442_v44  ;;  %6758 = vmatprep.subr.mxu0 %v11368_v0 }
  0x7b   :  { %6789 = vmatprep.subr.mxu1 %v11368_v0  ;;  %6759 = vmatpush3.msra.mxu0 %v8343_v28 }
  0x7c   :  { %6790 = vmatpush3.msra.mxu1 %v11443_v52  ;;  %6760 = vmatprep.subr.mxu0 %v11368_v0 }
  0x7d   :  { %6791 = vmatprep.subr.mxu1 %v11368_v0  ;;  %6761 = vmatpush3.msra.mxu0 %v8362_v35 }
  0x7e   :  { %6792 = vmatpush3.msra.mxu1 %v11444_v3  ;;  %6762 = vmatprep.subr.mxu0 %v11368_v0 }
  0x7f   :  { %6793 = vmatprep.subr.mxu1 %v11368_v0  ;;  %6763 = vmatpush3.msra.mxu0 %v8390_v45 }
  0x80   :  { %6794 = vmatpush3.msra.mxu1 %v11445_v59  ;;  %6764 = vmatprep.subr.mxu0 %v11368_v0  ;;  %v687_v59 = vlaneseq }
  0x81   :  { %6795 = vmatprep.subr.mxu1 %v11368_v0  ;;  %6765 = vmatpush3.msra.mxu0 %v8410_v50 }
  0x82   :  { %6796 = vmatpush3.msra.mxu1 %v11446_v42  ;;  %6766 = vmatprep.subr.mxu0 %v11368_v0  ;;  %v8801_v19 = vshrl.u32 %v687_v59, 7 }
  0x83   :  { %6797 = vmatprep.subr.mxu1 %v11368_v0  ;;  %6809 = vmatprep.mubr.msk.f32.mxu1 %vm8225_vm0, %v11368_v0 }
  0x84   :  { %6798 = vmatpush3.msra.mxu1 %v11447_v9  ;;  %6767 = vmatpush3.msra.mxu0 %v8440_v60 }
  0x85   :  { %6799 = vmatprep.subr.mxu1 %v11368_v0  ;;  %6768 = vmatprep.subr.mxu0 %v11368_v0 }
  0x86   :  { %6800 = vmatpush3.msra.mxu1 %v8547_v58  ;;  %6769 = vmatpush3.msra.mxu0 %v8453_v1 }
  0x87   :  { %6801 = vmatprep.subr.mxu1 %v11368_v0  ;;  %6770 = vmatprep.subr.mxu0 %v11368_v0 }
  0x88   :  { %6802 = vmatpush3.msra.mxu1 %v8561_v31  ;;  %6771 = vmatpush3.msra.mxu0 %v8472_v14 }
  0x89   :  { %6803 = vmatprep.subr.mxu1 %v11368_v0  ;;  %6772 = vmatprep.subr.mxu0 %v11368_v0 }
  0x8a   :  { %6804 = vmatpush3.msra.mxu1 %v8570_v48  ;;  %6773 = vmatpush3.msra.mxu0 %v8488_v36 }
  0x8b   :  { %6805 = vmatprep.subr.mxu1 %v11368_v0  ;;  %6774 = vmatprep.mubr.msk.f32.mxu0 %vm8225_vm0, %v11368_v0 }
  0x8c   :  { %6806 = vmatpush3.msra.mxu1 %v8580_v57  ;;  %6812 = vmatprep.subr.mxu0 %v11368_v0 }
  0x8d   :  { %6807 = vmatprep.subr.mxu1 %v11368_v0 }
  0x8e   :  { %6808 = vmatpush3.msra.mxu1 %v8584_v2 }
  0x8f   :  { %6847 = vmatprep.subr.mxu1 %v11368_v0  ;;  %v11371_v0 = vsub.s32 0, %v8801_v19 }
  0xe5   :  { %v132_v31 = vpop.f32.mrf.mxu0 }
  0xe7   :  { %v6566_v58 = vpop.f32.mrf.mxu0 }
  0xeb   :  { %v283_v39 = vpop.f32.mrf.mxu1 }
  0xec   :  { %v284_v3 = vadd.f32 %v283_v39, %v132_v31  ;;  %v11449_v31 = vld [vmem:[#allocation5_spill] sm:$0xff] }
  0xed   :  { %v6601_v48 = vpop.f32.mrf.mxu1 }
 0x106   :  { %v387_v41 = vpop.f32.mrf.mxu0 }
 0x107   :  { %v388_v42 = vadd.f32 %v387_v41, %v284_v3 }
 0x108   :  { %v6636_v37 = vpop.f32.mrf.mxu0 }
 0x109   :  { %v11448_v37 = vld [vmem:[#allocation4_spill] sm:$0xff] }
 0x10e   :  { %v476_v38 = vpop.f32.mrf.mxu1 }
 0x10f   :  { %v477_v9 = vadd.f32 %v476_v38, %v388_v42 }
 0x110   :  { %v6671_v44 = vpop.f32.mrf.mxu1 }
 0x127   :  { %v595_v52 = vpop.f32.mrf.mxu0 }
 0x128   :  { %v596_v26 = vadd.f32 %v595_v52, %v477_v9 }
 0x129   :  { %v6706_v57 = vpop.f32.mrf.mxu0 }
 0x12f   :  { %v682_v2 = vpop.f32.mrf.mxu1 }
 0x130   :  { %v683_v49 = vadd.f32 %v682_v2, %v596_v26  ;;  %v11450_v2 = vmov 0.0  }
 0x131   :  { %v6741_v58 = vpop.f32.mrf.mxu1 }
 0x132   :  { %v686_v7 = vmul.f32 0.001953125, %v683_v49 }
 0x134   :  { %v690_v48 = vrot.slane %v686_v7, %v11371_v0 }
 0x136   :  { %v8807_v44 = vsub.f32 %v11448_v37, %v690_v48  ;;  %v8810_v39 = vsub.f32 %v11449_v31, %v690_v48 }
 0x138   :  { %v693_v41 = vmul.f32 %v8807_v44, %v8807_v44  ;;  %v694_v38 = vmul.f32 %v8810_v39, %v8810_v39 }
 0x13a   :  { %v695_v26 = vadd.f32 %v694_v38, %v693_v41 }
 0x13c   :  { %v696_v52 = vrot.slane %v695_v26, 4 }
 0x13e   :  { %v697_v3 = vadd.f32 %v696_v52, %v695_v26  ;;  %v5620_v52 = vld [vmem:[%s11351_s3 + $0xb0] sm:$0xff] }
 0x140   :  { %v698_v59 = vrot.slane %v697_v3, 2 }
 0x142   :  { %v699_v49 = vadd.f32 %v698_v59, %v697_v3 }
 0x144   :  { %v700_v57 = vrot.slane %v699_v49, 1 }
 0x146   :  { %v701_v42 = vadd.f32 %v700_v57, %v699_v49 }
 0x148   :  { %v8816_v7 = vand.u32 4294901760, %v701_v42 }
 0x14a   :  { %v8819_v9 = vsub.f32 %v701_v42, %v8816_v7  ;;  %6810 = vmatmul.mubr.f32.vlgmr.msra.gmra.mxu1 %v8816_v7  ;;  %v9090_v42 = vand.u32 4294901760, %v5620_v52 }
 0x14b   :  { %6848 = vmatpush3.msra.mxu1 %v8271_v4  ;;  %6879 = vmatprep.mubr.msk.f32.mxu1 %vm8225_vm0, %v11450_v2 }
 0x14c   :  { %6849 = vmatprep.subr.mxu1 %v11450_v2  ;;  %v785_v58 = vand.u32 4294901760, %v8819_v9 }
 0x14d   :  { %6850 = vmatpush3.msra.mxu1 %v8273_v5 }
 0x14e   :  { %6851 = vmatprep.subr.mxu1 %v11450_v2  ;;  %v786_v48 = vsub.f32 %v8819_v9, %v785_v58 }
 0x14f   :  { %6852 = vmatpush3.msra.mxu1 %v8275_v6 }
 0x150   :  { %6853 = vmatprep.subr.mxu1 %v11450_v2  ;;  %v787_v37 = vand.u32 4294901760, %v786_v48 }
 0x151   :  { %6854 = vmatpush3.msra.mxu1 %v8290_v10 }
 0x152   :  { %6855 = vmatprep.subr.mxu1 %v11450_v2  ;;  %6775 = vmatmul.mubr.f32.vlgmr.msra.gmra.mxu0 %v787_v37  ;;  %v9105_v37 = vsub.f32 %v5620_v52, %v9090_v42  ;;  %v5614_v52 = vld [vmem:[%s11351_s3 + $0x80] sm:$0xff] }
 0x153   :  { %6813 = vmatpush3.msra.mxu0 %v8304_v15  ;;  %6856 = vmatpush3.msra.mxu1 %v8292_v11  ;;  %v5628_v15 = vld [vmem:[%s11351_s3 + $0xf0] sm:$0xff] }
 0x154   :  { %6814 = vmatprep.subr.mxu0 %v11450_v2  ;;  %6857 = vmatprep.subr.mxu1 %v11450_v2 }
 0x155   :  { %6815 = vmatpush3.msra.mxu0 %v8307_v16  ;;  %6858 = vmatpush3.msra.mxu1 %v8294_v12 }
 0x156   :  { %6816 = vmatprep.subr.mxu0 %v11450_v2  ;;  %6859 = vmatprep.subr.mxu1 %v11450_v2 }
 0x157   :  { %6817 = vmatpush3.msra.mxu0 %v8312_v18  ;;  %6860 = vmatpush3.msra.mxu1 %v8309_v17  ;;  %v5627_v18 = vld [vmem:[%s11351_s3 + $0xe8] sm:$0xff] }
 0x158   :  { %6818 = vmatprep.subr.mxu0 %v11450_v2  ;;  %6861 = vmatprep.subr.mxu1 %v11450_v2 }
 0x159   :  { %6819 = vmatpush3.msra.mxu0 %v8319_v20  ;;  %6862 = vmatpush3.msra.mxu1 %v8334_v25 }
 0x15a   :  { %6820 = vmatprep.subr.mxu0 %v11450_v2  ;;  %6863 = vmatprep.subr.mxu1 %v11450_v2 }
 0x15b   :  { %6821 = vmatpush3.msra.mxu0 %v8322_v21  ;;  %6864 = vmatpush3.msra.mxu1 %v8343_v28 }
 0x15c   :  { %6822 = vmatprep.subr.mxu0 %v11450_v2  ;;  %6865 = vmatprep.subr.mxu1 %v11450_v2 }
 0x15d   :  { %6823 = vmatpush3.msra.mxu0 %v8349_v30  ;;  %6866 = vmatpush3.msra.mxu1 %v8362_v35 }
 0x15e   :  { %6824 = vmatprep.subr.mxu0 %v11450_v2  ;;  %6867 = vmatprep.subr.mxu1 %v11450_v2 }
 0x15f   :  { %6825 = vmatpush3.msra.mxu0 %v8359_v34  ;;  %6868 = vmatpush3.msra.mxu1 %v8390_v45 }
 0x160   :  { %6826 = vmatprep.subr.mxu0 %v11450_v2  ;;  %6869 = vmatprep.subr.mxu1 %v11450_v2 }
 0x161   :  { %6827 = vmatpush3.msra.mxu0 %v8384_v43  ;;  %6870 = vmatpush3.msra.mxu1 %v8410_v50 }
 0x162   :  { %6828 = vmatprep.subr.mxu0 %v11450_v2  ;;  %6871 = vmatprep.subr.mxu1 %v11450_v2 }
 0x163   :  { %6829 = vmatpush3.msra.mxu0 %v8396_v47  ;;  %6872 = vmatpush3.msra.mxu1 %v8440_v60 }
 0x164   :  { %6830 = vmatprep.subr.mxu0 %v11450_v2  ;;  %6873 = vmatprep.subr.mxu1 %v11450_v2 }
 0x165   :  { %6831 = vmatpush3.msra.mxu0 %v8428_v56  ;;  %6874 = vmatpush3.msra.mxu1 %v8453_v1 }
 0x166   :  { %6832 = vmatprep.subr.mxu0 %v11450_v2  ;;  %6875 = vmatprep.subr.mxu1 %v11450_v2 }
 0x167   :  { %6833 = vmatpush3.msra.mxu0 %v8449_v63  ;;  %6876 = vmatpush3.msra.mxu1 %v8472_v14 }
 0x168   :  { %6834 = vmatprep.subr.mxu0 %v11450_v2  ;;  %6877 = vmatprep.subr.mxu1 %v11450_v2 }
 0x169   :  { %6835 = vmatpush3.msra.mxu0 %v8468_v13  ;;  %6878 = vmatpush3.msra.mxu1 %v8488_v36 }
 0x16a   :  { %6836 = vmatprep.subr.mxu0 %v11450_v2  ;;  %6880 = vmatmul.mubr.f32.vlgmr.msra.gmra.mxu1 %v785_v58 }
 0x16b   :  { %6917 = vmatprep.subr.mxu1 %v11450_v2  ;;  %6837 = vmatpush3.msra.mxu0 %v8484_v33 }
 0x16c   :  { %6918 = vmatpush3.msra.mxu1 %v8271_v4  ;;  %6838 = vmatprep.subr.mxu0 %v11450_v2  ;;  %v11451_v4 = vld [vmem:[#allocation12_spill] sm:$0xff] }
 0x16d   :  { %6919 = vmatprep.subr.mxu1 %v11450_v2  ;;  %6839 = vmatpush3.msra.mxu0 %v8500_v51 }
 0x16e   :  { %6920 = vmatpush3.msra.mxu1 %v8273_v5  ;;  %6840 = vmatprep.subr.mxu0 %v11450_v2  ;;  %v11452_v5 = vld [vmem:[#allocation14_spill] sm:$0xff] }
 0x16f   :  { %6921 = vmatprep.subr.mxu1 %v11450_v2  ;;  %6841 = vmatpush3.msra.mxu0 %v8514_v55  ;;  %v5621_v55 = vld [vmem:[%s11351_s3 + $0xb8] sm:$0xff] }
 0x170   :  { %6922 = vmatpush3.msra.mxu1 %v8275_v6  ;;  %6842 = vmatprep.subr.mxu0 %v11450_v2  ;;  %v11453_v6 = vld [vmem:[#allocation16_spill] sm:$0xff]  ;;  %v9074_v38 = vand.u32 4294901760, %v5621_v55 }
 0x171   :  { %6923 = vmatprep.subr.mxu1 %v11450_v2  ;;  %6843 = vmatpush3.msra.mxu0 %v8528_v62 }
 0x172   :  { %6844 = vmatprep.mubr.msk.f32.mxu0 %vm8225_vm0, %v11450_v2  ;;  %6924 = vmatpush3.msra.mxu1 %v8290_v10  ;;  %v11454_v10 = vld [vmem:[#allocation17_spill] sm:$0xff]  ;;  %v9087_v57 = vsub.f32 %v5621_v55, %v9074_v38 }
 0x173   :  { %6845 = vmatmul.mubr.f32.vlgmr.msra.gmra.mxu0 %v8819_v9  ;;  %6882 = vmatprep.subr.mxu0 %v11450_v2 }
 0x174   :  { %6925 = vmatprep.subr.mxu1 %v11450_v2  ;;  %6883 = vmatpush3.msra.mxu0 %v8326_v22  ;;  %v8985_v22 = vand.u32 4294901760, %v5627_v18  ;;  %v9099_v58 = vand.u32 4294901760, %v9087_v57 }
 0x175   :  { %6926 = vmatpush3.msra.mxu1 %v8292_v11  ;;  %6884 = vmatprep.subr.mxu0 %v11450_v2  ;;  %v5629_v11 = vld [vmem:[%s11351_s3 + $0xf8] sm:$0xff] }
 0x176   :  { %6927 = vmatprep.subr.mxu1 %v11450_v2  ;;  %6885 = vmatpush3.msra.mxu0 %v8329_v23  ;;  %v5626_v23 = vld [vmem:[%s11351_s3 + $0xe0] sm:$0xff] }
 0x177   :  { %6928 = vmatpush3.msra.mxu1 %v8294_v12  ;;  %6886 = vmatprep.subr.mxu0 %v11450_v2  ;;  %v8964_v12 = vand.u32 4294901760, %v5629_v11 }
 0x178   :  { %6929 = vmatprep.subr.mxu1 %v11450_v2  ;;  %6887 = vmatpush3.msra.mxu0 %v8332_v24 }
 0x179   :  { %6930 = vmatpush3.msra.mxu1 %v8309_v17  ;;  %6888 = vmatprep.subr.mxu0 %v11450_v2  ;;  %v8970_v16 = vsub.f32 %v5629_v11, %v8964_v12  ;;  %v8972_v17 = vand.u32 4294901760, %v5628_v15 }
 0x17a   :  { %6931 = vmatprep.subr.mxu1 %v11450_v2  ;;  %6889 = vmatpush3.msra.mxu0 %v8341_v27  ;;  %v8998_v27 = vsub.f32 %v5627_v18, %v8985_v22  ;;  %v5617_v18 = vld [vmem:[%s11351_s3 + $0x98] sm:$0xff] }
 0x17b   :  { %6932 = vmatpush3.msra.mxu1 %v8334_v25  ;;  %6890 = vmatprep.subr.mxu0 %v11450_v2  ;;  %v8980_v20 = vand.u32 4294901760, %v8970_v16  ;;  %v8983_v21 = vsub.f32 %v5628_v15, %v8972_v17  ;;  %v9120_v15 = vand.u32 4294901760, %v9105_v37 }
 0x17c   :  { %6933 = vmatprep.subr.mxu1 %v11450_v2  ;;  %6891 = vmatpush3.msra.mxu0 %v8346_v29  ;;  %v5625_v29 = vld [vmem:[%s11351_s3 + $0xd8] sm:$0xff] }
 0x17d   :  { %6934 = vmatpush3.msra.mxu1 %v8343_v28  ;;  %6892 = vmatprep.subr.mxu0 %v11450_v2  ;;  %v1507_v24 = vsub.f32 %v8970_v16, %v8980_v20  ;;  %v8995_v25 = vand.u32 4294901760, %v8983_v21  ;;  %v9000_v28 = vand.u32 4294901760, %v5626_v23  ;;  %v9016_v43 = vand.u32 4294901760, %v5625_v29  ;;  %11455 = vst [vmem:[#allocation6_spill] sm:$0xff] %v9120_v15 }
 0x17e   :  { %6935 = vmatprep.subr.mxu1 %v11450_v2  ;;  %6893 = vmatpush3.msra.mxu0 %v8375_v40 }
 0x17f   :  { %6936 = vmatpush3.msra.mxu1 %v8362_v35  ;;  %6894 = vmatprep.subr.mxu0 %v11450_v2  ;;  %v1508_v30 = vand.u32 4294901760, %v1507_v24  ;;  %v1514_v34 = vsub.f32 %v8983_v21, %v8995_v25  ;;  %v9010_v35 = vand.u32 4294901760, %v8998_v27  ;;  %v9013_v40 = vsub.f32 %v5626_v23, %v9000_v28 }
 0x180   :  { %6937 = vmatprep.subr.mxu1 %v11450_v2  ;;  %6895 = vmatpush3.msra.mxu0 %v8393_v46  ;;  %v9030_v56 = vsub.f32 %v5625_v29, %v9016_v43 }
 0x181   :  { %6938 = vmatpush3.msra.mxu1 %v8390_v45  ;;  %6896 = vmatprep.subr.mxu0 %v11450_v2  ;;  %v5624_v45 = vld [vmem:[%s11351_s3 + $0xd0] sm:$0xff]  ;;  %v1515_v46 = vand.u32 4294901760, %v1514_v34  ;;  %v1521_v47 = vsub.f32 %v8998_v27, %v9010_v35  ;;  %v1570_v34 = vsub.f32 %v9105_v37, %v9120_v15 }
 0x182   :  { %6939 = vmatprep.subr.mxu1 %v11450_v2  ;;  %6897 = vmatpush3.msra.mxu0 %v8422_v54  ;;  %v9027_v54 = vand.u32 4294901760, %v5624_v45  ;;  %v9045_v13 = vand.u32 4294901760, %v9030_v56 }
 0x183   :  { %6940 = vmatpush3.msra.mxu1 %v8410_v50  ;;  %6898 = vmatprep.subr.mxu0 %v11450_v2  ;;  %v9025_v50 = vand.u32 4294901760, %v9013_v40 }
 0x184   :  { %6941 = vmatprep.subr.mxu1 %v11450_v2  ;;  %6899 = vmatpush3.msra.mxu0 %v8443_v61  ;;  %v1522_v61 = vand.u32 4294901760, %v1521_v47  ;;  %v1535_v51 = vsub.f32 %v9030_v56, %v9045_v13 }
 0x185   :  { %6942 = vmatpush3.msra.mxu1 %v8440_v60  ;;  %6900 = vmatprep.subr.mxu0 %v11450_v2  ;;  %v5623_v60 = vld [vmem:[%s11351_s3 + $0xc8] sm:$0xff]  ;;  %v1528_v63 = vsub.f32 %v9013_v40, %v9025_v50 }
 0x186   :  { %6943 = vmatprep.subr.mxu1 %v11450_v2  ;;  %6901 = vmatpush3.msra.mxu0 %v8462_v8  ;;  %v9041_v8 = vand.u32 4294901760, %v5623_v60  ;;  %v1536_v26 = vand.u32 4294901760, %v1535_v51 }
 0x187   :  { %6944 = vmatpush3.msra.mxu1 %v8453_v1  ;;  %6902 = vmatprep.subr.mxu0 %v11450_v2  ;;  %v9039_v1 = vsub.f32 %v5624_v45, %v9027_v54  ;;  %v5616_v45 = vld [vmem:[%s11351_s3 + $0x90] sm:$0xff] }
 0x188   :  { %6945 = vmatprep.subr.mxu1 %v11450_v2  ;;  %6903 = vmatpush3.msra.mxu0 %v8481_v32  ;;  %v1529_v32 = vand.u32 4294901760, %v1528_v63  ;;  %v1571_v63 = vand.u32 4294901760, %v1570_v34 }
 0x189   :  { %6946 = vmatpush3.msra.mxu1 %v8472_v14  ;;  %6904 = vmatprep.subr.mxu0 %v11450_v2  ;;  %v5622_v14 = vld [vmem:[%s11351_s3 + $0xc0] sm:$0xff]  ;;  %v9052_v33 = vand.u32 4294901760, %v9039_v1 }
 0x18a   :  { %6947 = vmatprep.subr.mxu1 %v11450_v2  ;;  %6905 = vmatpush3.msra.mxu0 %v8497_v53  ;;  %v9057_v53 = vand.u32 4294901760, %v5622_v14 }
 0x18b   :  { %6948 = vmatpush3.msra.mxu1 %v8488_v36  ;;  %6949 = vmatprep.mubr.msk.f32.mxu1 %vm8225_vm0, %v11450_v2  ;;  %v9055_v36 = vsub.f32 %v5623_v60, %v9041_v8  ;;  %v1542_v62 = vsub.f32 %v9039_v1, %v9052_v33 }
 0x18c   :  { %6906 = vmatprep.subr.mxu0 %v11450_v2  ;;  %6950 = vmatmul.mubr.f32.vlgmr.msra.gmra.mxu1 %v8816_v7  ;;  %v9072_v41 = vsub.f32 %v5622_v14, %v9057_v53  ;;  %v5615_v14 = vld [vmem:[%s11351_s3 + $0x88] sm:$0xff] }
 0x18d   :  { %6907 = vmatpush3.msra.mxu0 %v11451_v4  ;;  %6914 = vmatprep.mubr.msk.f32.mxu0 %vm8225_vm0, %v11450_v2  ;;  %v9069_v31 = vand.u32 4294901760, %v9055_v36  ;;  %v1543_v3 = vand.u32 4294901760, %v1542_v62  ;;  %v5618_v4 = vld [vmem:[%s11351_s3 + $0xa0] sm:$0xff] }
 0x18e   :  { %6908 = vmatprep.subr.mxu0 %v11450_v2  ;;  %6987 = vmatprep.subr.mxu1 %v1508_v30  ;;  %v9084_v49 = vand.u32 4294901760, %v9072_v41  ;;  %v9116_v11 = vand.u32 4294901760, %v5618_v4 }
 0x18f   :  { %6909 = vmatpush3.msra.mxu0 %v11452_v5  ;;  %6988 = vmatpush3.msra.mxu1 %v1508_v30  ;;  %v1549_v59 = vsub.f32 %v9055_v36, %v9069_v31  ;;  %v9132_v30 = vand.u32 4294901760, %v5617_v18 }
 0x190   :  { %6910 = vmatprep.subr.mxu0 %v11450_v2  ;;  %6989 = vmatprep.subr.mxu1 %v1515_v46  ;;  %v9130_v29 = vsub.f32 %v5618_v4, %v9116_v11 }
 0x191   :  { %6911 = vmatpush3.msra.mxu0 %v11453_v6  ;;  %6990 = vmatpush3.msra.mxu1 %v1515_v46  ;;  %v1550_v9 = vand.u32 4294901760, %v1549_v59  ;;  %v1563_v6 = vsub.f32 %v9087_v57, %v9099_v58  ;;  %v9147_v60 = vsub.f32 %v5617_v18, %v9132_v30 }
 0x192   :  { %6912 = vmatprep.subr.mxu0 %v11450_v2  ;;  %6991 = vmatprep.subr.mxu1 %v1522_v61  ;;  %v1556_v2 = vsub.f32 %v9072_v41, %v9084_v49  ;;  %v9144_v47 = vand.u32 4294901760, %v9130_v29 }
 0x193   :  { %6913 = vmatpush3.msra.mxu0 %v11454_v10  ;;  %6992 = vmatpush3.msra.mxu1 %v1522_v61  ;;  %v1564_v23 = vand.u32 4294901760, %v1563_v6  ;;  %v9149_v61 = vand.u32 4294901760, %v5616_v45  ;;  %v9159_v55 = vand.u32 4294901760, %v9147_v60 }
 0x194   :  { %6915 = vmatmul.mubr.f32.vlgmr.msra.gmra.mxu0 %v8816_v7  ;;  %6952 = vmatprep.subr.mxu0 %v8964_v12  ;;  %v5619_v7 = vld [vmem:[%s11351_s3 + $0xa8] sm:$0xff]  ;;  %v1557_v5 = vand.u32 4294901760, %v1556_v2  ;;  %11457 = vst [vmem:[#allocation8_spill] sm:$0xff] %v9144_v47  ;;  %v1584_v51 = vsub.f32 %v9130_v29, %v9144_v47 }
 0x195   :  { %6953 = vmatpush3.msra.mxu0 %v8964_v12  ;;  %6993 = vmatprep.subr.mxu1 %v1529_v32  ;;  %v9101_v48 = vand.u32 4294901760, %v5619_v7  ;;  %11458 = vst [vmem:[#allocation9_spill] sm:$0xff] %v9159_v55  ;;  %v9162_v62 = vsub.f32 %v5616_v45, %v9149_v61  ;;  %v1591_v59 = vsub.f32 %v9147_v60, %v9159_v55 }
 0x196   :  { %6954 = vmatprep.subr.mxu0 %v8972_v17  ;;  %6994 = vmatpush3.msra.mxu1 %v1529_v32 }
 0x197   :  { %6955 = vmatpush3.msra.mxu0 %v8972_v17  ;;  %6995 = vmatprep.subr.mxu1 %v1536_v26  ;;  %v9114_v10 = vsub.f32 %v5619_v7, %v9101_v48  ;;  %v9174_v7 = vand.u32 4294901760, %v9162_v62  ;;  %v1592_v4 = vand.u32 4294901760, %v1591_v59 }
 0x198   :  { %6956 = vmatprep.subr.mxu0 %v8985_v22  ;;  %6996 = vmatpush3.msra.mxu1 %v1536_v26  ;;  %v9165_v26 = vand.u32 4294901760, %v5615_v14 }
 0x199   :  { %6957 = vmatpush3.msra.mxu0 %v8985_v22  ;;  %6997 = vmatprep.subr.mxu1 %v1543_v3  ;;  %v9127_v24 = vand.u32 4294901760, %v9114_v10  ;;  %11459 = vst [vmem:[#allocation10_spill] sm:$0xff] %v9174_v7 }
 0x19a   :  { %6958 = vmatprep.subr.mxu0 %v9000_v28  ;;  %6998 = vmatpush3.msra.mxu1 %v1543_v3  ;;  %v1585_v3 = vand.u32 4294901760, %v1584_v51  ;;  %v9180_v2 = vsub.f32 %v5615_v14, %v9165_v26 }
 0x19b   :  { %6959 = vmatpush3.msra.mxu0 %v9000_v28  ;;  %6999 = vmatprep.subr.mxu1 %v1550_v9  ;;  %11456 = vst [vmem:[#allocation7_spill] sm:$0xff] %v9127_v24  ;;  %v1577_v46 = vsub.f32 %v9114_v10, %v9127_v24 }
 0x19c   :  { %6960 = vmatprep.subr.mxu0 %v9016_v43  ;;  %7000 = vmatpush3.msra.mxu1 %v1550_v9  ;;  %v9176_v9 = vand.u32 4294901760, %v5614_v52  ;;  %v9190_v18 = vand.u32 4294901760, %v9180_v2 }
 0x19d   :  { %6961 = vmatpush3.msra.mxu0 %v9016_v43  ;;  %7001 = vmatprep.subr.mxu1 %v1557_v5  ;;  %v1578_v32 = vand.u32 4294901760, %v1577_v46 }
 0x19e   :  { %6962 = vmatprep.subr.mxu0 %v9027_v54  ;;  %7002 = vmatpush3.msra.mxu1 %v1557_v5  ;;  %v1598_v5 = vsub.f32 %v9162_v62, %v9174_v7  ;;  %v9186_v6 = vsub.f32 %v5614_v52, %v9176_v9  ;;  %11460 = vst [vmem:[#allocation11_spill] sm:$0xff] %v9190_v18 }
 0x19f   :  { %6963 = vmatpush3.msra.mxu0 %v9027_v54  ;;  %7003 = vmatprep.subr.mxu1 %v1564_v23  ;;  %v1605_v45 = vsub.f32 %v9180_v2, %v9190_v18 }
 0x1a0   :  { %6964 = vmatprep.subr.mxu0 %v9041_v8  ;;  %7004 = vmatpush3.msra.mxu1 %v1564_v23  ;;  %v1599_v23 = vand.u32 4294901760, %v1598_v5  ;;  %v9194_v34 = vand.u32 4294901760, %v9186_v6 }
 0x1a1   :  { %6965 = vmatpush3.msra.mxu0 %v9041_v8  ;;  %7005 = vmatprep.subr.mxu1 %v1571_v63 }
 0x1a2   :  { %6966 = vmatprep.subr.mxu0 %v9057_v53  ;;  %7006 = vmatpush3.msra.mxu1 %v1571_v63  ;;  %11461 = vst [vmem:[#allocation13_spill] sm:$0xff] %v9194_v34  ;;  %v1612_v46 = vsub.f32 %v9186_v6, %v9194_v34  ;;  %v1606_v63 = vand.u32 4294901760, %v1605_v45 }
 0x1a3   :  { %6967 = vmatpush3.msra.mxu0 %v9057_v53  ;;  %7007 = vmatprep.subr.mxu1 %v1578_v32 }
 0x1a4   :  { %6968 = vmatprep.subr.mxu0 %v9074_v38  ;;  %7008 = vmatpush3.msra.mxu1 %v1578_v32  ;;  %v1613_v14 = vand.u32 4294901760, %v1612_v46 }
 0x1a5   :  { %6969 = vmatpush3.msra.mxu0 %v9074_v38  ;;  %7009 = vmatprep.subr.mxu1 %v1585_v3 }
 0x1a6   :  { %6970 = vmatprep.subr.mxu0 %v9090_v42  ;;  %7010 = vmatpush3.msra.mxu1 %v1585_v3 }
 0x1a7   :  { %6971 = vmatpush3.msra.mxu0 %v9090_v42  ;;  %7011 = vmatprep.subr.mxu1 %v1592_v4 }
 0x1a8   :  { %6972 = vmatprep.subr.mxu0 %v9101_v48  ;;  %7012 = vmatpush3.msra.mxu1 %v1592_v4 }
 0x1a9   :  { %6973 = vmatpush3.msra.mxu0 %v9101_v48  ;;  %7013 = vmatprep.subr.mxu1 %v1599_v23 }
 0x1aa   :  { %6974 = vmatprep.subr.mxu0 %v9116_v11  ;;  %7014 = vmatpush3.msra.mxu1 %v1599_v23 }
 0x1ab   :  { %6975 = vmatpush3.msra.mxu0 %v9116_v11  ;;  %7015 = vmatprep.subr.mxu1 %v1606_v63 }
 0x1ac   :  { %6976 = vmatprep.subr.mxu0 %v9132_v30  ;;  %7016 = vmatpush3.msra.mxu1 %v1606_v63 }
 0x1ad   :  { %6977 = vmatpush3.msra.mxu0 %v9132_v30  ;;  %7017 = vmatprep.subr.mxu1 %v1613_v14 }
 0x1ae   :  { %6978 = vmatprep.subr.mxu0 %v9149_v61  ;;  %7018 = vmatpush3.msra.mxu1 %v1613_v14 }
 0x1af   :  { %6979 = vmatpush3.msra.mxu0 %v9149_v61  ;;  %7057 = vmatprep.subr.mxu1 %v8964_v12 }
 0x1b0   :  { %6980 = vmatprep.subr.mxu0 %v9165_v26 }
 0x1b1   :  { %6981 = vmatpush3.msra.mxu0 %v9165_v26 }
 0x1b2   :  { %6982 = vmatprep.subr.mxu0 %v9176_v9 }
 0x1b3   :  { %6983 = vmatpush3.msra.mxu0 %v9176_v9 }
 0x1b4   :  { %7022 = vmatprep.subr.mxu0 %v8970_v16 }
 0x20a   :  { %v940_v32 = vpop.f32.mrf.mxu1 }
 0x20c   :  { %v6811_v51 = vpop.f32.mrf.mxu1 }
 0x20d   :  { %v1344_v51 = vld [vmem:[%s11352_s1] sm:$0x1] }
 0x212   :  { %v789_v52 = vpop.f32.mrf.mxu0 }
 0x213   :  { %v941_v34 = vadd.f32 %v940_v32, %v789_v52 }
 0x214   :  { %v6776_v3 = vpop.f32.mrf.mxu0 }
 0x22a   :  { %v1133_v59 = vpop.f32.mrf.mxu1 }
 0x22c   :  { %v6881_v5 = vpop.f32.mrf.mxu1 }
 0x233   :  { %v1044_v4 = vpop.f32.mrf.mxu0 }
 0x234   :  { %v1045_v45 = vadd.f32 %v1044_v4, %v941_v34 }
 0x235   :  { %v6846_v0 = vpop.f32.mrf.mxu0 }
 0x236   :  { %v1134_v23 = vadd.f32 %v1133_v59, %v1045_v45  ;;  %v11462_v0 = vsub.s32 0, %v8801_v19 }
 0x24c   :  { %v1339_v18 = vpop.f32.mrf.mxu1 }
 0x24e   :  { %v6951_v7 = vpop.f32.mrf.mxu1 }
 0x24f   :  { %v5613_v7 = vld [vmem:[%s11352_s1 + $0x1] ss:$0 sm:$0xff] }
 0x254   :  { %v1252_v46 = vpop.f32.mrf.mxu0 }
 0x255   :  { %v1253_v55 = vadd.f32 %v1252_v46, %v1134_v23  ;;  %v1373_v23 = vld [vmem:[%s11351_s3 + $0x30] sm:$0xff]  ;;  %v11466_v46 = vld [vmem:[#allocation9_spill] sm:$0xff] }
 0x256   :  { %v6916_v63 = vpop.f32.mrf.mxu0 }
 0x257   :  { %v1340_v47 = vadd.f32 %v1339_v18, %v1253_v55 }
 0x259   :  { %v1343_v14 = vmul.f32 0.001953125, %v1340_v47 }
 0x25b   :  { %v1345_v24 = vadd.f32 1e-05, %v1343_v14 }
 0x25d   :  { %8214 = vrsqrt.f32 %v1345_v24 }
 0x26a   :  { %v8215_v3 = vpop.eup %8214 }
 0x26b   :  { %v1347_v5 = vmul.f32 %v8215_v3, %v1344_v51 }
 0x26d   :  { %v1351_v15 = vrot.slane %v1347_v5, %v11462_v0  ;;  %v1372_v5 = vld [vmem:[%s11351_s3 + $0x28] sm:$0xff]  ;;  %v9455_v0 = vand.u32 4294901760, %v1373_v23 }
 0x26f   :  { %v1352_v34 = vmul.f32 %v1351_v15, %v8807_v44  ;;  %v1353_v55 = vmul.f32 %v1351_v15, %v8810_v39 }
 0x271   :  { %v1359_v47 = vadd.f32 %v5613_v7, %v1352_v34  ;;  %v1360_v18 = vadd.f32 %v5613_v7, %v1353_v55 }
 0x273   :  { %1363 = vst [vmem:[#allocation2 + $0x1] sm:$0xff] %v1359_v47  ;;  %1364 = vst [vmem:[#allocation2 + $0x9] sm:$0xff] %v1360_v18  ;;  %v9213_v24 = vand.u32 4294901760, %v1359_v47  ;;  %v9215_v32 = vand.u32 4294901760, %v1360_v18 }
 0x275   :  { %7019 = vmatprep.mubr.f32.mxu1 %v9213_v24  ;;  %v9219_v19 = vsub.f32 %v1360_v18, %v9215_v32  ;;  %v1484_v52 = vsub.f32 %v1359_v47, %v9213_v24  ;;  %v1371_v47 = vld [vmem:[%s11351_s3 + $0x20] sm:$0xff] }
 0x276   :  { %7020 = vmatmul.mubr.f32.vlgmr.msra.gmra.mxu1 %v9215_v32  ;;  %v11467_v18 = vld [vmem:[#allocation10_spill] sm:$0xff] }
 0x277   :  { %7058 = vmatpush3.msra.mxu1 %v8964_v12  ;;  %v1485_v44 = vand.u32 4294901760, %v1484_v52  ;;  %v1495_v39 = vand.u32 4294901760, %v9219_v19 }
 0x278   :  { %7059 = vmatprep.subr.mxu1 %v8972_v17 }
 0x279   :  { %7060 = vmatpush3.msra.mxu1 %v8972_v17  ;;  %7089 = vmatprep.mubr.f32.mxu1 %v1485_v44  ;;  %v1486_v15 = vsub.f32 %v1484_v52, %v1485_v44  ;;  %v1496_v59 = vsub.f32 %v9219_v19, %v1495_v39 }
 0x27a   :  { %7061 = vmatprep.subr.mxu1 %v8985_v22 }
 0x27b   :  { %7062 = vmatpush3.msra.mxu1 %v8985_v22  ;;  %v1487_v4 = vand.u32 4294901760, %v1486_v15  ;;  %v1497_v45 = vand.u32 4294901760, %v1496_v59  ;;  %v1370_v15 = vld [vmem:[%s11351_s3 + $0x18] sm:$0xff]  ;;  %v11468_v59 = vld [vmem:[#allocation11_spill] sm:$0xff] }
 0x27c   :  { %7063 = vmatprep.subr.mxu1 %v9000_v28 }
 0x27d   :  { %7064 = vmatpush3.msra.mxu1 %v9000_v28  ;;  %6984 = vmatprep.mubr.f32.mxu0 %v1487_v4 }
 0x27e   :  { %7065 = vmatprep.subr.mxu1 %v9016_v43  ;;  %6985 = vmatmul.mubr.f32.vlgmr.msra.gmra.mxu0 %v1497_v45  ;;  %v9487_v45 = vsub.f32 %v1373_v23, %v9455_v0 }
 0x27f   :  { %7023 = vmatpush3.msra.mxu0 %v8970_v16  ;;  %7066 = vmatpush3.msra.mxu1 %v9016_v43 }
 0x280   :  { %7024 = vmatprep.subr.mxu0 %v8983_v21  ;;  %7054 = vmatprep.mubr.f32.mxu0 %v1484_v52 }
 0x281   :  { %7067 = vmatprep.subr.mxu1 %v9027_v54  ;;  %7025 = vmatpush3.msra.mxu0 %v8983_v21 }
 0x282   :  { %7068 = vmatpush3.msra.mxu1 %v9027_v54  ;;  %7026 = vmatprep.subr.mxu0 %v8998_v27 }
 0x283   :  { %7069 = vmatprep.subr.mxu1 %v9041_v8  ;;  %7027 = vmatpush3.msra.mxu0 %v8998_v27 }
 0x284   :  { %7070 = vmatpush3.msra.mxu1 %v9041_v8  ;;  %7028 = vmatprep.subr.mxu0 %v9013_v40 }
 0x285   :  { %7071 = vmatprep.subr.mxu1 %v9057_v53  ;;  %7029 = vmatpush3.msra.mxu0 %v9013_v40 }
 0x286   :  { %7072 = vmatpush3.msra.mxu1 %v9057_v53  ;;  %7030 = vmatprep.subr.mxu0 %v9030_v56 }
 0x287   :  { %7073 = vmatprep.subr.mxu1 %v9074_v38  ;;  %7031 = vmatpush3.msra.mxu0 %v9030_v56 }
 0x288   :  { %7074 = vmatpush3.msra.mxu1 %v9074_v38  ;;  %7032 = vmatprep.subr.mxu0 %v9039_v1 }
 0x289   :  { %7075 = vmatprep.subr.mxu1 %v9090_v42  ;;  %7033 = vmatpush3.msra.mxu0 %v9039_v1 }
 0x28a   :  { %7076 = vmatpush3.msra.mxu1 %v9090_v42  ;;  %7034 = vmatprep.subr.mxu0 %v9055_v36 }
 0x28b   :  { %7077 = vmatprep.subr.mxu1 %v9101_v48  ;;  %7035 = vmatpush3.msra.mxu0 %v9055_v36 }
 0x28c   :  { %7078 = vmatpush3.msra.mxu1 %v9101_v48  ;;  %7036 = vmatprep.subr.mxu0 %v9072_v41 }
 0x28d   :  { %7079 = vmatprep.subr.mxu1 %v9116_v11  ;;  %7037 = vmatpush3.msra.mxu0 %v9072_v41  ;;  %v1375_v41 = vld [vmem:[%s11351_s3 + $0x40] sm:$0xff] }
 0x28e   :  { %7080 = vmatpush3.msra.mxu1 %v9116_v11  ;;  %7038 = vmatprep.subr.mxu0 %v9087_v57 }
 0x28f   :  { %7081 = vmatprep.subr.mxu1 %v9132_v30  ;;  %7039 = vmatpush3.msra.mxu0 %v9087_v57 }
 0x290   :  { %7082 = vmatpush3.msra.mxu1 %v9132_v30  ;;  %7040 = vmatprep.subr.mxu0 %v9105_v37 }
 0x291   :  { %7083 = vmatprep.subr.mxu1 %v9149_v61  ;;  %7041 = vmatpush3.msra.mxu0 %v9105_v37 }
 0x292   :  { %7084 = vmatpush3.msra.mxu1 %v9149_v61  ;;  %7042 = vmatprep.subr.mxu0 %v9114_v10 }
 0x293   :  { %7085 = vmatprep.subr.mxu1 %v9165_v26  ;;  %7043 = vmatpush3.msra.mxu0 %v9114_v10 }
 0x294   :  { %7086 = vmatpush3.msra.mxu1 %v9165_v26  ;;  %7044 = vmatprep.subr.mxu0 %v9130_v29 }
 0x295   :  { %7087 = vmatprep.subr.mxu1 %v9176_v9  ;;  %7045 = vmatpush3.msra.mxu0 %v9130_v29  ;;  %v1374_v29 = vld [vmem:[%s11351_s3 + $0x38] sm:$0xff] }
 0x296   :  { %7088 = vmatpush3.msra.mxu1 %v9176_v9  ;;  %7046 = vmatprep.subr.mxu0 %v9147_v60 }
 0x297   :  { %7090 = vmatmul.mubr.f32.vlgmr.msra.gmra.mxu1 %v1495_v39  ;;  %7127 = vmatprep.subr.mxu1 %v8964_v12 }
 0x298   :  { %7047 = vmatpush3.msra.mxu0 %v9147_v60  ;;  %7128 = vmatpush3.msra.mxu1 %v8964_v12  ;;  %v1382_v12 = vld [vmem:[%s11351_s3 + $0x78] sm:$0xff] }
 0x299   :  { %7159 = vmatprep.mubr.f32.mxu1 %v9213_v24  ;;  %7048 = vmatprep.subr.mxu0 %v9162_v62  ;;  %v9312_v16 = vand.u32 4294901760, %v1382_v12 }
 0x29a   :  { %7129 = vmatprep.subr.mxu1 %v8972_v17  ;;  %7049 = vmatpush3.msra.mxu0 %v9162_v62 }
 0x29b   :  { %7130 = vmatpush3.msra.mxu1 %v8972_v17  ;;  %7050 = vmatprep.subr.mxu0 %v9180_v2  ;;  %v1381_v17 = vld [vmem:[%s11351_s3 + $0x70] sm:$0xff] }
 0x29c   :  { %7131 = vmatprep.subr.mxu1 %v8985_v22  ;;  %7051 = vmatpush3.msra.mxu0 %v9180_v2  ;;  %v9326_v21 = vand.u32 4294901760, %v1381_v17 }
 0x29d   :  { %7132 = vmatpush3.msra.mxu1 %v8985_v22  ;;  %7052 = vmatprep.subr.mxu0 %v9186_v6  ;;  %v9331_v22 = vsub.f32 %v1382_v12, %v9312_v16  ;;  %v9489_v12 = vand.u32 4294901760, %v1371_v47 }
 0x29e   :  { %7133 = vmatprep.subr.mxu1 %v9000_v28  ;;  %7053 = vmatpush3.msra.mxu0 %v9186_v6 }
 0x29f   :  { %7134 = vmatpush3.msra.mxu1 %v9000_v28  ;;  %7055 = vmatmul.mubr.f32.vlgmr.msra.gmra.mxu0 %v9219_v19  ;;  %v1378_v28 = vld [vmem:[%s11351_s3 + $0x58] sm:$0xff]  ;;  %v9471_v19 = vand.u32 4294901760, %v1372_v5 }
 0x2a0   :  { %7092 = vmatprep.subr.mxu0 %v8980_v20  ;;  %7135 = vmatprep.subr.mxu1 %v9016_v43  ;;  %v9365_v1 = vand.u32 4294901760, %v1378_v28 }
 0x2a1   :  { %7093 = vmatpush3.msra.mxu0 %v8980_v20  ;;  %7124 = vmatprep.mubr.f32.mxu0 %v9213_v24  ;;  %v1380_v20 = vld [vmem:[%s11351_s3 + $0x68] sm:$0xff] }
 0x2a2   :  { %7136 = vmatpush3.msra.mxu1 %v9016_v43  ;;  %7094 = vmatprep.subr.mxu0 %v8995_v25  ;;  %v9338_v27 = vand.u32 4294901760, %v1380_v20  ;;  %v9355_v43 = vand.u32 4294901760, %v9331_v22  ;;  %v9397_v57 = vsub.f32 %v1378_v28, %v9365_v1  ;;  %v11469_v28 = vld [vmem:[#allocation13_spill] sm:$0xff] }
 0x2a3   :  { %7137 = vmatprep.subr.mxu1 %v9027_v54  ;;  %7095 = vmatpush3.msra.mxu0 %v8995_v25  ;;  %v1379_v25 = vld [vmem:[%s11351_s3 + $0x60] sm:$0xff] }
 0x2a4   :  { %7138 = vmatpush3.msra.mxu1 %v9027_v54  ;;  %7096 = vmatprep.subr.mxu0 %v9010_v35  ;;  %v9350_v40 = vand.u32 4294901760, %v1379_v25  ;;  %v1365_v54 = vld [vmem:[#allocation2] sm:$0xff]  ;;  %v9363_v56 = vsub.f32 %v1380_v20, %v9338_v27  ;;  %v9428_v2 = vand.u32 4294901760, %v9397_v57 }
 0x2a5   :  { %7139 = vmatprep.subr.mxu1 %v9041_v8  ;;  %7097 = vmatpush3.msra.mxu0 %v9010_v35  ;;  %v9348_v35 = vsub.f32 %v1381_v17, %v9326_v21 }
 0x2a6   :  { %7140 = vmatpush3.msra.mxu1 %v9041_v8  ;;  %7098 = vmatprep.subr.mxu0 %v9025_v50  ;;  %v1376_v8 = vld [vmem:[%s11351_s3 + $0x48] sm:$0xff]  ;;  %v2219_v34 = vsub.f32 %v9397_v57, %v9428_v2 }
 0x2a7   :  { %7141 = vmatprep.subr.mxu1 %v9057_v53  ;;  %7099 = vmatpush3.msra.mxu0 %v9025_v50  ;;  %v1377_v50 = vld [vmem:[%s11351_s3 + $0x50] sm:$0xff] }
 0x2a8   :  { %7142 = vmatpush3.msra.mxu1 %v9057_v53  ;;  %7100 = vmatprep.subr.mxu0 %v9045_v13  ;;  %v9380_v36 = vand.u32 4294901760, %v1377_v50  ;;  %v2191_v53 = vsub.f32 %v9331_v22, %v9355_v43  ;;  %v2220_v17 = vand.u32 4294901760, %v2219_v34 }
 0x2a9   :  { %7143 = vmatprep.subr.mxu1 %v9074_v38  ;;  %7101 = vmatpush3.msra.mxu0 %v9045_v13  ;;  %v9375_v13 = vand.u32 4294901760, %v9348_v35 }
 0x2aa   :  { %7144 = vmatpush3.msra.mxu1 %v9074_v38  ;;  %7102 = vmatprep.subr.mxu0 %v9052_v33  ;;  %v11463_v38 = vld [vmem:[#allocation6_spill] sm:$0xff]  ;;  %v9411_v10 = vsub.f32 %v1377_v50, %v9380_v36 }
 0x2ab   :  { %7145 = vmatprep.subr.mxu1 %v9090_v42  ;;  %7103 = vmatpush3.msra.mxu0 %v9052_v33  ;;  %v9378_v33 = vsub.f32 %v1379_v25, %v9350_v40  ;;  %v1369_v25 = vld [vmem:[%s11351_s3 + $0x10] sm:$0xff] }
 0x2ac   :  { %7146 = vmatpush3.msra.mxu1 %v9090_v42  ;;  %7104 = vmatprep.subr.mxu0 %v9069_v31  ;;  %v9399_v42 = vand.u32 4294901760, %v1376_v8  ;;  %v9445_v51 = vand.u32 4294901760, %v9411_v10 }
 0x2ad   :  { %7147 = vmatprep.subr.mxu1 %v9101_v48  ;;  %7105 = vmatpush3.msra.mxu0 %v9069_v31  ;;  %v9386_v31 = vand.u32 4294901760, %v1365_v54  ;;  %v9408_v37 = vand.u32 4294901760, %v9378_v33 }
 0x2ae   :  { %7148 = vmatpush3.msra.mxu1 %v9101_v48  ;;  %7106 = vmatprep.subr.mxu0 %v9084_v49  ;;  %v2198_v48 = vsub.f32 %v9348_v35, %v9375_v13  ;;  %v9431_v6 = vsub.f32 %v1376_v8, %v9399_v42  ;;  %v2226_v44 = vsub.f32 %v9411_v10, %v9445_v51  ;;  %v9504_v8 = vand.u32 4294901760, %v1370_v15 }
 0x2af   :  { %7149 = vmatprep.subr.mxu1 %v9116_v11  ;;  %7107 = vmatpush3.msra.mxu0 %v9084_v49  ;;  %v9394_v49 = vand.u32 4294901760, %v9363_v56  ;;  %v9421_v60 = vsub.f32 %v1365_v54, %v9386_v31  ;;  %v2212_v14 = vsub.f32 %v9378_v33, %v9408_v37  ;;  %v9502_v54 = vsub.f32 %v1372_v5, %v9471_v19 }
 0x2b0   :  { %7150 = vmatpush3.msra.mxu1 %v9116_v11  ;;  %7108 = vmatprep.subr.mxu0 %v9099_v58  ;;  %v9413_v11 = vand.u32 4294901760, %v1375_v41  ;;  %v2199_v63 = vand.u32 4294901760, %v2198_v48  ;;  %v9461_v55 = vand.u32 4294901760, %v9431_v6  ;;  %v9514_v48 = vand.u32 4294901760, %v9487_v45 }
 0x2b1   :  { %7151 = vmatprep.subr.mxu1 %v9132_v30  ;;  %7109 = vmatpush3.msra.mxu0 %v9099_v58  ;;  %v11464_v58 = vld [vmem:[#allocation7_spill] sm:$0xff]  ;;  %v2205_v62 = vsub.f32 %v9363_v56, %v9394_v49  ;;  %v2213_v52 = vand.u32 4294901760, %v2212_v14  ;;  %v9529_v23 = vand.u32 4294901760, %v9502_v54 }
 0x2b2   :  { %7152 = vmatpush3.msra.mxu1 %v9132_v30  ;;  %7110 = vmatprep.subr.mxu0 %v11463_v38  ;;  %v2192_v30 = vand.u32 4294901760, %v2191_v53  ;;  %v9448_v3 = vsub.f32 %v1375_v41, %v9413_v11  ;;  %v2233_v20 = vsub.f32 %v9431_v6, %v9461_v55  ;;  %v2227_v53 = vand.u32 4294901760, %v2226_v44 }
 0x2b3   :  { %7153 = vmatprep.subr.mxu1 %v9149_v61  ;;  %7111 = vmatpush3.msra.mxu0 %v11463_v38  ;;  %v2206_v7 = vand.u32 4294901760, %v2205_v62  ;;  %v1368_v38 = vld [vmem:[%s11351_s3 + $0x8] sm:$0xff]  ;;  %v1367_v62 = vld [vmem:[%s11351_s3] sm:$0xff]  ;;  %v2254_v5 = vsub.f32 %v9487_v45, %v9514_v48 }
 0x2b4   :  { %7154 = vmatpush3.msra.mxu1 %v9149_v61  ;;  %7112 = vmatprep.subr.mxu0 %v11464_v58  ;;  %v11465_v61 = vld [vmem:[#allocation8_spill] sm:$0xff]  ;;  %v9477_v39 = vand.u32 4294901760, %v9448_v3 }
 0x2b5   :  { %7155 = vmatprep.subr.mxu1 %v9165_v26  ;;  %7113 = vmatpush3.msra.mxu0 %v11464_v58 }
 0x2b6   :  { %7156 = vmatpush3.msra.mxu1 %v9165_v26  ;;  %7114 = vmatprep.subr.mxu0 %v11465_v61  ;;  %v9438_v26 = vand.u32 4294901760, %v1374_v29  ;;  %v2240_v41 = vsub.f32 %v9448_v3, %v9477_v39 }
 0x2b7   :  { %7157 = vmatprep.subr.mxu1 %v9176_v9  ;;  %7115 = vmatpush3.msra.mxu0 %v11465_v61  ;;  %v2234_v61 = vand.u32 4294901760, %v2233_v20 }
 0x2b8   :  { %7158 = vmatpush3.msra.mxu1 %v9176_v9  ;;  %7116 = vmatprep.subr.mxu0 %v11466_v46  ;;  %v2169_v9 = vand.u32 4294901760, %v9421_v60  ;;  %v9469_v24 = vsub.f32 %v1374_v29, %v9438_v26  ;;  %v9517_v29 = vsub.f32 %v1371_v47, %v9489_v12  ;;  %v2241_v14 = vand.u32 4294901760, %v2240_v41 }
 0x2b9   :  { %7160 = vmatmul.mubr.f32.vlgmr.msra.gmra.mxu1 %v9215_v32  ;;  %7197 = vmatprep.subr.mxu1 %v2192_v30  ;;  %v9546_v47 = vand.u32 4294901760, %v1367_v62 }
 0x2ba   :  { %7117 = vmatpush3.msra.mxu0 %v11466_v46  ;;  %7198 = vmatpush3.msra.mxu1 %v2192_v30  ;;  %v2170_v4 = vsub.f32 %v9421_v60, %v2169_v9  ;;  %v9499_v50 = vand.u32 4294901760, %v9469_v24  ;;  %v9519_v30 = vand.u32 4294901760, %v1369_v25  ;;  %v9532_v46 = vsub.f32 %v1370_v15, %v9504_v8 }
 0x2bb   :  { %7229 = vmatprep.mubr.f32.mxu1 %v9386_v31  ;;  %7118 = vmatprep.subr.mxu0 %v11467_v18  ;;  %v9566_v20 = vsub.f32 %v1367_v62, %v9546_v47 }
 0x2bc   :  { %7199 = vmatprep.subr.mxu1 %v2199_v63  ;;  %7119 = vmatpush3.msra.mxu0 %v11467_v18  ;;  %v2171_v58 = vand.u32 4294901760, %v2170_v4  ;;  %v9544_v34 = vsub.f32 %v1369_v25, %v9519_v30  ;;  %v9553_v44 = vand.u32 4294901760, %v9532_v46 }
 0x2bd   :  { %7200 = vmatpush3.msra.mxu1 %v2199_v63  ;;  %7120 = vmatprep.subr.mxu0 %v11468_v59  ;;  %v9534_v63 = vand.u32 4294901760, %v1368_v38 }
 0x2be   :  { %7201 = vmatprep.subr.mxu1 %v2206_v7  ;;  %7121 = vmatpush3.msra.mxu0 %v11468_v59  ;;  %v2255_v59 = vand.u32 4294901760, %v2254_v5 }
 0x2bf   :  { %7202 = vmatpush3.msra.mxu1 %v2206_v7  ;;  %7122 = vmatprep.subr.mxu0 %v11469_v28  ;;  %v9541_v7 = vand.u32 4294901760, %v9517_v29  ;;  %v9556_v15 = vsub.f32 %v1368_v38, %v9534_v63 }
 0x2c0   :  { %7203 = vmatprep.subr.mxu1 %v2213_v52  ;;  %7123 = vmatpush3.msra.mxu0 %v11469_v28  ;;  %v2275_v28 = vsub.f32 %v9532_v46, %v9553_v44 }
 0x2c1   :  { %7204 = vmatpush3.msra.mxu1 %v2213_v52  ;;  %7125 = vmatmul.mubr.f32.vlgmr.msra.gmra.mxu0 %v9215_v32  ;;  %v2247_v32 = vsub.f32 %v9469_v24, %v9499_v50  ;;  %v2261_v52 = vsub.f32 %v9502_v54, %v9529_v23  ;;  %v2268_v4 = vsub.f32 %v9517_v29, %v9541_v7 }
 0x2c2   :  { %7162 = vmatprep.subr.mxu0 %v9312_v16  ;;  %7205 = vmatprep.subr.mxu1 %v2220_v17  ;;  %v2276_v62 = vand.u32 4294901760, %v2275_v28 }
 0x2c3   :  { %7163 = vmatpush3.msra.mxu0 %v9312_v16  ;;  %7194 = vmatprep.mubr.f32.mxu0 %v2171_v58  ;;  %v2248_v18 = vand.u32 4294901760, %v2247_v32  ;;  %v2262_v25 = vand.u32 4294901760, %v2261_v52  ;;  %v2269_v41 = vand.u32 4294901760, %v2268_v4  ;;  %v9580_v58 = vand.u32 4294901760, %v9566_v20 }
 0x2c4   :  { %7206 = vmatpush3.msra.mxu1 %v2220_v17  ;;  %7164 = vmatprep.subr.mxu0 %v9326_v21  ;;  %v9563_v17 = vand.u32 4294901760, %v9544_v34 }
 0x2c5   :  { %7207 = vmatprep.subr.mxu1 %v2227_v53  ;;  %7165 = vmatpush3.msra.mxu0 %v9326_v21  ;;  %v2296_v5 = vsub.f32 %v9566_v20, %v9580_v58 }
 0x2c6   :  { %7208 = vmatpush3.msra.mxu1 %v2227_v53  ;;  %7166 = vmatprep.subr.mxu0 %v9338_v27  ;;  %v9573_v53 = vand.u32 4294901760, %v9556_v15  ;;  %v2282_v38 = vsub.f32 %v9544_v34, %v9563_v17 }
 0x2c7   :  { %7209 = vmatprep.subr.mxu1 %v2234_v61  ;;  %7167 = vmatpush3.msra.mxu0 %v9338_v27 }
 0x2c8   :  { %7210 = vmatpush3.msra.mxu1 %v2234_v61  ;;  %7168 = vmatprep.subr.mxu0 %v9350_v40  ;;  %v1366_v61 = vld [vmem:[#allocation2 + $0x8] sm:$0xff]  ;;  %v2289_v32 = vsub.f32 %v9556_v15, %v9573_v53 }
 0x2c9   :  { %7211 = vmatprep.subr.mxu1 %v2241_v14  ;;  %7169 = vmatpush3.msra.mxu0 %v9350_v40 }
 0x2ca   :  { %7212 = vmatpush3.msra.mxu1 %v2241_v14  ;;  %7170 = vmatprep.subr.mxu0 %v9365_v1  ;;  %v2283_v14 = vand.u32 4294901760, %v2282_v38  ;;  %v2290_v52 = vand.u32 4294901760, %v2289_v32 }
 0x2cb   :  { %7213 = vmatprep.subr.mxu1 %v2248_v18  ;;  %7171 = vmatpush3.msra.mxu0 %v9365_v1 }
 0x2cc   :  { %7214 = vmatpush3.msra.mxu1 %v2248_v18  ;;  %7172 = vmatprep.subr.mxu0 %v9380_v36  ;;  %v9590_v18 = vand.u32 4294901760, %v1366_v61 }
 0x2cd   :  { %7215 = vmatprep.subr.mxu1 %v2255_v59  ;;  %7173 = vmatpush3.msra.mxu0 %v9380_v36 }
 0x2ce   :  { %7216 = vmatpush3.msra.mxu1 %v2255_v59  ;;  %7174 = vmatprep.subr.mxu0 %v9399_v42  ;;  %v2297_v59 = vand.u32 4294901760, %v2296_v5  ;;  %v9597_v4 = vsub.f32 %v1366_v61, %v9590_v18  ;;  %v5634_v61 = vld [vmem:[%s11351_s3 + $0x120] sm:$0xff] }
 0x2cf   :  { %7217 = vmatprep.subr.mxu1 %v2262_v25  ;;  %7175 = vmatpush3.msra.mxu0 %v9399_v42 }
 0x2d0   :  { %7218 = vmatpush3.msra.mxu1 %v2262_v25  ;;  %7176 = vmatprep.subr.mxu0 %v9413_v11  ;;  %v2179_v25 = vand.u32 4294901760, %v9597_v4 }
 0x2d1   :  { %7219 = vmatprep.subr.mxu1 %v2269_v41  ;;  %7177 = vmatpush3.msra.mxu0 %v9413_v11 }
 0x2d2   :  { %7220 = vmatpush3.msra.mxu1 %v2269_v41  ;;  %7178 = vmatprep.subr.mxu0 %v9438_v26  ;;  %v2180_v28 = vsub.f32 %v9597_v4, %v2179_v25 }
 0x2d3   :  { %7221 = vmatprep.subr.mxu1 %v2276_v62  ;;  %7179 = vmatpush3.msra.mxu0 %v9438_v26 }
 0x2d4   :  { %7222 = vmatpush3.msra.mxu1 %v2276_v62  ;;  %7180 = vmatprep.subr.mxu0 %v9455_v0 }
 0x2d5   :  { %7223 = vmatprep.subr.mxu1 %v2283_v14  ;;  %7181 = vmatpush3.msra.mxu0 %v9455_v0 }
 0x2d6   :  { %7224 = vmatpush3.msra.mxu1 %v2283_v14  ;;  %7182 = vmatprep.subr.mxu0 %v9471_v19 }
 0x2d7   :  { %7225 = vmatprep.subr.mxu1 %v2290_v52  ;;  %7183 = vmatpush3.msra.mxu0 %v9471_v19 }
 0x2d8   :  { %7226 = vmatpush3.msra.mxu1 %v2290_v52  ;;  %7184 = vmatprep.subr.mxu0 %v9489_v12  ;;  %v5633_v52 = vld [vmem:[%s11351_s3 + $0x118] sm:$0xff] }
 0x2d9   :  { %7227 = vmatprep.subr.mxu1 %v2297_v59  ;;  %7185 = vmatpush3.msra.mxu0 %v9489_v12 }
 0x2da   :  { %7228 = vmatpush3.msra.mxu1 %v2297_v59  ;;  %7186 = vmatprep.subr.mxu0 %v9504_v8 }
 0x2db   :  { %7230 = vmatmul.mubr.f32.vlgmr.msra.gmra.mxu1 %v9590_v18  ;;  %7267 = vmatprep.subr.mxu1 %v9312_v16 }
 0x2dc   :  { %7187 = vmatpush3.msra.mxu0 %v9504_v8  ;;  %7268 = vmatpush3.msra.mxu1 %v9312_v16 }
 0x2dd   :  { %7299 = vmatprep.mubr.f32.mxu1 %v2169_v9  ;;  %7188 = vmatprep.subr.mxu0 %v9519_v30  ;;  %v2181_v9 = vand.u32 4294901760, %v2180_v28 }
 0x2de   :  { %7269 = vmatprep.subr.mxu1 %v9326_v21  ;;  %7189 = vmatpush3.msra.mxu0 %v9519_v30 }
 0x2df   :  { %7270 = vmatpush3.msra.mxu1 %v9326_v21  ;;  %7190 = vmatprep.subr.mxu0 %v9534_v63 }
 0x2e0   :  { %7271 = vmatprep.subr.mxu1 %v9338_v27  ;;  %7191 = vmatpush3.msra.mxu0 %v9534_v63 }
 0x2e1   :  { %7272 = vmatpush3.msra.mxu1 %v9338_v27  ;;  %7192 = vmatprep.subr.mxu0 %v9546_v47 }
 0x2e2   :  { %7273 = vmatprep.subr.mxu1 %v9350_v40  ;;  %7193 = vmatpush3.msra.mxu0 %v9546_v47 }
 0x2e3   :  { %7274 = vmatpush3.msra.mxu1 %v9350_v40  ;;  %7195 = vmatmul.mubr.f32.vlgmr.msra.gmra.mxu0 %v2181_v9  ;;  %v5632_v9 = vld [vmem:[%s11351_s3 + $0x110] sm:$0xff] }
 0x2e4   :  { %7232 = vmatprep.subr.mxu0 %v9331_v22  ;;  %7275 = vmatprep.subr.mxu1 %v9365_v1 }
 0x2e5   :  { %7233 = vmatpush3.msra.mxu0 %v9331_v22  ;;  %7264 = vmatprep.mubr.f32.mxu0 %v9421_v60  ;;  %v5644_v22 = vld [vmem:[%s11351_s3 + $0x170] sm:$0xff] }
 0x2e6   :  { %7276 = vmatpush3.msra.mxu1 %v9365_v1  ;;  %7234 = vmatprep.subr.mxu0 %v9348_v35 }
 0x2e7   :  { %7277 = vmatprep.subr.mxu1 %v9380_v36  ;;  %7235 = vmatpush3.msra.mxu0 %v9348_v35  ;;  %v9724_v35 = vand.u32 4294901760, %v5644_v22 }
 0x2e8   :  { %7278 = vmatpush3.msra.mxu1 %v9380_v36  ;;  %7236 = vmatprep.subr.mxu0 %v9363_v56 }
 0x2e9   :  { %7279 = vmatprep.subr.mxu1 %v9399_v42  ;;  %7237 = vmatpush3.msra.mxu0 %v9363_v56 }
 0x2ea   :  { %7280 = vmatpush3.msra.mxu1 %v9399_v42  ;;  %7238 = vmatprep.subr.mxu0 %v9378_v33 }
 0x2eb   :  { %7281 = vmatprep.subr.mxu1 %v9413_v11  ;;  %7239 = vmatpush3.msra.mxu0 %v9378_v33 }
 0x2ec   :  { %7282 = vmatpush3.msra.mxu1 %v9413_v11  ;;  %7240 = vmatprep.subr.mxu0 %v9397_v57 }
 0x2ed   :  { %7283 = vmatprep.subr.mxu1 %v9438_v26  ;;  %7241 = vmatpush3.msra.mxu0 %v9397_v57 }
 0x2ee   :  { %7284 = vmatpush3.msra.mxu1 %v9438_v26  ;;  %7242 = vmatprep.subr.mxu0 %v9411_v10 }
 0x2ef   :  { %7285 = vmatprep.subr.mxu1 %v9455_v0  ;;  %7243 = vmatpush3.msra.mxu0 %v9411_v10 }
 0x2f0   :  { %7286 = vmatpush3.msra.mxu1 %v9455_v0  ;;  %7244 = vmatprep.subr.mxu0 %v9431_v6 }
 0x2f1   :  { %7287 = vmatprep.subr.mxu1 %v9471_v19  ;;  %7245 = vmatpush3.msra.mxu0 %v9431_v6 }
 0x2f2   :  { %7288 = vmatpush3.msra.mxu1 %v9471_v19  ;;  %7246 = vmatprep.subr.mxu0 %v9448_v3 }
 0x2f3   :  { %7289 = vmatprep.subr.mxu1 %v9489_v12  ;;  %7247 = vmatpush3.msra.mxu0 %v9448_v3 }
 0x2f4   :  { %7290 = vmatpush3.msra.mxu1 %v9489_v12  ;;  %7248 = vmatprep.subr.mxu0 %v9469_v24 }
 0x2f5   :  { %7291 = vmatprep.subr.mxu1 %v9504_v8  ;;  %7249 = vmatpush3.msra.mxu0 %v9469_v24 }
 0x2f6   :  { %7292 = vmatpush3.msra.mxu1 %v9504_v8  ;;  %7250 = vmatprep.subr.mxu0 %v9487_v45 }
 0x2f7   :  { %7293 = vmatprep.subr.mxu1 %v9519_v30  ;;  %7251 = vmatpush3.msra.mxu0 %v9487_v45  ;;  %v5637_v45 = vld [vmem:[%s11351_s3 + $0x138] sm:$0xff] }
 0x2f8   :  { %7294 = vmatpush3.msra.mxu1 %v9519_v30  ;;  %7252 = vmatprep.subr.mxu0 %v9502_v54 }
 0x2f9   :  { %7295 = vmatprep.subr.mxu1 %v9534_v63  ;;  %7253 = vmatpush3.msra.mxu0 %v9502_v54 }
 0x2fa   :  { %7296 = vmatpush3.msra.mxu1 %v9534_v63  ;;  %7254 = vmatprep.subr.mxu0 %v9517_v29 }
 0x2fb   :  { %7297 = vmatprep.subr.mxu1 %v9546_v47  ;;  %7255 = vmatpush3.msra.mxu0 %v9517_v29  ;;  %v5636_v29 = vld [vmem:[%s11351_s3 + $0x130] sm:$0xff] }
 0x2fc   :  { %7298 = vmatpush3.msra.mxu1 %v9546_v47  ;;  %7256 = vmatprep.subr.mxu0 %v9532_v46 }
 0x2fd   :  { %7300 = vmatmul.mubr.f32.vlgmr.msra.gmra.mxu1 %v2179_v25  ;;  %7337 = vmatprep.subr.mxu1 %v9312_v16 }
 0x2fe   :  { %7257 = vmatpush3.msra.mxu0 %v9532_v46  ;;  %7338 = vmatpush3.msra.mxu1 %v9312_v16  ;;  %v5645_v16 = vld [vmem:[%s11351_s3 + $0x178] sm:$0xff] }
 0x2ff   :  { %7369 = vmatprep.mubr.f32.mxu1 %v9386_v31  ;;  %7258 = vmatprep.subr.mxu0 %v9544_v34 }
 0x300   :  { %7339 = vmatprep.subr.mxu1 %v9326_v21  ;;  %7259 = vmatpush3.msra.mxu0 %v9544_v34 }
 0x301   :  { %7340 = vmatpush3.msra.mxu1 %v9326_v21  ;;  %7260 = vmatprep.subr.mxu0 %v9556_v15  ;;  %v9710_v21 = vand.u32 4294901760, %v5645_v16 }
 0x302   :  { %7341 = vmatprep.subr.mxu1 %v9338_v27  ;;  %7261 = vmatpush3.msra.mxu0 %v9556_v15  ;;  %v5635_v15 = vld [vmem:[%s11351_s3 + $0x128] sm:$0xff] }
 0x303   :  { %7342 = vmatpush3.msra.mxu1 %v9338_v27  ;;  %7262 = vmatprep.subr.mxu0 %v9566_v20  ;;  %v5643_v27 = vld [vmem:[%s11351_s3 + $0x168] sm:$0xff] }
 0x304   :  { %7343 = vmatprep.subr.mxu1 %v9350_v40  ;;  %7263 = vmatpush3.msra.mxu0 %v9566_v20  ;;  %v9736_v56 = vand.u32 4294901760, %v5643_v27 }
 0x305   :  { %7344 = vmatpush3.msra.mxu1 %v9350_v40  ;;  %7265 = vmatmul.mubr.f32.vlgmr.msra.gmra.mxu0 %v9597_v4  ;;  %v9729_v40 = vsub.f32 %v5645_v16, %v9710_v21  ;;  %v9887_v4 = vand.u32 4294901760, %v5634_v61 }
 0x306   :  { %7302 = vmatprep.subr.mxu0 %v9355_v43  ;;  %7345 = vmatprep.subr.mxu1 %v9365_v1 }
 0x307   :  { %7303 = vmatpush3.msra.mxu0 %v9355_v43  ;;  %7334 = vmatprep.mubr.f32.mxu0 %v9386_v31  ;;  %v5642_v43 = vld [vmem:[%s11351_s3 + $0x160] sm:$0xff] }
 0x308   :  { %7346 = vmatpush3.msra.mxu1 %v9365_v1  ;;  %7304 = vmatprep.subr.mxu0 %v9375_v13  ;;  %v5641_v1 = vld [vmem:[%s11351_s3 + $0x158] sm:$0xff]  ;;  %v9748_v33 = vand.u32 4294901760, %v5642_v43  ;;  %v2770_v31 = vld [vmem:[#allocation2 + $0x2] sm:$0xff] }
 0x309   :  { %7347 = vmatprep.subr.mxu1 %v9380_v36  ;;  %7305 = vmatpush3.msra.mxu0 %v9375_v13  ;;  %v9746_v13 = vsub.f32 %v5644_v22, %v9724_v35  ;;  %v9760_v57 = vand.u32 4294901760, %v5641_v1  ;;  %v9772_v10 = vand.u32 4294901760, %v2770_v31 }
 0x30a   :  { %7348 = vmatpush3.msra.mxu1 %v9380_v36  ;;  %7306 = vmatprep.subr.mxu0 %v9394_v49  ;;  %v9753_v36 = vand.u32 4294901760, %v9729_v40  ;;  %v9778_v60 = vsub.f32 %v5642_v43, %v9748_v33 }
 0x30b   :  { %7349 = vmatprep.subr.mxu1 %v9399_v42  ;;  %7307 = vmatpush3.msra.mxu0 %v9394_v49  ;;  %v9758_v49 = vsub.f32 %v5643_v27, %v9736_v56  ;;  %v9795_v3 = vsub.f32 %v5641_v1, %v9760_v57  ;;  %v9902_v27 = vand.u32 4294901760, %v5633_v52  ;;  %v5631_v1 = vld [vmem:[%s11351_s3 + $0x108] sm:$0xff] }
 0x30c   :  { %7350 = vmatpush3.msra.mxu1 %v9399_v42  ;;  %7308 = vmatprep.subr.mxu0 %v9408_v37  ;;  %v5640_v42 = vld [vmem:[%s11351_s3 + $0x150] sm:$0xff]  ;;  %v9806_v24 = vand.u32 4294901760, %v9778_v60 }
 0x30d   :  { %7351 = vmatprep.subr.mxu1 %v9413_v11  ;;  %7309 = vmatpush3.msra.mxu0 %v9408_v37  ;;  %v5639_v37 = vld [vmem:[%s11351_s3 + $0x148] sm:$0xff]  ;;  %v9784_v6 = vand.u32 4294901760, %v5640_v42 }
 0x30e   :  { %7352 = vmatpush3.msra.mxu1 %v9413_v11  ;;  %7310 = vmatprep.subr.mxu0 %v9428_v2  ;;  %v9775_v11 = vand.u32 4294901760, %v9746_v13  ;;  %v2915_v46 = vsub.f32 %v9778_v60, %v9806_v24 }
 0x30f   :  { %7353 = vmatprep.subr.mxu1 %v9438_v26  ;;  %7311 = vmatpush3.msra.mxu0 %v9428_v2  ;;  %v2894_v2 = vsub.f32 %v9729_v40, %v9753_v36 }
 0x310   :  { %7354 = vmatpush3.msra.mxu1 %v9438_v26  ;;  %7312 = vmatprep.subr.mxu0 %v9445_v51  ;;  %v5638_v26 = vld [vmem:[%s11351_s3 + $0x140] sm:$0xff]  ;;  %v2916_v32 = vand.u32 4294901760, %v2915_v46 }
 0x311   :  { %7355 = vmatprep.subr.mxu1 %v9455_v0  ;;  %7313 = vmatpush3.msra.mxu0 %v9445_v51  ;;  %v9792_v51 = vand.u32 4294901760, %v9758_v49 }
 0x312   :  { %7356 = vmatpush3.msra.mxu1 %v9455_v0  ;;  %7314 = vmatprep.subr.mxu0 %v9461_v55  ;;  %v9797_v0 = vand.u32 4294901760, %v5639_v37 }
 0x313   :  { %7357 = vmatprep.subr.mxu1 %v9471_v19  ;;  %7315 = vmatpush3.msra.mxu0 %v9461_v55  ;;  %v2901_v55 = vsub.f32 %v9746_v13, %v9775_v11  ;;  %v2908_v54 = vsub.f32 %v9758_v49, %v9792_v51 }
 0x314   :  { %7358 = vmatpush3.msra.mxu1 %v9471_v19  ;;  %7316 = vmatprep.subr.mxu0 %v9477_v39  ;;  %v9809_v19 = vsub.f32 %v2770_v31, %v9772_v10 }
 0x315   :  { %7359 = vmatprep.subr.mxu1 %v9489_v12  ;;  %7317 = vmatpush3.msra.mxu0 %v9477_v39  ;;  %v9811_v39 = vand.u32 4294901760, %v5638_v26  ;;  %v2909_v20 = vand.u32 4294901760, %v2908_v54 }
 0x316   :  { %7360 = vmatpush3.msra.mxu1 %v9489_v12  ;;  %7318 = vmatprep.subr.mxu0 %v9499_v50  ;;  %v2895_v12 = vand.u32 4294901760, %v2894_v2  ;;  %v9917_v2 = vand.u32 4294901760, %v5632_v9 }
 0x317   :  { %7361 = vmatprep.subr.mxu1 %v9504_v8  ;;  %7319 = vmatpush3.msra.mxu0 %v9499_v50  ;;  %v9819_v50 = vsub.f32 %v5640_v42, %v9784_v6  ;;  %v9844_v34 = vsub.f32 %v5638_v26, %v9811_v39  ;;  %v5630_v26 = vld [vmem:[%s11351_s3 + $0x100] sm:$0xff] }
 0x318   :  { %7362 = vmatpush3.msra.mxu1 %v9504_v8  ;;  %7320 = vmatprep.subr.mxu0 %v9514_v48  ;;  %v9826_v8 = vand.u32 4294901760, %v9795_v3  ;;  %v9942_v46 = vsub.f32 %v5632_v9, %v9917_v2 }
 0x319   :  { %7363 = vmatprep.subr.mxu1 %v9519_v30  ;;  %7321 = vmatpush3.msra.mxu0 %v9514_v48  ;;  %v9829_v48 = vsub.f32 %v5639_v37, %v9797_v0  ;;  %v9876_v5 = vand.u32 4294901760, %v9844_v34  ;;  %v9915_v37 = vsub.f32 %v5634_v61, %v9887_v4 }
 0x31a   :  { %7364 = vmatpush3.msra.mxu1 %v9519_v30  ;;  %7322 = vmatprep.subr.mxu0 %v9529_v23  ;;  %v9836_v30 = vand.u32 4294901760, %v5637_v45  ;;  %v2922_v41 = vsub.f32 %v9795_v3, %v9826_v8 }
 0x31b   :  { %7365 = vmatprep.subr.mxu1 %v9534_v63  ;;  %7323 = vmatpush3.msra.mxu0 %v9529_v23  ;;  %v2902_v23 = vand.u32 4294901760, %v2901_v55  ;;  %v9859_v38 = vand.u32 4294901760, %v9829_v48  ;;  %v2943_v43 = vsub.f32 %v9844_v34, %v9876_v5 }
 0x31c   :  { %7366 = vmatpush3.msra.mxu1 %v9534_v63  ;;  %7324 = vmatprep.subr.mxu0 %v9541_v7  ;;  %v2872_v63 = vand.u32 4294901760, %v9809_v19  ;;  %v9867_v62 = vsub.f32 %v5637_v45, %v9836_v30  ;;  %v2923_v25 = vand.u32 4294901760, %v2922_v41  ;;  %v9930_v45 = vsub.f32 %v5633_v52, %v9902_v27 }
 0x31d   :  { %7367 = vmatprep.subr.mxu1 %v9546_v47  ;;  %7325 = vmatpush3.msra.mxu0 %v9541_v7  ;;  %v9851_v7 = vand.u32 4294901760, %v9819_v50  ;;  %v2936_v28 = vsub.f32 %v9829_v48, %v9859_v38  ;;  %v2944_v54 = vand.u32 4294901760, %v2943_v43 }
 0x31e   :  { %7368 = vmatpush3.msra.mxu1 %v9546_v47  ;;  %7326 = vmatprep.subr.mxu0 %v9553_v44  ;;  %v9853_v47 = vand.u32 4294901760, %v5636_v29  ;;  %v2873_v14 = vsub.f32 %v9809_v19, %v2872_v63  ;;  %v9897_v16 = vand.u32 4294901760, %v9867_v62  ;;  %v9951_v61 = vand.u32 4294901760, %v9930_v45 }
 0x31f   :  { %7370 = vmatmul.mubr.f32.vlgmr.msra.gmra.mxu1 %v9590_v18  ;;  %7407 = vmatprep.subr.mxu1 %v2895_v12  ;;  %v2929_v59 = vsub.f32 %v9819_v50, %v9851_v7 }
 0x320   :  { %7327 = vmatpush3.msra.mxu0 %v9553_v44  ;;  %7408 = vmatpush3.msra.mxu1 %v2895_v12  ;;  %v9869_v44 = vand.u32 4294901760, %v5635_v15  ;;  %v9932_v12 = vand.u32 4294901760, %v5631_v1  ;;  %v2978_v9 = vsub.f32 %v9930_v45, %v9951_v61 }
 0x321   :  { %7439 = vmatprep.mubr.f32.mxu1 %v9772_v10  ;;  %7328 = vmatprep.subr.mxu0 %v9563_v17  ;;  %v2930_v31 = vand.u32 4294901760, %v2929_v59  ;;  %v9961_v59 = vand.u32 4294901760, %v9942_v46 }
 0x322   :  { %7409 = vmatprep.subr.mxu1 %v2902_v23  ;;  %7329 = vmatpush3.msra.mxu0 %v9563_v17  ;;  %v9885_v17 = vsub.f32 %v5636_v29, %v9853_v47  ;;  %v9900_v22 = vsub.f32 %v5635_v15, %v9869_v44  ;;  %v9944_v15 = vand.u32 4294901760, %v5630_v26 }
 0x323   :  { %7410 = vmatpush3.msra.mxu1 %v2902_v23  ;;  %7330 = vmatprep.subr.mxu0 %v9573_v53  ;;  %v9939_v23 = vand.u32 4294901760, %v9915_v37 }
 0x324   :  { %7411 = vmatprep.subr.mxu1 %v2909_v20  ;;  %7331 = vmatpush3.msra.mxu0 %v9573_v53  ;;  %v2874_v53 = vand.u32 4294901760, %v2873_v14  ;;  %v9912_v42 = vand.u32 4294901760, %v9885_v17  ;;  %v9927_v55 = vand.u32 4294901760, %v9900_v22 }
 0x325   :  { %7412 = vmatpush3.msra.mxu1 %v2909_v20  ;;  %7332 = vmatprep.subr.mxu0 %v9580_v58  ;;  %v2971_v52 = vsub.f32 %v9915_v37, %v9939_v23 }
 0x326   :  { %7413 = vmatprep.subr.mxu1 %v2916_v32  ;;  %7333 = vmatpush3.msra.mxu0 %v9580_v58  ;;  %v2937_v58 = vand.u32 4294901760, %v2936_v28  ;;  %v2957_v29 = vsub.f32 %v9885_v17, %v9912_v42  ;;  %v2964_v41 = vsub.f32 %v9900_v22, %v9927_v55 }
 0x327   :  { %7414 = vmatpush3.msra.mxu1 %v2916_v32  ;;  %7335 = vmatmul.mubr.f32.vlgmr.msra.gmra.mxu0 %v9590_v18  ;;  %v2950_v18 = vsub.f32 %v9867_v62, %v9897_v16  ;;  %v9954_v32 = vsub.f32 %v5631_v1, %v9932_v12  ;;  %v2972_v43 = vand.u32 4294901760, %v2971_v52  ;;  %v2985_v1 = vsub.f32 %v9942_v46, %v9961_v59 }
 0x328   :  { %7372 = vmatprep.subr.mxu0 %v9710_v21  ;;  %7415 = vmatprep.subr.mxu1 %v2923_v25  ;;  %v2958_v14 = vand.u32 4294901760, %v2957_v29  ;;  %v2965_v28 = vand.u32 4294901760, %v2964_v41 }
 0x329   :  { %7373 = vmatpush3.msra.mxu0 %v9710_v21  ;;  %7404 = vmatprep.mubr.f32.mxu0 %v2874_v53  ;;  %v2951_v20 = vand.u32 4294901760, %v2950_v18  ;;  %v9971_v53 = vand.u32 4294901760, %v9954_v32 }
 0x32a   :  { %7416 = vmatpush3.msra.mxu1 %v2923_v25  ;;  %7374 = vmatprep.subr.mxu0 %v9724_v35  ;;  %v9964_v25 = vsub.f32 %v5630_v26, %v9944_v15  ;;  %v2979_v26 = vand.u32 4294901760, %v2978_v9 }
 0x32b   :  { %7417 = vmatprep.subr.mxu1 %v2930_v31  ;;  %7375 = vmatpush3.msra.mxu0 %v9724_v35  ;;  %v2992_v18 = vsub.f32 %v9954_v32, %v9971_v53 }
 0x32c   :  { %7418 = vmatpush3.msra.mxu1 %v2930_v31  ;;  %7376 = vmatprep.subr.mxu0 %v9736_v56  ;;  %v9978_v31 = vand.u32 4294901760, %v9964_v25 }
 0x32d   :  { %7419 = vmatprep.subr.mxu1 %v2937_v58  ;;  %7377 = vmatpush3.msra.mxu0 %v9736_v56  ;;  %v2993_v41 = vand.u32 4294901760, %v2992_v18 }
 0x32e   :  { %7420 = vmatpush3.msra.mxu1 %v2937_v58  ;;  %7378 = vmatprep.subr.mxu0 %v9748_v33  ;;  %v2771_v58 = vld [vmem:[#allocation2 + $0xa] sm:$0xff]  ;;  %v2999_v29 = vsub.f32 %v9964_v25, %v9978_v31 }
 0x32f   :  { %7421 = vmatprep.subr.mxu1 %v2944_v54  ;;  %7379 = vmatpush3.msra.mxu0 %v9748_v33 }
 0x330   :  { %7422 = vmatpush3.msra.mxu1 %v2944_v54  ;;  %7380 = vmatprep.subr.mxu0 %v9760_v57  ;;  %v2986_v54 = vand.u32 4294901760, %v2985_v1  ;;  %v5652_v1 = vld [vmem:[%s11353_s4 + $0xa8] sm:$0xff] }
 0x331   :  { %7423 = vmatprep.subr.mxu1 %v2951_v20  ;;  %7381 = vmatpush3.msra.mxu0 %v9760_v57 }
 0x332   :  { %7424 = vmatpush3.msra.mxu1 %v2951_v20  ;;  %7382 = vmatprep.subr.mxu0 %v9784_v6  ;;  %v9988_v20 = vand.u32 4294901760, %v2771_v58 }
 0x333   :  { %7425 = vmatprep.subr.mxu1 %v2958_v14  ;;  %7383 = vmatpush3.msra.mxu0 %v9784_v6 }
 0x334   :  { %7426 = vmatpush3.msra.mxu1 %v2958_v14  ;;  %7384 = vmatprep.subr.mxu0 %v9797_v0  ;;  %v3000_v14 = vand.u32 4294901760, %v2999_v29  ;;  %v9995_v52 = vsub.f32 %v2771_v58, %v9988_v20  ;;  %v5651_v29 = vld [vmem:[%s11353_s4 + $0xa0] sm:$0xff] }
 0x335   :  { %7427 = vmatprep.subr.mxu1 %v2965_v28  ;;  %7385 = vmatpush3.msra.mxu0 %v9797_v0 }
 0x336   :  { %7428 = vmatpush3.msra.mxu1 %v2965_v28  ;;  %7386 = vmatprep.subr.mxu0 %v9811_v39  ;;  %v2882_v28 = vand.u32 4294901760, %v9995_v52 }
 0x337   :  { %7429 = vmatprep.subr.mxu1 %v2972_v43  ;;  %7387 = vmatpush3.msra.mxu0 %v9811_v39 }
 0x338   :  { %7430 = vmatpush3.msra.mxu1 %v2972_v43  ;;  %7388 = vmatprep.subr.mxu0 %v9836_v30  ;;  %v2883_v9 = vsub.f32 %v9995_v52, %v2882_v28 }
 0x339   :  { %7431 = vmatprep.subr.mxu1 %v2979_v26  ;;  %7389 = vmatpush3.msra.mxu0 %v9836_v30 }
 0x33a   :  { %7432 = vmatpush3.msra.mxu1 %v2979_v26  ;;  %7390 = vmatprep.subr.mxu0 %v9853_v47 }
 0x33b   :  { %7433 = vmatprep.subr.mxu1 %v2986_v54  ;;  %7391 = vmatpush3.msra.mxu0 %v9853_v47 }
 0x33c   :  { %7434 = vmatpush3.msra.mxu1 %v2986_v54  ;;  %7392 = vmatprep.subr.mxu0 %v9869_v44  ;;  %v10296_v54 = vand.u32 4294901760, %v5652_v1 }
 0x33d   :  { %7435 = vmatprep.subr.mxu1 %v2993_v41  ;;  %7393 = vmatpush3.msra.mxu0 %v9869_v44 }
 0x33e   :  { %7436 = vmatpush3.msra.mxu1 %v2993_v41  ;;  %7394 = vmatprep.subr.mxu0 %v9887_v4 }
 0x33f   :  { %7437 = vmatprep.subr.mxu1 %v3000_v14  ;;  %7395 = vmatpush3.msra.mxu0 %v9887_v4 }
 0x340   :  { %7438 = vmatpush3.msra.mxu1 %v3000_v14  ;;  %7396 = vmatprep.subr.mxu0 %v9902_v27 }
 0x341   :  { %7440 = vmatmul.mubr.f32.vlgmr.msra.gmra.mxu1 %v9988_v20  ;;  %7477 = vmatprep.subr.mxu1 %v9710_v21 }
 0x342   :  { %7397 = vmatpush3.msra.mxu0 %v9902_v27  ;;  %7478 = vmatpush3.msra.mxu1 %v9710_v21 }
 0x343   :  { %7509 = vmatprep.mubr.f32.mxu1 %v2872_v63  ;;  %7398 = vmatprep.subr.mxu0 %v9917_v2  ;;  %v2884_v63 = vand.u32 4294901760, %v2883_v9  ;;  %v5650_v9 = vld [vmem:[%s11353_s4 + $0x98] sm:$0xff] }
 0x344   :  { %7479 = vmatprep.subr.mxu1 %v9724_v35  ;;  %7399 = vmatpush3.msra.mxu0 %v9917_v2 }
 0x345   :  { %7480 = vmatpush3.msra.mxu1 %v9724_v35  ;;  %7400 = vmatprep.subr.mxu0 %v9932_v12 }
 0x346   :  { %7481 = vmatprep.subr.mxu1 %v9736_v56  ;;  %7401 = vmatpush3.msra.mxu0 %v9932_v12 }
 0x347   :  { %7482 = vmatpush3.msra.mxu1 %v9736_v56  ;;  %7402 = vmatprep.subr.mxu0 %v9944_v15 }
 0x348   :  { %7483 = vmatprep.subr.mxu1 %v9748_v33  ;;  %7403 = vmatpush3.msra.mxu0 %v9944_v15 }
 0x349   :  { %7484 = vmatpush3.msra.mxu1 %v9748_v33  ;;  %7405 = vmatmul.mubr.f32.vlgmr.msra.gmra.mxu0 %v2884_v63 }
 0x34a   :  { %7442 = vmatprep.subr.mxu0 %v9729_v40  ;;  %7485 = vmatprep.subr.mxu1 %v9760_v57 }
 0x34b   :  { %7443 = vmatpush3.msra.mxu0 %v9729_v40  ;;  %7474 = vmatprep.mubr.f32.mxu0 %v9809_v19  ;;  %v5661_v40 = vld [vmem:[%s11353_s4 + $0xf0] sm:$0xff] }
 0x34c   :  { %7486 = vmatpush3.msra.mxu1 %v9760_v57  ;;  %7444 = vmatprep.subr.mxu0 %v9746_v13 }
 0x34d   :  { %7487 = vmatprep.subr.mxu1 %v9784_v6  ;;  %7445 = vmatpush3.msra.mxu0 %v9746_v13  ;;  %v10163_v13 = vand.u32 4294901760, %v5661_v40 }
 0x34e   :  { %7488 = vmatpush3.msra.mxu1 %v9784_v6  ;;  %7446 = vmatprep.subr.mxu0 %v9758_v49 }
 0x34f   :  { %7489 = vmatprep.subr.mxu1 %v9797_v0  ;;  %7447 = vmatpush3.msra.mxu0 %v9758_v49  ;;  %v10174_v49 = vsub.f32 %v5661_v40, %v10163_v13 }
 0x350   :  { %7490 = vmatpush3.msra.mxu1 %v9797_v0  ;;  %7448 = vmatprep.subr.mxu0 %v9778_v60 }
 0x351   :  { %7491 = vmatprep.subr.mxu1 %v9811_v39  ;;  %7449 = vmatpush3.msra.mxu0 %v9778_v60  ;;  %v10186_v60 = vand.u32 4294901760, %v10174_v49 }
 0x352   :  { %7492 = vmatpush3.msra.mxu1 %v9811_v39  ;;  %7450 = vmatprep.subr.mxu0 %v9795_v3 }
 0x353   :  { %7493 = vmatprep.subr.mxu1 %v9836_v30  ;;  %7451 = vmatpush3.msra.mxu0 %v9795_v3  ;;  %11471 = vst [vmem:[#allocation4_spill] sm:$0xff] %v10186_v60  ;;  %v5658_v3 = vld [vmem:[%s11353_s4 + $0xd8] sm:$0xff] }
 0x354   :  { %7494 = vmatpush3.msra.mxu1 %v9836_v30  ;;  %7452 = vmatprep.subr.mxu0 %v9819_v50 }
 0x355   :  { %7495 = vmatprep.subr.mxu1 %v9853_v47  ;;  %7453 = vmatpush3.msra.mxu0 %v9819_v50  ;;  %v10207_v50 = vand.u32 4294901760, %v5658_v3 }
 0x356   :  { %7496 = vmatpush3.msra.mxu1 %v9853_v47  ;;  %7454 = vmatprep.subr.mxu0 %v9829_v48 }
 0x357   :  { %7497 = vmatprep.subr.mxu1 %v9869_v44  ;;  %7455 = vmatpush3.msra.mxu0 %v9829_v48 }
 0x358   :  { %7498 = vmatpush3.msra.mxu1 %v9869_v44  ;;  %7456 = vmatprep.subr.mxu0 %v9844_v34 }
 0x359   :  { %7499 = vmatprep.subr.mxu1 %v9887_v4  ;;  %7457 = vmatpush3.msra.mxu0 %v9844_v34 }
 0x35a   :  { %7500 = vmatpush3.msra.mxu1 %v9887_v4  ;;  %7458 = vmatprep.subr.mxu0 %v9867_v62 }
 0x35b   :  { %7501 = vmatprep.subr.mxu1 %v9902_v27  ;;  %7459 = vmatpush3.msra.mxu0 %v9867_v62 }
 0x35c   :  { %7502 = vmatpush3.msra.mxu1 %v9902_v27  ;;  %7460 = vmatprep.subr.mxu0 %v9885_v17 }
 0x35d   :  { %7503 = vmatprep.subr.mxu1 %v9917_v2  ;;  %7461 = vmatpush3.msra.mxu0 %v9885_v17 }
 0x35e   :  { %7504 = vmatpush3.msra.mxu1 %v9917_v2  ;;  %7462 = vmatprep.subr.mxu0 %v9900_v22 }
 0x35f   :  { %7505 = vmatprep.subr.mxu1 %v9932_v12  ;;  %7463 = vmatpush3.msra.mxu0 %v9900_v22 }
 0x360   :  { %7506 = vmatpush3.msra.mxu1 %v9932_v12  ;;  %7464 = vmatprep.subr.mxu0 %v9915_v37 }
 0x361   :  { %7507 = vmatprep.subr.mxu1 %v9944_v15  ;;  %7465 = vmatpush3.msra.mxu0 %v9915_v37 }
 0x362   :  { %7508 = vmatpush3.msra.mxu1 %v9944_v15  ;;  %7466 = vmatprep.subr.mxu0 %v9930_v45 }
 0x363   :  { %7510 = vmatmul.mubr.f32.vlgmr.msra.gmra.mxu1 %v2882_v28  ;;  %7547 = vmatprep.subr.mxu1 %v9710_v21  ;;  %v10311_v28 = vsub.f32 %v5652_v1, %v10296_v54 }
 0x364   :  { %7467 = vmatpush3.msra.mxu0 %v9930_v45  ;;  %7548 = vmatpush3.msra.mxu1 %v9710_v21  ;;  %v5662_v21 = vld [vmem:[%s11353_s4 + $0xf8] sm:$0xff] }
 0x365   :  { %7579 = vmatprep.mubr.f32.mxu1 %v9772_v10  ;;  %7468 = vmatprep.subr.mxu0 %v9942_v46 }
 0x366   :  { %7549 = vmatprep.subr.mxu1 %v9724_v35  ;;  %7469 = vmatpush3.msra.mxu0 %v9942_v46 }
 0x367   :  { %7550 = vmatpush3.msra.mxu1 %v9724_v35  ;;  %7470 = vmatprep.subr.mxu0 %v9954_v32  ;;  %v10155_v35 = vand.u32 4294901760, %v5662_v21 }
 0x368   :  { %7551 = vmatprep.subr.mxu1 %v9736_v56  ;;  %7471 = vmatpush3.msra.mxu0 %v9954_v32 }
 0x369   :  { %7552 = vmatpush3.msra.mxu1 %v9736_v56  ;;  %7472 = vmatprep.subr.mxu0 %v9964_v25  ;;  %v10161_v56 = vsub.f32 %v5662_v21, %v10155_v35 }
 0x36a   :  { %7553 = vmatprep.subr.mxu1 %v9748_v33  ;;  %7473 = vmatpush3.msra.mxu0 %v9964_v25 }
 0x36b   :  { %7554 = vmatpush3.msra.mxu1 %v9748_v33  ;;  %7475 = vmatmul.mubr.f32.vlgmr.msra.gmra.mxu0 %v9995_v52  ;;  %v5660_v33 = vld [vmem:[%s11353_s4 + $0xe8] sm:$0xff]  ;;  %v10307_v52 = vand.u32 4294901760, %v5651_v29 }
 0x36c   :  { %7512 = vmatprep.subr.mxu0 %v9753_v36  ;;  %7555 = vmatprep.subr.mxu1 %v9760_v57 }
 0x36d   :  { %7513 = vmatpush3.msra.mxu0 %v9753_v36  ;;  %7544 = vmatprep.mubr.f32.mxu0 %v9772_v10  ;;  %v10171_v36 = vand.u32 4294901760, %v10161_v56  ;;  %v5659_v10 = vld [vmem:[%s11353_s4 + $0xe0] sm:$0xff]  ;;  %v10320_v40 = vsub.f32 %v5651_v29, %v10307_v52 }
 0x36e   :  { %7556 = vmatpush3.msra.mxu1 %v9760_v57  ;;  %7514 = vmatprep.subr.mxu0 %v9775_v11  ;;  %v10176_v57 = vand.u32 4294901760, %v5660_v33 }
 0x36f   :  { %7557 = vmatprep.subr.mxu1 %v9784_v6  ;;  %7515 = vmatpush3.msra.mxu0 %v9775_v11  ;;  %11470 = vst [vmem:[#allocation15_spill] sm:$0xff] %v10171_v36  ;;  %v3630_v11 = vsub.f32 %v10161_v56, %v10171_v36 }
 0x370   :  { %7558 = vmatpush3.msra.mxu1 %v9784_v6  ;;  %7516 = vmatprep.subr.mxu0 %v9792_v51  ;;  %v10189_v6 = vsub.f32 %v5660_v33, %v10176_v57  ;;  %v10322_v33 = vand.u32 4294901760, %v5650_v9 }
 0x371   :  { %7559 = vmatprep.subr.mxu1 %v9797_v0  ;;  %7517 = vmatpush3.msra.mxu0 %v9792_v51  ;;  %v10191_v51 = vand.u32 4294901760, %v5659_v10 }
 0x372   :  { %7560 = vmatpush3.msra.mxu1 %v9797_v0  ;;  %7518 = vmatprep.subr.mxu0 %v9806_v24  ;;  %v3631_v0 = vand.u32 4294901760, %v3630_v11  ;;  %v10201_v19 = vand.u32 4294901760, %v10189_v6  ;;  %v5649_v11 = vld [vmem:[%s11353_s4 + $0x90] sm:$0xff] }
 0x373   :  { %7561 = vmatprep.subr.mxu1 %v9811_v39  ;;  %7519 = vmatpush3.msra.mxu0 %v9806_v24  ;;  %v3637_v24 = vsub.f32 %v10174_v49, %v10186_v60 }
 0x374   :  { %7562 = vmatpush3.msra.mxu1 %v9811_v39  ;;  %7520 = vmatprep.subr.mxu0 %v9826_v8  ;;  %11472 = vst [vmem:[#allocation5_spill] sm:$0xff] %v10201_v19  ;;  %v10205_v39 = vsub.f32 %v5659_v10, %v10191_v51  ;;  %v10326_v10 = vand.u32 4294901760, %v10311_v28 }
 0x375   :  { %7563 = vmatprep.subr.mxu1 %v9836_v30  ;;  %7521 = vmatpush3.msra.mxu0 %v9826_v8  ;;  %v5657_v8 = vld [vmem:[%s11353_s4 + $0xd0] sm:$0xff]  ;;  %v3638_v48 = vand.u32 4294901760, %v3637_v24  ;;  %v10336_v24 = vsub.f32 %v5650_v9, %v10322_v33 }
 0x376   :  { %7564 = vmatpush3.msra.mxu1 %v9836_v30  ;;  %7522 = vmatprep.subr.mxu0 %v9851_v7  ;;  %v3644_v30 = vsub.f32 %v10189_v6, %v10201_v19  ;;  %v10216_v34 = vand.u32 4294901760, %v10205_v39  ;;  %11480 = vst [vmem:[#allocation9_spill] sm:$0xff] %v10326_v10 }
 0x377   :  { %7565 = vmatprep.subr.mxu1 %v9853_v47  ;;  %7523 = vmatpush3.msra.mxu0 %v9851_v7  ;;  %v10219_v7 = vsub.f32 %v5658_v3, %v10207_v50  ;;  %11482 = vst [vmem:[#allocation11_spill] sm:$0xff] %v10336_v24 }
 0x378   :  { %7566 = vmatpush3.msra.mxu1 %v9853_v47  ;;  %7524 = vmatprep.subr.mxu0 %v9859_v38  ;;  %11473 = vst [vmem:[#allocation12_spill] sm:$0xff] %v10216_v34  ;;  %v10221_v47 = vand.u32 4294901760, %v5657_v8  ;;  %v3645_v62 = vand.u32 4294901760, %v3644_v30  ;;  %v5648_v30 = vld [vmem:[%s11353_s4 + $0x88] sm:$0xff] }
 0x379   :  { %7567 = vmatprep.subr.mxu1 %v9869_v44  ;;  %7525 = vmatpush3.msra.mxu0 %v9859_v38  ;;  %v5656_v38 = vld [vmem:[%s11353_s4 + $0xc8] sm:$0xff]  ;;  %v10233_v17 = vand.u32 4294901760, %v10219_v7 }
 0x37a   :  { %7568 = vmatpush3.msra.mxu1 %v9869_v44  ;;  %7526 = vmatprep.subr.mxu0 %v9876_v5  ;;  %v10227_v44 = vand.u32 4294901760, %v5656_v38 }
 0x37b   :  { %7569 = vmatprep.subr.mxu1 %v9887_v4  ;;  %7527 = vmatpush3.msra.mxu0 %v9876_v5  ;;  %v3651_v5 = vsub.f32 %v10205_v39, %v10216_v34  ;;  %11474 = vst [vmem:[#allocation14_spill] sm:$0xff] %v10233_v17  ;;  %v3658_v37 = vsub.f32 %v10219_v7, %v10233_v17 }
 0x37c   :  { %7570 = vmatpush3.msra.mxu1 %v9887_v4  ;;  %7528 = vmatprep.subr.mxu0 %v9897_v16  ;;  %v10236_v4 = vsub.f32 %v5657_v8, %v10221_v47  ;;  %v10243_v22 = vsub.f32 %v5656_v38, %v10227_v44  ;;  %v10338_v8 = vand.u32 4294901760, %v5649_v11 }
 0x37d   :  { %7571 = vmatprep.subr.mxu1 %v9902_v27  ;;  %7529 = vmatpush3.msra.mxu0 %v9897_v16  ;;  %v5655_v16 = vld [vmem:[%s11353_s4 + $0xc0] sm:$0xff]  ;;  %v3659_v46 = vand.u32 4294901760, %v3658_v37 }
 0x37e   :  { %7572 = vmatpush3.msra.mxu1 %v9902_v27  ;;  %7530 = vmatprep.subr.mxu0 %v9912_v42  ;;  %v10245_v27 = vand.u32 4294901760, %v5655_v16  ;;  %v10258_v45 = vand.u32 4294901760, %v10243_v22  ;;  %v5647_v37 = vld [vmem:[%s11353_s4 + $0x80] sm:$0xff] }
 0x37f   :  { %7573 = vmatprep.subr.mxu1 %v9917_v2  ;;  %7531 = vmatpush3.msra.mxu0 %v9912_v42  ;;  %v3652_v42 = vand.u32 4294901760, %v3651_v5  ;;  %v10353_v5 = vsub.f32 %v5649_v11, %v10338_v8  ;;  %v6986_v11 = vpop.f32.mrf.mxu0 }
 0x380   :  { %7574 = vmatpush3.msra.mxu1 %v9917_v2  ;;  %7532 = vmatprep.subr.mxu0 %v9927_v55  ;;  %v10251_v2 = vand.u32 4294901760, %v10236_v4  ;;  %11476 = vst [vmem:[#allocation17_spill] sm:$0xff] %v10258_v45  ;;  %v3672_v32 = vsub.f32 %v10243_v22, %v10258_v45 }
 0x381   :  { %7575 = vmatprep.subr.mxu1 %v9932_v12  ;;  %7533 = vmatpush3.msra.mxu0 %v9927_v55  ;;  %v5654_v55 = vld [vmem:[%s11353_s4 + $0xb8] sm:$0xff]  ;;  %11484 = vst [vmem:[#allocation18_spill] sm:$0xff] %v10353_v5 }
 0x382   :  { %7576 = vmatpush3.msra.mxu1 %v9932_v12  ;;  %7534 = vmatprep.subr.mxu0 %v9939_v23  ;;  %11475 = vst [vmem:[#allocation16_spill] sm:$0xff] %v10251_v2  ;;  %v10261_v12 = vsub.f32 %v5655_v16, %v10245_v27  ;;  %v10355_v16 = vand.u32 4294901760, %v5648_v30 }
 0x383   :  { %7577 = vmatprep.subr.mxu1 %v9944_v15  ;;  %7535 = vmatpush3.msra.mxu0 %v9939_v23  ;;  %v10263_v23 = vand.u32 4294901760, %v5654_v55 }
 0x384   :  { %7578 = vmatpush3.msra.mxu1 %v9944_v15  ;;  %7536 = vmatprep.subr.mxu0 %v9951_v61  ;;  %v3665_v15 = vsub.f32 %v10236_v4, %v10251_v2 }
 0x385   :  { %7580 = vmatmul.mubr.f32.vlgmr.msra.gmra.mxu1 %v9988_v20  ;;  %7537 = vmatpush3.msra.mxu0 %v9951_v61  ;;  %v5653_v61 = vld [vmem:[%s11353_s4 + $0xb0] sm:$0xff]  ;;  %v10278_v25 = vsub.f32 %v5654_v55, %v10263_v23 }
 0x386   :  { %7538 = vmatprep.subr.mxu0 %v9961_v59  ;;  %7617 = vmatprep.subr.mxu1 %v3631_v0  ;;  %v3666_v43 = vand.u32 4294901760, %v3665_v15  ;;  %v10365_v15 = vand.u32 4294901760, %v10353_v5 }
 0x387   :  { %7539 = vmatpush3.msra.mxu0 %v9961_v59  ;;  %7618 = vmatpush3.msra.mxu1 %v3631_v0  ;;  %v10275_v59 = vand.u32 4294901760, %v10261_v12  ;;  %v10290_v26 = vand.u32 4294901760, %v10278_v25  ;;  %v10333_v0 = vand.u32 4294901760, %v10320_v40 }
 0x388   :  { %7540 = vmatprep.subr.mxu0 %v9971_v53  ;;  %7619 = vmatprep.subr.mxu1 %v3638_v48  ;;  %11485 = vst [vmem:[#allocation19_spill] sm:$0xff] %v10365_v15  ;;  %v3721_v1 = vsub.f32 %v10353_v5, %v10365_v15 }
 0x389   :  { %7541 = vmatpush3.msra.mxu0 %v9971_v53  ;;  %7620 = vmatpush3.msra.mxu1 %v3638_v48  ;;  %11477 = vst [vmem:[#allocation6_spill] sm:$0xff] %v10275_v59  ;;  %v10280_v53 = vand.u32 4294901760, %v5653_v61  ;;  %v3679_v58 = vsub.f32 %v10261_v12, %v10275_v59  ;;  %11478 = vst [vmem:[#allocation7_spill] sm:$0xff] %v10290_v26  ;;  %v3686_v41 = vsub.f32 %v10278_v25, %v10290_v26 }
 0x38a   :  { %7542 = vmatprep.subr.mxu0 %v9978_v31  ;;  %7621 = vmatprep.subr.mxu1 %v3645_v62  ;;  %11481 = vst [vmem:[#allocation10_spill] sm:$0xff] %v10333_v0  ;;  %v3700_v48 = vsub.f32 %v10311_v28, %v10326_v10  ;;  %v3707_v38 = vsub.f32 %v10320_v40, %v10333_v0  ;;  %v3722_v29 = vand.u32 4294901760, %v3721_v1 }
 0x38b   :  { %7543 = vmatpush3.msra.mxu0 %v9978_v31  ;;  %7622 = vmatpush3.msra.mxu1 %v3645_v62  ;;  %v3673_v31 = vand.u32 4294901760, %v3672_v32  ;;  %v10293_v18 = vsub.f32 %v5653_v61, %v10280_v53  ;;  %v3687_v63 = vand.u32 4294901760, %v3686_v41  ;;  %v10350_v62 = vand.u32 4294901760, %v10336_v24 }
 0x38c   :  { %7545 = vmatmul.mubr.f32.vlgmr.msra.gmra.mxu0 %v9988_v20  ;;  %7582 = vmatprep.subr.mxu0 %v10155_v35  ;;  %v3680_v20 = vand.u32 4294901760, %v3679_v58  ;;  %v3708_v55 = vand.u32 4294901760, %v3707_v38  ;;  %v10368_v61 = vsub.f32 %v5648_v30, %v10355_v16  ;;  %v10371_v32 = vand.u32 4294901760, %v5647_v37 }
 0x38d   :  { %7583 = vmatpush3.msra.mxu0 %v10155_v35  ;;  %7623 = vmatprep.subr.mxu1 %v3652_v42  ;;  %v10305_v14 = vand.u32 4294901760, %v10293_v18  ;;  %11483 = vst [vmem:[#allocation13_spill] sm:$0xff] %v10350_v62 }
 0x38e   :  { %7584 = vmatprep.subr.mxu0 %v10163_v13  ;;  %7624 = vmatpush3.msra.mxu1 %v3652_v42  ;;  %v3701_v42 = vand.u32 4294901760, %v3700_v48  ;;  %11486 = vst [vmem:[#allocation20_spill] sm:$0xff] %v10368_v61  ;;  %v10381_v58 = vsub.f32 %v5647_v37, %v10371_v32  ;;  %v1489_v48 = vpop.f32.mrf.mxu0 }
 0x38f   :  { %7585 = vmatpush3.msra.mxu0 %v10163_v13  ;;  %7625 = vmatprep.subr.mxu1 %v3659_v46  ;;  %11479 = vst [vmem:[#allocation8_spill] sm:$0xff] %v10305_v14  ;;  %v3693_v21 = vsub.f32 %v10293_v18, %v10305_v14 }
 0x390   :  { %7586 = vmatprep.subr.mxu0 %v10176_v57  ;;  %7626 = vmatpush3.msra.mxu1 %v3659_v46  ;;  %v3714_v46 = vsub.f32 %v10336_v24, %v10350_v62  ;;  %11488 = vst [vmem:[#allocation22_spill] sm:$0xff] %v10381_v58  ;;  %v10388_v41 = vand.u32 4294901760, %v10381_v58  ;;  %v7056_v30 = vpop.f32.mrf.mxu0 }
 0x391   :  { %7587 = vmatpush3.msra.mxu0 %v10176_v57  ;;  %7627 = vmatprep.subr.mxu1 %v3666_v43  ;;  %v3694_v3 = vand.u32 4294901760, %v3693_v21 }
 0x392   :  { %7588 = vmatprep.subr.mxu0 %v10191_v51  ;;  %7628 = vmatpush3.msra.mxu1 %v3666_v43  ;;  %v3715_v43 = vand.u32 4294901760, %v3714_v46  ;;  %11489 = vst [vmem:[#allocation23_spill] sm:$0xff] %v10388_v41  ;;  %v1760_v37 = vpop.f32.mrf.mxu0 }
 0x393   :  { %7589 = vmatpush3.msra.mxu0 %v10191_v51  ;;  %7629 = vmatprep.subr.mxu1 %v3673_v31 }
 0x394   :  { %7590 = vmatprep.subr.mxu0 %v10207_v50  ;;  %7630 = vmatpush3.msra.mxu1 %v3673_v31  ;;  %v10377_v31 = vand.u32 4294901760, %v10368_v61 }
 0x395   :  { %7591 = vmatpush3.msra.mxu0 %v10207_v50  ;;  %7631 = vmatprep.subr.mxu1 %v3680_v20 }
 0x396   :  { %7592 = vmatprep.subr.mxu0 %v10221_v47  ;;  %7632 = vmatpush3.msra.mxu1 %v3680_v20  ;;  %11487 = vst [vmem:[#allocation21_spill] sm:$0xff] %v10377_v31  ;;  %v3728_v20 = vsub.f32 %v10368_v61, %v10377_v31 }
 0x397   :  { %7593 = vmatpush3.msra.mxu0 %v10221_v47  ;;  %7633 = vmatprep.subr.mxu1 %v3687_v63 }
 0x398   :  { %7594 = vmatprep.subr.mxu0 %v10227_v44  ;;  %7634 = vmatpush3.msra.mxu1 %v3687_v63  ;;  %v3729_v9 = vand.u32 4294901760, %v3728_v20  ;;  %v3735_v63 = vsub.f32 %v10381_v58, %v10388_v41 }
 0x399   :  { %7595 = vmatpush3.msra.mxu0 %v10227_v44  ;;  %7635 = vmatprep.subr.mxu1 %v3694_v3 }
 0x39a   :  { %7596 = vmatprep.subr.mxu0 %v10245_v27  ;;  %7636 = vmatpush3.msra.mxu1 %v3694_v3  ;;  %v3736_v21 = vand.u32 4294901760, %v3735_v63  ;;  %v7021_v3 = vpop.f32.mrf.mxu1 }
 0x39b   :  { %7597 = vmatpush3.msra.mxu0 %v10245_v27  ;;  %7637 = vmatprep.subr.mxu1 %v3701_v42  ;;  %v1657_v31 = vadd.f32 %v7021_v3, %v6986_v11 }
 0x39c   :  { %7598 = vmatprep.subr.mxu0 %v10263_v23  ;;  %7638 = vmatpush3.msra.mxu1 %v3701_v42  ;;  %v1650_v38 = vpop.f32.mrf.mxu1 }
 0x39d   :  { %7599 = vmatpush3.msra.mxu0 %v10263_v23  ;;  %7639 = vmatprep.subr.mxu1 %v3708_v55  ;;  %v1651_v15 = vadd.f32 %v1650_v38, %v1489_v48  ;;  %v1768_v62 = vadd.f32 %v7056_v30, %v1657_v31 }
 0x39e   :  { %7600 = vmatprep.subr.mxu0 %v10280_v53  ;;  %7640 = vmatpush3.msra.mxu1 %v3708_v55  ;;  %v7091_v42 = vpop.f32.mrf.mxu1  ;;  %v7126_v55 = vpop.f32.mrf.mxu0 }
 0x39f   :  { %7601 = vmatpush3.msra.mxu0 %v10280_v53  ;;  %7641 = vmatprep.subr.mxu1 %v3715_v43  ;;  %v1761_v14 = vadd.f32 %v1760_v37, %v1651_v15  ;;  %v1865_v59 = vadd.f32 %v7091_v42, %v1768_v62 }
 0x3a0   :  { %7602 = vmatprep.subr.mxu0 %v10296_v54  ;;  %7642 = vmatpush3.msra.mxu1 %v3715_v43  ;;  %v1856_v46 = vpop.f32.mrf.mxu1  ;;  %v1983_v1 = vpop.f32.mrf.mxu0 }
 0x3a1   :  { %7603 = vmatpush3.msra.mxu0 %v10296_v54  ;;  %7643 = vmatprep.subr.mxu1 %v3722_v29  ;;  %v1990_v2 = vadd.f32 %v7126_v55, %v1865_v59  ;;  %v1857_v17 = vadd.f32 %v1856_v46, %v1761_v14 }
 0x3a2   :  { %7604 = vmatprep.subr.mxu0 %v10307_v52  ;;  %7644 = vmatpush3.msra.mxu1 %v3722_v29  ;;  %v7161_v43 = vpop.f32.mrf.mxu1 }
 0x3a3   :  { %7605 = vmatpush3.msra.mxu0 %v10307_v52  ;;  %7645 = vmatprep.subr.mxu1 %v3729_v9  ;;  %v7196_v20 = vpop.f32.mrf.mxu0  ;;  %v1984_v60 = vadd.f32 %v1983_v1, %v1857_v17  ;;  %v2083_v58 = vadd.f32 %v7161_v43, %v1990_v2 }
 0x3a4   :  { %7606 = vmatprep.subr.mxu0 %v10322_v33  ;;  %7646 = vmatpush3.msra.mxu1 %v3729_v9  ;;  %v2076_v29 = vpop.f32.mrf.mxu1 }
 0x3a5   :  { %7607 = vmatpush3.msra.mxu0 %v10322_v33  ;;  %7647 = vmatprep.subr.mxu1 %v3736_v21  ;;  %v2173_v63 = vpop.f32.mrf.mxu0  ;;  %v2184_v5 = vadd.f32 %v7196_v20, %v2083_v58  ;;  %v2077_v24 = vadd.f32 %v2076_v29, %v1984_v60 }
 0x3a6   :  { %7608 = vmatprep.subr.mxu0 %v10338_v8  ;;  %7648 = vmatpush3.msra.mxu1 %v3736_v21  ;;  %v7231_v41 = vpop.f32.mrf.mxu1 }
 0x3a7   :  { %7609 = vmatpush3.msra.mxu0 %v10338_v8  ;;  %7687 = vmatprep.subr.mxu1 %v10155_v35  ;;  %v2174_v48 = vadd.f32 %v2173_v63, %v2077_v24  ;;  %v2341_v30 = vadd.f32 %v7231_v41, %v2184_v5 }
 0x3a8   :  { %7610 = vmatprep.subr.mxu0 %v10355_v16  ;;  %v2334_v21 = vpop.f32.mrf.mxu1 }
 0x3a9   :  { %7611 = vmatpush3.msra.mxu0 %v10355_v16  ;;  %v2335_v37 = vadd.f32 %v2334_v21, %v2174_v48 }
 0x3aa   :  { %7612 = vmatprep.subr.mxu0 %v10371_v32 }
 0x3ab   :  { %7613 = vmatpush3.msra.mxu0 %v10371_v32 }
 0x3ac   :  { %7652 = vmatprep.subr.mxu0 %v10161_v56 }
 0x3bd   :  { %v7301_v0 = vpop.f32.mrf.mxu1 }
 0x3bf   :  { %v2540_v45 = vpop.f32.mrf.mxu1 }
 0x3c5   :  { %v7266_v9 = vpop.f32.mrf.mxu0 }
 0x3c6   :  { %v2452_v15 = vadd.f32 %v7266_v9, %v2341_v30 }
 0x3c7   :  { %v2444_v10 = vpop.f32.mrf.mxu0 }
 0x3c8   :  { %v2445_v14 = vadd.f32 %v2444_v10, %v2335_v37  ;;  %v2549_v17 = vadd.f32 %v7301_v0, %v2452_v15  ;;  %v5646_v10 = vld [vmem:[%s11352_s1 + $0x2] ss:$0 sm:$0xff] }
 0x3ca   :  { %v2541_v58 = vadd.f32 %v2540_v45, %v2445_v14 }
 0x3df   :  { %v7371_v34 = vpop.f32.mrf.mxu1 }
 0x3e1   :  { %v2760_v61 = vpop.f32.mrf.mxu1 }
 0x3e7   :  { %v7336_v26 = vpop.f32.mrf.mxu0 }
 0x3e8   :  { %v2674_v43 = vadd.f32 %v7336_v26, %v2549_v17 }
 0x3e9   :  { %v2667_v19 = vpop.f32.mrf.mxu0 }
 0x3ea   :  { %v2668_v24 = vadd.f32 %v2667_v19, %v2541_v58  ;;  %v2767_v9 = vadd.f32 %v7371_v34, %v2674_v43 }
 0x3ec   :  { %v2761_v0 = vadd.f32 %v2760_v61, %v2668_v24 }
 0x401   :  { %v7441_v11 = vpop.f32.mrf.mxu1 }
 0x403   :  { %v3037_v38 = vpop.f32.mrf.mxu1 }
 0x409   :  { %v7406_v36 = vpop.f32.mrf.mxu0 }
 0x40a   :  { %v3044_v62 = vadd.f32 %v7441_v11, %v7406_v36 }
 0x40b   :  { %v2876_v3 = vpop.f32.mrf.mxu0 }
 0x40c   :  { %v3038_v55 = vadd.f32 %v3037_v38, %v2876_v3 }
 0x423   :  { %v7511_v42 = vpop.f32.mrf.mxu1 }
 0x425   :  { %v3243_v2 = vpop.f32.mrf.mxu1 }
 0x42b   :  { %v7476_v31 = vpop.f32.mrf.mxu0 }
 0x42c   :  { %v3155_v46 = vadd.f32 %v7476_v31, %v3044_v62 }
 0x42d   :  { %v3147_v59 = vpop.f32.mrf.mxu0 }
 0x42e   :  { %v3148_v1 = vadd.f32 %v3147_v59, %v3038_v55  ;;  %v3252_v60 = vadd.f32 %v7511_v42, %v3155_v46 }
 0x430   :  { %v3244_v5 = vadd.f32 %v3243_v2, %v3148_v1  ;;  %v3500_v1 = vld [vmem:[%s11353_s4 + $0x50] sm:$0xff] }
 0x431   :  { %v10568_v24 = vand.u32 4294901760, %v3500_v1 }
 0x445   :  { %v7581_v20 = vpop.f32.mrf.mxu1 }
 0x447   :  { %v3463_v11 = vpop.f32.mrf.mxu1 }
 0x44c   :  { %v7546_v29 = vpop.f32.mrf.mxu0 }
 0x44d   :  { %v3377_v63 = vadd.f32 %v7546_v29, %v3252_v60  ;;  %v3499_v60 = vld [vmem:[%s11353_s4 + $0x48] sm:$0xff] }
 0x44e   :  { %v3370_v41 = vpop.f32.mrf.mxu0 }
 0x44f   :  { %v3470_v21 = vadd.f32 %v7581_v20, %v3377_v63  ;;  %v3371_v36 = vadd.f32 %v3370_v41, %v3244_v5  ;;  %v11502_v20 = vld [vmem:[#allocation7_spill] sm:$0xff]  ;;  %v11503_v41 = vld [vmem:[#allocation8_spill] sm:$0xff] }
 0x451   :  { %v3474_v3 = vadd.f32 %v3470_v21, %v2767_v9  ;;  %v3464_v48 = vadd.f32 %v3463_v11, %v3371_v36  ;;  %v10587_v36 = vand.u32 4294901760, %v3499_v60  ;;  %v11504_v11 = vld [vmem:[#allocation9_spill] sm:$0xff] }
 0x453   :  { %v3481_v26 = vadd.f32 %v5646_v10, %v3474_v3  ;;  %v3473_v45 = vadd.f32 %v3464_v48, %v2761_v0  ;;  %v10599_v0 = vsub.f32 %v3500_v1, %v10568_v24  ;;  %v3497_v48 = vld [vmem:[%s11353_s4 + $0x38] sm:$0xff]  ;;  %v3492_v1 = vld [vmem:[%s11353_s4 + $0x10] sm:$0xff] }
 0x455   :  { %8216 = vtanh.f32 %v3481_v26  ;;  %v3480_v31 = vadd.f32 %v5646_v10, %v3473_v45  ;;  %v11505_v45 = vld [vmem:[#allocation10_spill] sm:$0xff] }
 0x457   :  { %8218 = vtanh.f32 %v3480_v31 }
 0x462   :  { %v8217_v19 = vpop.eup %8216 }
 0x463   :  { %3487 = vst [vmem:[#allocation3 + $0x9] sm:$0xff] %v8217_v19  ;;  %v10397_v30 = vand.u32 4294901760, %v8217_v19 }
 0x464   :  { %v8219_v34 = vpop.eup %8218 }
 0x465   :  { %3486 = vst [vmem:[#allocation3 + $0x1] sm:$0xff] %v8219_v34  ;;  %v10399_v38 = vand.u32 4294901760, %v8219_v34  ;;  %v10402_v15 = vsub.f32 %v8217_v19, %v10397_v30 }
 0x467   :  { %7649 = vmatprep.mubr.f32.mxu1 %v10399_v38  ;;  %v3607_v61 = vsub.f32 %v8219_v34, %v10399_v38  ;;  %v3618_v37 = vand.u32 4294901760, %v10402_v15  ;;  %v10619_v34 = vsub.f32 %v3499_v60, %v10587_v36 }
 0x468   :  { %7650 = vmatmul.mubr.f32.vlgmr.msra.gmra.mxu1 %v10397_v30 }
 0x469   :  { %7688 = vmatpush3.msra.mxu1 %v10155_v35  ;;  %v3608_v62 = vand.u32 4294901760, %v3607_v61  ;;  %v3619_v42 = vsub.f32 %v10402_v15, %v3618_v37 }
 0x46a   :  { %7689 = vmatprep.subr.mxu1 %v10163_v13 }
 0x46b   :  { %7690 = vmatpush3.msra.mxu1 %v10163_v13  ;;  %7719 = vmatprep.mubr.f32.mxu1 %v3608_v62  ;;  %v3609_v59 = vsub.f32 %v3607_v61, %v3608_v62  ;;  %v3620_v55 = vand.u32 4294901760, %v3619_v42  ;;  %v10633_v62 = vand.u32 4294901760, %v10599_v0 }
 0x46c   :  { %7691 = vmatprep.subr.mxu1 %v10176_v57  ;;  %v3488_v2 = vld [vmem:[#allocation3] sm:$0xff] }
 0x46d   :  { %7692 = vmatpush3.msra.mxu1 %v10176_v57  ;;  %v3610_v14 = vand.u32 4294901760, %v3609_v59  ;;  %v10574_v5 = vand.u32 4294901760, %v3488_v2  ;;  %v3495_v59 = vld [vmem:[%s11353_s4 + $0x28] sm:$0xff] }
 0x46e   :  { %7693 = vmatprep.subr.mxu1 %v10191_v51 }
 0x46f   :  { %7694 = vmatpush3.msra.mxu1 %v10191_v51  ;;  %7614 = vmatprep.mubr.f32.mxu0 %v3610_v14  ;;  %v10609_v26 = vsub.f32 %v3488_v2, %v10574_v5 }
 0x470   :  { %7695 = vmatprep.subr.mxu1 %v10207_v50  ;;  %7615 = vmatmul.mubr.f32.vlgmr.msra.gmra.mxu0 %v3620_v55 }
 0x471   :  { %7653 = vmatpush3.msra.mxu0 %v10161_v56  ;;  %7696 = vmatpush3.msra.mxu1 %v10207_v50  ;;  %v11490_v56 = vld [vmem:[#allocation11_spill] sm:$0xff] }
 0x472   :  { %7654 = vmatprep.subr.mxu0 %v10174_v49  ;;  %7684 = vmatprep.mubr.f32.mxu0 %v3607_v61 }
 0x473   :  { %7697 = vmatprep.subr.mxu1 %v10221_v47  ;;  %7655 = vmatpush3.msra.mxu0 %v10174_v49  ;;  %v11491_v49 = vld [vmem:[#allocation18_spill] sm:$0xff] }
 0x474   :  { %7698 = vmatpush3.msra.mxu1 %v10221_v47  ;;  %7656 = vmatprep.subr.mxu0 %v10189_v6 }
 0x475   :  { %7699 = vmatprep.subr.mxu1 %v10227_v44  ;;  %7657 = vmatpush3.msra.mxu0 %v10189_v6  ;;  %v11492_v6 = vld [vmem:[#allocation20_spill] sm:$0xff] }
 0x476   :  { %7700 = vmatpush3.msra.mxu1 %v10227_v44  ;;  %7658 = vmatprep.subr.mxu0 %v10205_v39 }
 0x477   :  { %7701 = vmatprep.subr.mxu1 %v10245_v27  ;;  %7659 = vmatpush3.msra.mxu0 %v10205_v39  ;;  %v11493_v39 = vld [vmem:[#allocation22_spill] sm:$0xff] }
 0x478   :  { %7702 = vmatpush3.msra.mxu1 %v10245_v27  ;;  %7660 = vmatprep.subr.mxu0 %v10219_v7 }
 0x479   :  { %7703 = vmatprep.subr.mxu1 %v10263_v23  ;;  %7661 = vmatpush3.msra.mxu0 %v10219_v7 }
 0x47a   :  { %7704 = vmatpush3.msra.mxu1 %v10263_v23  ;;  %7662 = vmatprep.subr.mxu0 %v10236_v4 }
 0x47b   :  { %7705 = vmatprep.subr.mxu1 %v10280_v53  ;;  %7663 = vmatpush3.msra.mxu0 %v10236_v4  ;;  %v11497_v4 = vld [vmem:[#allocation12_spill] sm:$0xff] }
 0x47c   :  { %7706 = vmatpush3.msra.mxu1 %v10280_v53  ;;  %7664 = vmatprep.subr.mxu0 %v10243_v22 }
 0x47d   :  { %7707 = vmatprep.subr.mxu1 %v10296_v54  ;;  %7665 = vmatpush3.msra.mxu0 %v10243_v22  ;;  %v11498_v22 = vld [vmem:[#allocation14_spill] sm:$0xff] }
 0x47e   :  { %7708 = vmatpush3.msra.mxu1 %v10296_v54  ;;  %7666 = vmatprep.subr.mxu0 %v10261_v12 }
 0x47f   :  { %7709 = vmatprep.subr.mxu1 %v10307_v52  ;;  %7667 = vmatpush3.msra.mxu0 %v10261_v12 }
 0x480   :  { %7710 = vmatpush3.msra.mxu1 %v10307_v52  ;;  %7668 = vmatprep.subr.mxu0 %v10278_v25 }
 0x481   :  { %7711 = vmatprep.subr.mxu1 %v10322_v33  ;;  %7669 = vmatpush3.msra.mxu0 %v10278_v25  ;;  %v3502_v25 = vld [vmem:[%s11353_s4 + $0x60] sm:$0xff] }
 0x482   :  { %7712 = vmatpush3.msra.mxu1 %v10322_v33  ;;  %7670 = vmatprep.subr.mxu0 %v10293_v18 }
 0x483   :  { %7713 = vmatprep.subr.mxu1 %v10338_v8  ;;  %7671 = vmatpush3.msra.mxu0 %v10293_v18  ;;  %v11499_v18 = vld [vmem:[#allocation16_spill] sm:$0xff] }
 0x484   :  { %7714 = vmatpush3.msra.mxu1 %v10338_v8  ;;  %7672 = vmatprep.subr.mxu0 %v10311_v28 }
 0x485   :  { %7715 = vmatprep.subr.mxu1 %v10355_v16  ;;  %7673 = vmatpush3.msra.mxu0 %v10311_v28  ;;  %v3501_v28 = vld [vmem:[%s11353_s4 + $0x58] sm:$0xff] }
 0x486   :  { %7716 = vmatpush3.msra.mxu1 %v10355_v16  ;;  %7674 = vmatprep.subr.mxu0 %v10320_v40  ;;  %v10553_v58 = vand.u32 4294901760, %v3501_v28 }
 0x487   :  { %7717 = vmatprep.subr.mxu1 %v10371_v32  ;;  %7675 = vmatpush3.msra.mxu0 %v10320_v40  ;;  %v11500_v40 = vld [vmem:[#allocation17_spill] sm:$0xff] }
 0x488   :  { %7718 = vmatpush3.msra.mxu1 %v10371_v32  ;;  %7676 = vmatprep.subr.mxu0 %v11490_v56  ;;  %v10585_v21 = vsub.f32 %v3501_v28, %v10553_v58 }
 0x489   :  { %7720 = vmatmul.mubr.f32.vlgmr.msra.gmra.mxu1 %v3618_v37  ;;  %7757 = vmatprep.subr.mxu1 %v10155_v35 }
 0x48a   :  { %7677 = vmatpush3.msra.mxu0 %v11490_v56  ;;  %7758 = vmatpush3.msra.mxu1 %v10155_v35  ;;  %v11494_v35 = vld [vmem:[#allocation15_spill] sm:$0xff]  ;;  %v10616_v19 = vand.u32 4294901760, %v10585_v21 }
 0x48b   :  { %7789 = vmatprep.mubr.f32.mxu1 %v10399_v38  ;;  %7678 = vmatprep.subr.mxu0 %v11491_v49 }
 0x48c   :  { %7759 = vmatprep.subr.mxu1 %v10163_v13  ;;  %7679 = vmatpush3.msra.mxu0 %v11491_v49  ;;  %v4342_v56 = vsub.f32 %v10585_v21, %v10616_v19  ;;  %v10649_v49 = vand.u32 4294901760, %v10619_v34 }
 0x48d   :  { %7760 = vmatpush3.msra.mxu1 %v10163_v13  ;;  %7680 = vmatprep.subr.mxu0 %v11492_v6  ;;  %v11495_v13 = vld [vmem:[#allocation4_spill] sm:$0xff] }
 0x48e   :  { %7761 = vmatprep.subr.mxu1 %v10176_v57  ;;  %7681 = vmatpush3.msra.mxu0 %v11492_v6  ;;  %v3494_v6 = vld [vmem:[%s11353_s4 + $0x20] sm:$0xff]  ;;  %v4343_v28 = vand.u32 4294901760, %v4342_v56 }
 0x48f   :  { %7762 = vmatpush3.msra.mxu1 %v10176_v57  ;;  %7682 = vmatprep.subr.mxu0 %v11493_v39  ;;  %v3505_v57 = vld [vmem:[%s11353_s4 + $0x78] sm:$0xff] }
 0x490   :  { %7763 = vmatprep.subr.mxu1 %v10191_v51  ;;  %7683 = vmatpush3.msra.mxu0 %v11493_v39  ;;  %v10500_v7 = vand.u32 4294901760, %v3505_v57  ;;  %v11507_v39 = vld [vmem:[#allocation19_spill] sm:$0xff] }
 0x491   :  { %7764 = vmatpush3.msra.mxu1 %v10191_v51  ;;  %7685 = vmatmul.mubr.f32.vlgmr.msra.gmra.mxu0 %v10402_v15  ;;  %v11496_v51 = vld [vmem:[#allocation5_spill] sm:$0xff] }
 0x492   :  { %7722 = vmatprep.subr.mxu0 %v11494_v35  ;;  %7765 = vmatprep.subr.mxu1 %v10207_v50  ;;  %v11506_v15 = vld [vmem:[#allocation13_spill] sm:$0xff] }
 0x493   :  { %7723 = vmatpush3.msra.mxu0 %v11494_v35  ;;  %7754 = vmatprep.mubr.f32.mxu0 %v10399_v38  ;;  %v3496_v38 = vld [vmem:[%s11353_s4 + $0x30] sm:$0xff] }
 0x494   :  { %7766 = vmatpush3.msra.mxu1 %v10207_v50  ;;  %7724 = vmatprep.subr.mxu0 %v11495_v13  ;;  %v3504_v50 = vld [vmem:[%s11353_s4 + $0x70] sm:$0xff]  ;;  %v10643_v14 = vand.u32 4294901760, %v3496_v38 }
 0x495   :  { %7767 = vmatprep.subr.mxu1 %v10221_v47  ;;  %7725 = vmatpush3.msra.mxu0 %v11495_v13  ;;  %v10514_v12 = vand.u32 4294901760, %v3504_v50  ;;  %v10659_v13 = vand.u32 4294901760, %v3495_v59 }
 0x496   :  { %7768 = vmatpush3.msra.mxu1 %v10221_v47  ;;  %7726 = vmatprep.subr.mxu0 %v11496_v51  ;;  %v3503_v47 = vld [vmem:[%s11353_s4 + $0x68] sm:$0xff] }
 0x497   :  { %7769 = vmatprep.subr.mxu1 %v10227_v44  ;;  %7727 = vmatpush3.msra.mxu0 %v11496_v51  ;;  %v10536_v46 = vsub.f32 %v3504_v50, %v10514_v12  ;;  %v4349_v51 = vsub.f32 %v10599_v0, %v10633_v62  ;;  %v10690_v60 = vsub.f32 %v3495_v59, %v10659_v13 }
 0x498   :  { %7770 = vmatpush3.msra.mxu1 %v10227_v44  ;;  %7728 = vmatprep.subr.mxu0 %v11497_v4  ;;  %v10519_v44 = vsub.f32 %v3505_v57, %v10500_v7 }
 0x499   :  { %7771 = vmatprep.subr.mxu1 %v10245_v27  ;;  %7729 = vmatpush3.msra.mxu0 %v11497_v4  ;;  %v3493_v4 = vld [vmem:[%s11353_s4 + $0x18] sm:$0xff] }
 0x49a   :  { %7772 = vmatpush3.msra.mxu1 %v10245_v27  ;;  %7730 = vmatprep.subr.mxu0 %v11498_v22  ;;  %v10526_v27 = vand.u32 4294901760, %v3503_v47  ;;  %v10543_v17 = vand.u32 4294901760, %v10519_v44 }
 0x49b   :  { %7773 = vmatprep.subr.mxu1 %v10263_v23  ;;  %7731 = vmatpush3.msra.mxu0 %v11498_v22 }
 0x49c   :  { %7774 = vmatpush3.msra.mxu1 %v10263_v23  ;;  %7732 = vmatprep.subr.mxu0 %v11499_v18  ;;  %v10538_v23 = vand.u32 4294901760, %v3502_v25  ;;  %v10551_v43 = vsub.f32 %v3503_v47, %v10526_v27  ;;  %v4314_v63 = vsub.f32 %v10519_v44, %v10543_v17  ;;  %v11508_v47 = vld [vmem:[#allocation21_spill] sm:$0xff] }
 0x49d   :  { %7775 = vmatprep.subr.mxu1 %v10280_v53  ;;  %7733 = vmatpush3.msra.mxu0 %v11499_v18  ;;  %v10677_v18 = vand.u32 4294901760, %v3494_v6 }
 0x49e   :  { %7776 = vmatpush3.msra.mxu1 %v10280_v53  ;;  %7734 = vmatprep.subr.mxu0 %v11500_v40  ;;  %v11501_v53 = vld [vmem:[#allocation6_spill] sm:$0xff]  ;;  %v10566_v29 = vsub.f32 %v3502_v25, %v10538_v23  ;;  %v10582_v9 = vand.u32 4294901760, %v10551_v43  ;;  %v10675_v25 = vsub.f32 %v3496_v38, %v10643_v14  ;;  %v10717_v38 = vand.u32 4294901760, %v10690_v60 }
 0x49f   :  { %7777 = vmatprep.subr.mxu1 %v10296_v54  ;;  %7735 = vmatpush3.msra.mxu0 %v11500_v40  ;;  %v4356_v40 = vsub.f32 %v10619_v34, %v10649_v49 }
 0x4a0   :  { %7778 = vmatpush3.msra.mxu1 %v10296_v54  ;;  %7736 = vmatprep.subr.mxu0 %v11501_v53  ;;  %v10563_v54 = vand.u32 4294901760, %v10536_v46  ;;  %v10596_v10 = vand.u32 4294901760, %v10566_v29  ;;  %v4328_v31 = vsub.f32 %v10551_v43, %v10582_v9 }
 0x4a1   :  { %7779 = vmatprep.subr.mxu1 %v10307_v52  ;;  %7737 = vmatpush3.msra.mxu0 %v11501_v53  ;;  %v11509_v53 = vld [vmem:[#allocation23_spill] sm:$0xff] }
 0x4a2   :  { %7780 = vmatpush3.msra.mxu1 %v10307_v52  ;;  %7738 = vmatprep.subr.mxu0 %v11502_v20  ;;  %v3498_v52 = vld [vmem:[%s11353_s4 + $0x40] sm:$0xff]  ;;  %v4335_v37 = vsub.f32 %v10566_v29, %v10596_v10  ;;  %v4329_v55 = vand.u32 4294901760, %v4328_v31 }
 0x4a3   :  { %7781 = vmatprep.subr.mxu1 %v10322_v33  ;;  %7739 = vmatpush3.msra.mxu0 %v11502_v20  ;;  %v10601_v3 = vand.u32 4294901760, %v3498_v52  ;;  %v10692_v20 = vand.u32 4294901760, %v3493_v4  ;;  %v3490_v31 = vld [vmem:[%s11353_s4] sm:$0xff] }
 0x4a4   :  { %7782 = vmatpush3.msra.mxu1 %v10322_v33  ;;  %7740 = vmatprep.subr.mxu0 %v11503_v41  ;;  %v4321_v33 = vsub.f32 %v10536_v46, %v10563_v54  ;;  %v4336_v57 = vand.u32 4294901760, %v4335_v37 }
 0x4a5   :  { %7783 = vmatprep.subr.mxu1 %v10338_v8  ;;  %7741 = vmatpush3.msra.mxu0 %v11503_v41  ;;  %v10636_v42 = vsub.f32 %v3498_v52, %v10601_v3  ;;  %v3491_v41 = vld [vmem:[%s11353_s4 + $0x8] sm:$0xff] }
 0x4a6   :  { %7784 = vmatpush3.msra.mxu1 %v10338_v8  ;;  %7742 = vmatprep.subr.mxu0 %v11504_v11  ;;  %v4315_v8 = vand.u32 4294901760, %v4314_v63  ;;  %v4322_v61 = vand.u32 4294901760, %v4321_v33  ;;  %v4350_v63 = vand.u32 4294901760, %v4349_v51  ;;  %v10702_v33 = vand.u32 4294901760, %v10675_v25 }
 0x4a7   :  { %7785 = vmatprep.subr.mxu1 %v10355_v16  ;;  %7743 = vmatpush3.msra.mxu0 %v11504_v11  ;;  %v10665_v50 = vand.u32 4294901760, %v10636_v42 }
 0x4a8   :  { %7786 = vmatpush3.msra.mxu1 %v10355_v16  ;;  %7744 = vmatprep.subr.mxu0 %v11505_v45  ;;  %v10626_v16 = vand.u32 4294901760, %v3497_v48  ;;  %v4377_v59 = vsub.f32 %v10675_v25, %v10702_v33 }
 0x4a9   :  { %7787 = vmatprep.subr.mxu1 %v10371_v32  ;;  %7745 = vmatpush3.msra.mxu0 %v11505_v45  ;;  %v4363_v52 = vsub.f32 %v10636_v42, %v10665_v50  ;;  %v4357_v45 = vand.u32 4294901760, %v4356_v40 }
 0x4aa   :  { %7788 = vmatpush3.msra.mxu1 %v10371_v32  ;;  %7746 = vmatprep.subr.mxu0 %v11506_v15  ;;  %v4292_v32 = vand.u32 4294901760, %v10609_v26  ;;  %v10657_v35 = vsub.f32 %v3497_v48, %v10626_v16  ;;  %v10705_v48 = vsub.f32 %v3494_v6, %v10677_v18  ;;  %v10734_v6 = vand.u32 4294901760, %v3490_v31 }
 0x4ab   :  { %7790 = vmatmul.mubr.f32.vlgmr.msra.gmra.mxu1 %v10397_v30  ;;  %7827 = vmatprep.subr.mxu1 %v4315_v8  ;;  %v4364_v37 = vand.u32 4294901760, %v4363_v52 }
 0x4ac   :  { %7747 = vmatpush3.msra.mxu0 %v11506_v15  ;;  %7828 = vmatpush3.msra.mxu1 %v4315_v8  ;;  %v4293_v22 = vsub.f32 %v10609_v26, %v4292_v32  ;;  %v10687_v2 = vand.u32 4294901760, %v10657_v35  ;;  %v10707_v8 = vand.u32 4294901760, %v3492_v1  ;;  %v10720_v15 = vsub.f32 %v3493_v4, %v10692_v20 }
 0x4ad   :  { %7859 = vmatprep.mubr.f32.mxu1 %v10574_v5  ;;  %7748 = vmatprep.subr.mxu0 %v11507_v39  ;;  %v10754_v40 = vsub.f32 %v3490_v31, %v10734_v6 }
 0x4ae   :  { %7829 = vmatprep.subr.mxu1 %v4322_v61  ;;  %7749 = vmatpush3.msra.mxu0 %v11507_v39  ;;  %v4294_v11 = vand.u32 4294901760, %v4293_v22  ;;  %v10732_v56 = vsub.f32 %v3492_v1, %v10707_v8  ;;  %v10741_v51 = vand.u32 4294901760, %v10720_v15 }
 0x4af   :  { %7830 = vmatpush3.msra.mxu1 %v4322_v61  ;;  %7750 = vmatprep.subr.mxu0 %v11508_v47  ;;  %v10722_v61 = vand.u32 4294901760, %v3491_v41 }
 0x4b0   :  { %7831 = vmatprep.subr.mxu1 %v4329_v55  ;;  %7751 = vmatpush3.msra.mxu0 %v11508_v47  ;;  %v4378_v47 = vand.u32 4294901760, %v4377_v59 }
 0x4b1   :  { %7832 = vmatpush3.msra.mxu1 %v4329_v55  ;;  %7752 = vmatprep.subr.mxu0 %v11509_v53  ;;  %v10729_v55 = vand.u32 4294901760, %v10705_v48  ;;  %v10744_v4 = vsub.f32 %v3491_v41, %v10722_v61 }
 0x4b2   :  { %7833 = vmatprep.subr.mxu1 %v4336_v57  ;;  %7753 = vmatpush3.msra.mxu0 %v11509_v53  ;;  %v4398_v53 = vsub.f32 %v10720_v15, %v10741_v51 }
 0x4b3   :  { %7834 = vmatpush3.msra.mxu1 %v4336_v57  ;;  %7755 = vmatmul.mubr.f32.vlgmr.msra.gmra.mxu0 %v10397_v30  ;;  %v4370_v30 = vsub.f32 %v10657_v35, %v10687_v2  ;;  %v4384_v57 = vsub.f32 %v10690_v60, %v10717_v38  ;;  %v4391_v22 = vsub.f32 %v10705_v48, %v10729_v55 }
 0x4b4   :  { %7792 = vmatprep.subr.mxu0 %v10500_v7  ;;  %7835 = vmatprep.subr.mxu1 %v4343_v28  ;;  %v4399_v31 = vand.u32 4294901760, %v4398_v53 }
 0x4b5   :  { %7793 = vmatpush3.msra.mxu0 %v10500_v7  ;;  %7824 = vmatprep.mubr.f32.mxu0 %v4294_v11  ;;  %v4371_v39 = vand.u32 4294901760, %v4370_v30  ;;  %v4385_v1 = vand.u32 4294901760, %v4384_v57  ;;  %v4392_v52 = vand.u32 4294901760, %v4391_v22  ;;  %v10768_v11 = vand.u32 4294901760, %v10754_v40 }
 0x4b6   :  { %7836 = vmatpush3.msra.mxu1 %v4343_v28  ;;  %7794 = vmatprep.subr.mxu0 %v10514_v12  ;;  %v10751_v28 = vand.u32 4294901760, %v10732_v56 }
 0x4b7   :  { %7837 = vmatprep.subr.mxu1 %v4350_v63  ;;  %7795 = vmatpush3.msra.mxu0 %v10514_v12  ;;  %v4419_v59 = vsub.f32 %v10754_v40, %v10768_v11 }
 0x4b8   :  { %7838 = vmatpush3.msra.mxu1 %v4350_v63  ;;  %7796 = vmatprep.subr.mxu0 %v10526_v27  ;;  %v10761_v63 = vand.u32 4294901760, %v10744_v4  ;;  %v4405_v41 = vsub.f32 %v10732_v56, %v10751_v28 }
 0x4b9   :  { %7839 = vmatprep.subr.mxu1 %v4357_v45  ;;  %7797 = vmatpush3.msra.mxu0 %v10526_v27 }
 0x4ba   :  { %7840 = vmatpush3.msra.mxu1 %v4357_v45  ;;  %7798 = vmatprep.subr.mxu0 %v10538_v23  ;;  %v3489_v45 = vld [vmem:[#allocation3 + $0x8] sm:$0xff]  ;;  %v4412_v30 = vsub.f32 %v10744_v4, %v10761_v63 }
 0x4bb   :  { %7841 = vmatprep.subr.mxu1 %v4364_v37  ;;  %7799 = vmatpush3.msra.mxu0 %v10538_v23 }
 0x4bc   :  { %7842 = vmatpush3.msra.mxu1 %v4364_v37  ;;  %7800 = vmatprep.subr.mxu0 %v10553_v58  ;;  %v4406_v37 = vand.u32 4294901760, %v4405_v41  ;;  %v4413_v57 = vand.u32 4294901760, %v4412_v30 }
 0x4bd   :  { %7843 = vmatprep.subr.mxu1 %v4371_v39  ;;  %7801 = vmatpush3.msra.mxu0 %v10553_v58 }
 0x4be   :  { %7844 = vmatpush3.msra.mxu1 %v4371_v39  ;;  %7802 = vmatprep.subr.mxu0 %v10568_v24  ;;  %v10778_v39 = vand.u32 4294901760, %v3489_v45 }
 0x4bf   :  { %7845 = vmatprep.subr.mxu1 %v4378_v47  ;;  %7803 = vmatpush3.msra.mxu0 %v10568_v24 }
 0x4c0   :  { %7846 = vmatpush3.msra.mxu1 %v4378_v47  ;;  %7804 = vmatprep.subr.mxu0 %v10587_v36  ;;  %v4420_v47 = vand.u32 4294901760, %v4419_v59  ;;  %v10785_v22 = vsub.f32 %v3489_v45, %v10778_v39  ;;  %v5667_v45 = vld [vmem:[%s11353_s4 + $0x120] sm:$0xff] }
 0x4c1   :  { %7847 = vmatprep.subr.mxu1 %v4385_v1  ;;  %7805 = vmatpush3.msra.mxu0 %v10587_v36 }
 0x4c2   :  { %7848 = vmatpush3.msra.mxu1 %v4385_v1  ;;  %7806 = vmatprep.subr.mxu0 %v10601_v3  ;;  %v4302_v1 = vand.u32 4294901760, %v10785_v22 }
 0x4c3   :  { %7849 = vmatprep.subr.mxu1 %v4392_v52  ;;  %7807 = vmatpush3.msra.mxu0 %v10601_v3 }
 0x4c4   :  { %7850 = vmatpush3.msra.mxu1 %v4392_v52  ;;  %7808 = vmatprep.subr.mxu0 %v10626_v16  ;;  %v4303_v53 = vsub.f32 %v10785_v22, %v4302_v1 }
 0x4c5   :  { %7851 = vmatprep.subr.mxu1 %v4399_v31  ;;  %7809 = vmatpush3.msra.mxu0 %v10626_v16 }
 0x4c6   :  { %7852 = vmatpush3.msra.mxu1 %v4399_v31  ;;  %7810 = vmatprep.subr.mxu0 %v10643_v14 }
 0x4c7   :  { %7853 = vmatprep.subr.mxu1 %v4406_v37  ;;  %7811 = vmatpush3.msra.mxu0 %v10643_v14 }
 0x4c8   :  { %7854 = vmatpush3.msra.mxu1 %v4406_v37  ;;  %7812 = vmatprep.subr.mxu0 %v10659_v13 }
 0x4c9   :  { %7855 = vmatprep.subr.mxu1 %v4413_v57  ;;  %7813 = vmatpush3.msra.mxu0 %v10659_v13 }
 0x4ca   :  { %7856 = vmatpush3.msra.mxu1 %v4413_v57  ;;  %7814 = vmatprep.subr.mxu0 %v10677_v18  ;;  %v5666_v57 = vld [vmem:[%s11353_s4 + $0x118] sm:$0xff] }
 0x4cb   :  { %7857 = vmatprep.subr.mxu1 %v4420_v47  ;;  %7815 = vmatpush3.msra.mxu0 %v10677_v18 }
 0x4cc   :  { %7858 = vmatpush3.msra.mxu1 %v4420_v47  ;;  %7816 = vmatprep.subr.mxu0 %v10692_v20 }
 0x4cd   :  { %7860 = vmatmul.mubr.f32.vlgmr.msra.gmra.mxu1 %v10778_v39  ;;  %7897 = vmatprep.subr.mxu1 %v10500_v7 }
 0x4ce   :  { %7817 = vmatpush3.msra.mxu0 %v10692_v20  ;;  %7898 = vmatpush3.msra.mxu1 %v10500_v7 }
 0x4cf   :  { %7929 = vmatprep.mubr.f32.mxu1 %v4292_v32  ;;  %7818 = vmatprep.subr.mxu0 %v10707_v8  ;;  %v4304_v32 = vand.u32 4294901760, %v4303_v53 }
 0x4d0   :  { %7899 = vmatprep.subr.mxu1 %v10514_v12  ;;  %7819 = vmatpush3.msra.mxu0 %v10707_v8 }
 0x4d1   :  { %7900 = vmatpush3.msra.mxu1 %v10514_v12  ;;  %7820 = vmatprep.subr.mxu0 %v10722_v61 }
 0x4d2   :  { %7901 = vmatprep.subr.mxu1 %v10526_v27  ;;  %7821 = vmatpush3.msra.mxu0 %v10722_v61 }
 0x4d3   :  { %7902 = vmatpush3.msra.mxu1 %v10526_v27  ;;  %7822 = vmatprep.subr.mxu0 %v10734_v6 }
 0x4d4   :  { %7903 = vmatprep.subr.mxu1 %v10538_v23  ;;  %7823 = vmatpush3.msra.mxu0 %v10734_v6 }
 0x4d5   :  { %7904 = vmatpush3.msra.mxu1 %v10538_v23  ;;  %7825 = vmatmul.mubr.f32.vlgmr.msra.gmra.mxu0 %v4304_v32  ;;  %v5665_v32 = vld [vmem:[%s11353_s4 + $0x110] sm:$0xff] }
 0x4d6   :  { %7862 = vmatprep.subr.mxu0 %v10519_v44  ;;  %7905 = vmatprep.subr.mxu1 %v10553_v58 }
 0x4d7   :  { %7863 = vmatpush3.msra.mxu0 %v10519_v44  ;;  %7894 = vmatprep.mubr.f32.mxu0 %v10609_v26  ;;  %v5677_v44 = vld [vmem:[%s11353_s4 + $0x170] sm:$0xff] }
 0x4d8   :  { %7906 = vmatpush3.msra.mxu1 %v10553_v58  ;;  %7864 = vmatprep.subr.mxu0 %v10536_v46 }
 0x4d9   :  { %7907 = vmatprep.subr.mxu1 %v10568_v24  ;;  %7865 = vmatpush3.msra.mxu0 %v10536_v46  ;;  %v10912_v46 = vand.u32 4294901760, %v5677_v44 }
 0x4da   :  { %7908 = vmatpush3.msra.mxu1 %v10568_v24  ;;  %7866 = vmatprep.subr.mxu0 %v10551_v43 }
 0x4db   :  { %7909 = vmatprep.subr.mxu1 %v10587_v36  ;;  %7867 = vmatpush3.msra.mxu0 %v10551_v43 }
 0x4dc   :  { %7910 = vmatpush3.msra.mxu1 %v10587_v36  ;;  %7868 = vmatprep.subr.mxu0 %v10566_v29 }
 0x4dd   :  { %7911 = vmatprep.subr.mxu1 %v10601_v3  ;;  %7869 = vmatpush3.msra.mxu0 %v10566_v29 }
 0x4de   :  { %7912 = vmatpush3.msra.mxu1 %v10601_v3  ;;  %7870 = vmatprep.subr.mxu0 %v10585_v21 }
 0x4df   :  { %7913 = vmatprep.subr.mxu1 %v10626_v16  ;;  %7871 = vmatpush3.msra.mxu0 %v10585_v21 }
 0x4e0   :  { %7914 = vmatpush3.msra.mxu1 %v10626_v16  ;;  %7872 = vmatprep.subr.mxu0 %v10599_v0 }
 0x4e1   :  { %7915 = vmatprep.subr.mxu1 %v10643_v14  ;;  %7873 = vmatpush3.msra.mxu0 %v10599_v0 }
 0x4e2   :  { %7916 = vmatpush3.msra.mxu1 %v10643_v14  ;;  %7874 = vmatprep.subr.mxu0 %v10619_v34 }
 0x4e3   :  { %7917 = vmatprep.subr.mxu1 %v10659_v13  ;;  %7875 = vmatpush3.msra.mxu0 %v10619_v34 }
 0x4e4   :  { %7918 = vmatpush3.msra.mxu1 %v10659_v13  ;;  %7876 = vmatprep.subr.mxu0 %v10636_v42 }
 0x4e5   :  { %7919 = vmatprep.subr.mxu1 %v10677_v18  ;;  %7877 = vmatpush3.msra.mxu0 %v10636_v42 }
 0x4e6   :  { %7920 = vmatpush3.msra.mxu1 %v10677_v18  ;;  %7878 = vmatprep.subr.mxu0 %v10657_v35 }
 0x4e7   :  { %7921 = vmatprep.subr.mxu1 %v10692_v20  ;;  %7879 = vmatpush3.msra.mxu0 %v10657_v35 }
 0x4e8   :  { %7922 = vmatpush3.msra.mxu1 %v10692_v20  ;;  %7880 = vmatprep.subr.mxu0 %v10675_v25 }
 0x4e9   :  { %7923 = vmatprep.subr.mxu1 %v10707_v8  ;;  %7881 = vmatpush3.msra.mxu0 %v10675_v25  ;;  %v5670_v25 = vld [vmem:[%s11353_s4 + $0x138] sm:$0xff] }
 0x4ea   :  { %7924 = vmatpush3.msra.mxu1 %v10707_v8  ;;  %7882 = vmatprep.subr.mxu0 %v10690_v60 }
 0x4eb   :  { %7925 = vmatprep.subr.mxu1 %v10722_v61  ;;  %7883 = vmatpush3.msra.mxu0 %v10690_v60 }
 0x4ec   :  { %7926 = vmatpush3.msra.mxu1 %v10722_v61  ;;  %7884 = vmatprep.subr.mxu0 %v10705_v48 }
 0x4ed   :  { %7927 = vmatprep.subr.mxu1 %v10734_v6  ;;  %7885 = vmatpush3.msra.mxu0 %v10705_v48  ;;  %v5669_v48 = vld [vmem:[%s11353_s4 + $0x130] sm:$0xff] }
 0x4ee   :  { %7928 = vmatpush3.msra.mxu1 %v10734_v6  ;;  %7886 = vmatprep.subr.mxu0 %v10720_v15 }
 0x4ef   :  { %7930 = vmatmul.mubr.f32.vlgmr.msra.gmra.mxu1 %v4302_v1  ;;  %7967 = vmatprep.subr.mxu1 %v10500_v7 }
 0x4f0   :  { %7887 = vmatpush3.msra.mxu0 %v10720_v15  ;;  %7968 = vmatpush3.msra.mxu1 %v10500_v7  ;;  %v5678_v7 = vld [vmem:[%s11353_s4 + $0x178] sm:$0xff] }
 0x4f1   :  { %7999 = vmatprep.mubr.f32.mxu1 %v10574_v5  ;;  %7888 = vmatprep.subr.mxu0 %v10732_v56 }
 0x4f2   :  { %7969 = vmatprep.subr.mxu1 %v10514_v12  ;;  %7889 = vmatpush3.msra.mxu0 %v10732_v56 }
 0x4f3   :  { %7970 = vmatpush3.msra.mxu1 %v10514_v12  ;;  %7890 = vmatprep.subr.mxu0 %v10744_v4  ;;  %v10898_v12 = vand.u32 4294901760, %v5678_v7 }
 0x4f4   :  { %7971 = vmatprep.subr.mxu1 %v10526_v27  ;;  %7891 = vmatpush3.msra.mxu0 %v10744_v4  ;;  %v5668_v4 = vld [vmem:[%s11353_s4 + $0x128] sm:$0xff] }
 0x4f5   :  { %7972 = vmatpush3.msra.mxu1 %v10526_v27  ;;  %7892 = vmatprep.subr.mxu0 %v10754_v40  ;;  %v5676_v27 = vld [vmem:[%s11353_s4 + $0x168] sm:$0xff] }
 0x4f6   :  { %7973 = vmatprep.subr.mxu1 %v10538_v23  ;;  %7893 = vmatpush3.msra.mxu0 %v10754_v40  ;;  %v10924_v43 = vand.u32 4294901760, %v5676_v27 }
 0x4f7   :  { %7974 = vmatpush3.msra.mxu1 %v10538_v23  ;;  %7895 = vmatmul.mubr.f32.vlgmr.msra.gmra.mxu0 %v10785_v22  ;;  %v10917_v23 = vsub.f32 %v5678_v7, %v10898_v12  ;;  %v11075_v22 = vand.u32 4294901760, %v5667_v45 }
 0x4f8   :  { %7932 = vmatprep.subr.mxu0 %v10543_v17  ;;  %7975 = vmatprep.subr.mxu1 %v10553_v58 }
 0x4f9   :  { %7933 = vmatpush3.msra.mxu0 %v10543_v17  ;;  %7964 = vmatprep.mubr.f32.mxu0 %v10574_v5  ;;  %v5675_v17 = vld [vmem:[%s11353_s4 + $0x160] sm:$0xff] }
 0x4fa   :  { %7976 = vmatpush3.msra.mxu1 %v10553_v58  ;;  %7934 = vmatprep.subr.mxu0 %v10563_v54  ;;  %v5674_v58 = vld [vmem:[%s11353_s4 + $0x158] sm:$0xff]  ;;  %v10936_v29 = vand.u32 4294901760, %v5675_v17 }
 0x4fb   :  { %7977 = vmatprep.subr.mxu1 %v10568_v24  ;;  %7935 = vmatpush3.msra.mxu0 %v10563_v54  ;;  %v10934_v54 = vsub.f32 %v5677_v44, %v10912_v46  ;;  %v4893_v5 = vld [vmem:[#allocation3 + $0x2] sm:$0xff]  ;;  %v10948_v21 = vand.u32 4294901760, %v5674_v58 }
 0x4fc   :  { %7978 = vmatpush3.msra.mxu1 %v10568_v24  ;;  %7936 = vmatprep.subr.mxu0 %v10582_v9  ;;  %v10941_v24 = vand.u32 4294901760, %v10917_v23  ;;  %v10960_v0 = vand.u32 4294901760, %v4893_v5  ;;  %v10966_v26 = vsub.f32 %v5675_v17, %v10936_v29 }
 0x4fd   :  { %7979 = vmatprep.subr.mxu1 %v10587_v36  ;;  %7937 = vmatpush3.msra.mxu0 %v10582_v9  ;;  %v10946_v9 = vsub.f32 %v5676_v27, %v10924_v43  ;;  %v10983_v42 = vsub.f32 %v5674_v58, %v10948_v21  ;;  %v11090_v27 = vand.u32 4294901760, %v5666_v57  ;;  %v5664_v58 = vld [vmem:[%s11353_s4 + $0x108] sm:$0xff] }
 0x4fe   :  { %7980 = vmatpush3.msra.mxu1 %v10587_v36  ;;  %7938 = vmatprep.subr.mxu0 %v10596_v10  ;;  %v5673_v36 = vld [vmem:[%s11353_s4 + $0x150] sm:$0xff]  ;;  %v10994_v35 = vand.u32 4294901760, %v10966_v26 }
 0x4ff   :  { %7981 = vmatprep.subr.mxu1 %v10601_v3  ;;  %7939 = vmatpush3.msra.mxu0 %v10596_v10  ;;  %v5672_v10 = vld [vmem:[%s11353_s4 + $0x148] sm:$0xff]  ;;  %v10972_v34 = vand.u32 4294901760, %v5673_v36 }
 0x500   :  { %7982 = vmatpush3.msra.mxu1 %v10601_v3  ;;  %7940 = vmatprep.subr.mxu0 %v10616_v19  ;;  %v10963_v3 = vand.u32 4294901760, %v10934_v54  ;;  %v5038_v15 = vsub.f32 %v10966_v26, %v10994_v35 }
 0x501   :  { %7983 = vmatprep.subr.mxu1 %v10626_v16  ;;  %7941 = vmatpush3.msra.mxu0 %v10616_v19  ;;  %v5017_v19 = vsub.f32 %v10917_v23, %v10941_v24 }
 0x502   :  { %7984 = vmatpush3.msra.mxu1 %v10626_v16  ;;  %7942 = vmatprep.subr.mxu0 %v10633_v62  ;;  %v5671_v16 = vld [vmem:[%s11353_s4 + $0x140] sm:$0xff]  ;;  %v5039_v30 = vand.u32 4294901760, %v5038_v15 }
 0x503   :  { %7985 = vmatprep.subr.mxu1 %v10643_v14  ;;  %7943 = vmatpush3.msra.mxu0 %v10633_v62  ;;  %v10980_v62 = vand.u32 4294901760, %v10946_v9 }
 0x504   :  { %7986 = vmatpush3.msra.mxu1 %v10643_v14  ;;  %7944 = vmatprep.subr.mxu0 %v10649_v49  ;;  %v10985_v14 = vand.u32 4294901760, %v5672_v10 }
 0x505   :  { %7987 = vmatprep.subr.mxu1 %v10659_v13  ;;  %7945 = vmatpush3.msra.mxu0 %v10649_v49  ;;  %v5024_v49 = vsub.f32 %v10934_v54, %v10963_v3  ;;  %v5031_v60 = vsub.f32 %v10946_v9, %v10980_v62 }
 0x506   :  { %7988 = vmatpush3.msra.mxu1 %v10659_v13  ;;  %7946 = vmatprep.subr.mxu0 %v10665_v50  ;;  %v10997_v13 = vsub.f32 %v4893_v5, %v10960_v0 }
 0x507   :  { %7989 = vmatprep.subr.mxu1 %v10677_v18  ;;  %7947 = vmatpush3.msra.mxu0 %v10665_v50  ;;  %v10999_v50 = vand.u32 4294901760, %v5671_v16  ;;  %v5032_v40 = vand.u32 4294901760, %v5031_v60 }
 0x508   :  { %7990 = vmatpush3.msra.mxu1 %v10677_v18  ;;  %7948 = vmatprep.subr.mxu0 %v10687_v2  ;;  %v5018_v18 = vand.u32 4294901760, %v5017_v19  ;;  %v11105_v19 = vand.u32 4294901760, %v5665_v32 }
 0x509   :  { %7991 = vmatprep.subr.mxu1 %v10692_v20  ;;  %7949 = vmatpush3.msra.mxu0 %v10687_v2  ;;  %v11007_v2 = vsub.f32 %v5673_v36, %v10972_v34  ;;  %v11032_v56 = vsub.f32 %v5671_v16, %v10999_v50  ;;  %v5663_v16 = vld [vmem:[%s11353_s4 + $0x100] sm:$0xff] }
 0x50a   :  { %7992 = vmatpush3.msra.mxu1 %v10692_v20  ;;  %7950 = vmatprep.subr.mxu0 %v10702_v33  ;;  %v11014_v20 = vand.u32 4294901760, %v10983_v42  ;;  %v11130_v15 = vsub.f32 %v5665_v32, %v11105_v19 }
 0x50b   :  { %7993 = vmatprep.subr.mxu1 %v10707_v8  ;;  %7951 = vmatpush3.msra.mxu0 %v10702_v33  ;;  %v11017_v33 = vsub.f32 %v5672_v10, %v10985_v14  ;;  %v11064_v59 = vand.u32 4294901760, %v11032_v56  ;;  %v11103_v10 = vsub.f32 %v5667_v45, %v11075_v22 }
 0x50c   :  { %7994 = vmatpush3.msra.mxu1 %v10707_v8  ;;  %7952 = vmatprep.subr.mxu0 %v10717_v38  ;;  %v11024_v8 = vand.u32 4294901760, %v5670_v25  ;;  %v5045_v52 = vsub.f32 %v10983_v42, %v11014_v20 }
 0x50d   :  { %7995 = vmatprep.subr.mxu1 %v10722_v61  ;;  %7953 = vmatpush3.msra.mxu0 %v10717_v38  ;;  %v5025_v38 = vand.u32 4294901760, %v5024_v49  ;;  %v11047_v41 = vand.u32 4294901760, %v11017_v33  ;;  %v5066_v17 = vsub.f32 %v11032_v56, %v11064_v59 }
 0x50e   :  { %7996 = vmatpush3.msra.mxu1 %v10722_v61  ;;  %7954 = vmatprep.subr.mxu0 %v10729_v55  ;;  %v4995_v61 = vand.u32 4294901760, %v10997_v13  ;;  %v11055_v31 = vsub.f32 %v5670_v25, %v11024_v8  ;;  %v5046_v1 = vand.u32 4294901760, %v5045_v52  ;;  %v11118_v25 = vsub.f32 %v5666_v57, %v11090_v27 }
 0x50f   :  { %7997 = vmatprep.subr.mxu1 %v10734_v6  ;;  %7955 = vmatpush3.msra.mxu0 %v10729_v55  ;;  %v11039_v55 = vand.u32 4294901760, %v11007_v2  ;;  %v5059_v53 = vsub.f32 %v11017_v33, %v11047_v41  ;;  %v5067_v60 = vand.u32 4294901760, %v5066_v17 }
 0x510   :  { %7998 = vmatpush3.msra.mxu1 %v10734_v6  ;;  %7956 = vmatprep.subr.mxu0 %v10741_v51  ;;  %v11041_v6 = vand.u32 4294901760, %v5669_v48  ;;  %v4996_v37 = vsub.f32 %v10997_v13, %v4995_v61  ;;  %v11085_v7 = vand.u32 4294901760, %v11055_v31  ;;  %v11139_v45 = vand.u32 4294901760, %v11118_v25 }
 0x511   :  { %8000 = vmatmul.mubr.f32.vlgmr.msra.gmra.mxu1 %v10778_v39  ;;  %8037 = vmatprep.subr.mxu1 %v5018_v18  ;;  %v5052_v47 = vsub.f32 %v11007_v2, %v11039_v55 }
 0x512   :  { %7957 = vmatpush3.msra.mxu0 %v10741_v51  ;;  %8038 = vmatpush3.msra.mxu1 %v5018_v18  ;;  %v11057_v51 = vand.u32 4294901760, %v5668_v4  ;;  %v11120_v18 = vand.u32 4294901760, %v5664_v58  ;;  %v5101_v32 = vsub.f32 %v11118_v25, %v11139_v45 }
 0x513   :  { %8069 = vmatprep.mubr.f32.mxu1 %v10960_v0  ;;  %7958 = vmatprep.subr.mxu0 %v10751_v28  ;;  %v5053_v5 = vand.u32 4294901760, %v5052_v47  ;;  %v11149_v47 = vand.u32 4294901760, %v11130_v15 }
 0x514   :  { %8039 = vmatprep.subr.mxu1 %v5025_v38  ;;  %7959 = vmatpush3.msra.mxu0 %v10751_v28  ;;  %v11073_v28 = vsub.f32 %v5669_v48, %v11041_v6  ;;  %v11088_v44 = vsub.f32 %v5668_v4, %v11057_v51  ;;  %v11132_v4 = vand.u32 4294901760, %v5663_v16 }
 0x515   :  { %8040 = vmatpush3.msra.mxu1 %v5025_v38  ;;  %7960 = vmatprep.subr.mxu0 %v10761_v63  ;;  %v11127_v38 = vand.u32 4294901760, %v11103_v10 }
 0x516   :  { %8041 = vmatprep.subr.mxu1 %v5032_v40  ;;  %7961 = vmatpush3.msra.mxu0 %v10761_v63  ;;  %v4997_v63 = vand.u32 4294901760, %v4996_v37  ;;  %v11100_v36 = vand.u32 4294901760, %v11073_v28  ;;  %v11115_v49 = vand.u32 4294901760, %v11088_v44 }
 0x517   :  { %8042 = vmatpush3.msra.mxu1 %v5032_v40  ;;  %7962 = vmatprep.subr.mxu0 %v10768_v11  ;;  %v5094_v57 = vsub.f32 %v11103_v10, %v11127_v38 }
 0x518   :  { %8043 = vmatprep.subr.mxu1 %v5039_v30  ;;  %7963 = vmatpush3.msra.mxu0 %v10768_v11  ;;  %v5060_v11 = vand.u32 4294901760, %v5059_v53  ;;  %v5080_v48 = vsub.f32 %v11073_v28, %v11100_v36  ;;  %v5087_v52 = vsub.f32 %v11088_v44, %v11115_v49 }
 0x519   :  { %8044 = vmatpush3.msra.mxu1 %v5039_v30  ;;  %7965 = vmatmul.mubr.f32.vlgmr.msra.gmra.mxu0 %v10778_v39  ;;  %v5073_v39 = vsub.f32 %v11055_v31, %v11085_v7  ;;  %v11142_v30 = vsub.f32 %v5664_v58, %v11120_v18  ;;  %v5095_v17 = vand.u32 4294901760, %v5094_v57  ;;  %v5108_v58 = vsub.f32 %v11130_v15, %v11149_v47 }
 0x51a   :  { %8002 = vmatprep.subr.mxu0 %v10898_v12  ;;  %8045 = vmatprep.subr.mxu1 %v5046_v1  ;;  %v5081_v37 = vand.u32 4294901760, %v5080_v48  ;;  %v5088_v53 = vand.u32 4294901760, %v5087_v52 }
 0x51b   :  { %8003 = vmatpush3.msra.mxu0 %v10898_v12  ;;  %8034 = vmatprep.mubr.f32.mxu0 %v4997_v63  ;;  %v5074_v40 = vand.u32 4294901760, %v5073_v39  ;;  %v11159_v63 = vand.u32 4294901760, %v11142_v30 }
 0x51c   :  { %8046 = vmatpush3.msra.mxu1 %v5046_v1  ;;  %8004 = vmatprep.subr.mxu0 %v10912_v46  ;;  %v11152_v1 = vsub.f32 %v5663_v16, %v11132_v4  ;;  %v5102_v16 = vand.u32 4294901760, %v5101_v32 }
 0x51d   :  { %8047 = vmatprep.subr.mxu1 %v5053_v5  ;;  %8005 = vmatpush3.msra.mxu0 %v10912_v46  ;;  %v5115_v39 = vsub.f32 %v11142_v30, %v11159_v63 }
 0x51e   :  { %8048 = vmatpush3.msra.mxu1 %v5053_v5  ;;  %8006 = vmatprep.subr.mxu0 %v10924_v43  ;;  %v11166_v5 = vand.u32 4294901760, %v11152_v1 }
 0x51f   :  { %8049 = vmatprep.subr.mxu1 %v5060_v11  ;;  %8007 = vmatpush3.msra.mxu0 %v10924_v43  ;;  %v5116_v52 = vand.u32 4294901760, %v5115_v39 }
 0x520   :  { %8050 = vmatpush3.msra.mxu1 %v5060_v11  ;;  %8008 = vmatprep.subr.mxu0 %v10936_v29  ;;  %v4894_v11 = vld [vmem:[#allocation3 + $0xa] sm:$0xff]  ;;  %v5122_v48 = vsub.f32 %v11152_v1, %v11166_v5 }
 0x521   :  { %8051 = vmatprep.subr.mxu1 %v5067_v60  ;;  %8009 = vmatpush3.msra.mxu0 %v10936_v29 }
 0x522   :  { %8052 = vmatpush3.msra.mxu1 %v5067_v60  ;;  %8010 = vmatprep.subr.mxu0 %v10948_v21  ;;  %v5109_v60 = vand.u32 4294901760, %v5108_v58 }
 0x523   :  { %8053 = vmatprep.subr.mxu1 %v5074_v40  ;;  %8011 = vmatpush3.msra.mxu0 %v10948_v21 }
 0x524   :  { %8054 = vmatpush3.msra.mxu1 %v5074_v40  ;;  %8012 = vmatprep.subr.mxu0 %v10972_v34  ;;  %v11176_v40 = vand.u32 4294901760, %v4894_v11 }
 0x525   :  { %8055 = vmatprep.subr.mxu1 %v5081_v37  ;;  %8013 = vmatpush3.msra.mxu0 %v10972_v34 }
 0x526   :  { %8056 = vmatpush3.msra.mxu1 %v5081_v37  ;;  %8014 = vmatprep.subr.mxu0 %v10985_v14  ;;  %v5123_v37 = vand.u32 4294901760, %v5122_v48  ;;  %v11183_v57 = vsub.f32 %v4894_v11, %v11176_v40 }
 0x527   :  { %8057 = vmatprep.subr.mxu1 %v5088_v53  ;;  %8015 = vmatpush3.msra.mxu0 %v10985_v14 }
 0x528   :  { %8058 = vmatpush3.msra.mxu1 %v5088_v53  ;;  %8016 = vmatprep.subr.mxu0 %v10999_v50  ;;  %v5005_v53 = vand.u32 4294901760, %v11183_v57 }
 0x529   :  { %8059 = vmatprep.subr.mxu1 %v5095_v17  ;;  %8017 = vmatpush3.msra.mxu0 %v10999_v50 }
 0x52a   :  { %8060 = vmatpush3.msra.mxu1 %v5095_v17  ;;  %8018 = vmatprep.subr.mxu0 %v11024_v8  ;;  %v5006_v32 = vsub.f32 %v11183_v57, %v5005_v53 }
 0x52b   :  { %8061 = vmatprep.subr.mxu1 %v5102_v16  ;;  %8019 = vmatpush3.msra.mxu0 %v11024_v8 }
 0x52c   :  { %8062 = vmatpush3.msra.mxu1 %v5102_v16  ;;  %8020 = vmatprep.subr.mxu0 %v11041_v6 }
 0x52d   :  { %8063 = vmatprep.subr.mxu1 %v5109_v60  ;;  %8021 = vmatpush3.msra.mxu0 %v11041_v6 }
 0x52e   :  { %8064 = vmatpush3.msra.mxu1 %v5109_v60  ;;  %8022 = vmatprep.subr.mxu0 %v11057_v51 }
 0x52f   :  { %8065 = vmatprep.subr.mxu1 %v5116_v52  ;;  %8023 = vmatpush3.msra.mxu0 %v11057_v51 }
 0x530   :  { %8066 = vmatpush3.msra.mxu1 %v5116_v52  ;;  %8024 = vmatprep.subr.mxu0 %v11075_v22 }
 0x531   :  { %8067 = vmatprep.subr.mxu1 %v5123_v37  ;;  %8025 = vmatpush3.msra.mxu0 %v11075_v22 }
 0x532   :  { %8068 = vmatpush3.msra.mxu1 %v5123_v37  ;;  %8026 = vmatprep.subr.mxu0 %v11090_v27 }
 0x533   :  { %8070 = vmatmul.mubr.f32.vlgmr.msra.gmra.mxu1 %v11176_v40  ;;  %8107 = vmatprep.subr.mxu1 %v10898_v12 }
 0x534   :  { %8027 = vmatpush3.msra.mxu0 %v11090_v27  ;;  %8108 = vmatpush3.msra.mxu1 %v10898_v12 }
 0x535   :  { %8139 = vmatprep.mubr.f32.mxu1 %v4995_v61  ;;  %8028 = vmatprep.subr.mxu0 %v11105_v19  ;;  %v5007_v61 = vand.u32 4294901760, %v5006_v32 }
 0x536   :  { %8109 = vmatprep.subr.mxu1 %v10912_v46  ;;  %8029 = vmatpush3.msra.mxu0 %v11105_v19 }
 0x537   :  { %8110 = vmatpush3.msra.mxu1 %v10912_v46  ;;  %8030 = vmatprep.subr.mxu0 %v11120_v18 }
 0x538   :  { %8111 = vmatprep.subr.mxu1 %v10924_v43  ;;  %8031 = vmatpush3.msra.mxu0 %v11120_v18 }
 0x539   :  { %8112 = vmatpush3.msra.mxu1 %v10924_v43  ;;  %8032 = vmatprep.subr.mxu0 %v11132_v4 }
 0x53a   :  { %8113 = vmatprep.subr.mxu1 %v10936_v29  ;;  %8033 = vmatpush3.msra.mxu0 %v11132_v4 }
 0x53b   :  { %8114 = vmatpush3.msra.mxu1 %v10936_v29  ;;  %8035 = vmatmul.mubr.f32.vlgmr.msra.gmra.mxu0 %v5007_v61 }
 0x53c   :  { %8072 = vmatprep.subr.mxu0 %v10917_v23  ;;  %8115 = vmatprep.subr.mxu1 %v10948_v21 }
 0x53d   :  { %8073 = vmatpush3.msra.mxu0 %v10917_v23  ;;  %8104 = vmatprep.mubr.f32.mxu0 %v10997_v13 }
 0x53e   :  { %8116 = vmatpush3.msra.mxu1 %v10948_v21  ;;  %8074 = vmatprep.subr.mxu0 %v10934_v54 }
 0x53f   :  { %8117 = vmatprep.subr.mxu1 %v10972_v34  ;;  %8075 = vmatpush3.msra.mxu0 %v10934_v54 }
 0x540   :  { %8118 = vmatpush3.msra.mxu1 %v10972_v34  ;;  %8076 = vmatprep.subr.mxu0 %v10946_v9 }
 0x541   :  { %8119 = vmatprep.subr.mxu1 %v10985_v14  ;;  %8077 = vmatpush3.msra.mxu0 %v10946_v9 }
 0x542   :  { %8120 = vmatpush3.msra.mxu1 %v10985_v14  ;;  %8078 = vmatprep.subr.mxu0 %v10966_v26 }
 0x543   :  { %8121 = vmatprep.subr.mxu1 %v10999_v50  ;;  %8079 = vmatpush3.msra.mxu0 %v10966_v26 }
 0x544   :  { %8122 = vmatpush3.msra.mxu1 %v10999_v50  ;;  %8080 = vmatprep.subr.mxu0 %v10983_v42 }
 0x545   :  { %8123 = vmatprep.subr.mxu1 %v11024_v8  ;;  %8081 = vmatpush3.msra.mxu0 %v10983_v42 }
 0x546   :  { %8124 = vmatpush3.msra.mxu1 %v11024_v8  ;;  %8082 = vmatprep.subr.mxu0 %v11007_v2 }
 0x547   :  { %8125 = vmatprep.subr.mxu1 %v11041_v6  ;;  %8083 = vmatpush3.msra.mxu0 %v11007_v2 }
 0x548   :  { %8126 = vmatpush3.msra.mxu1 %v11041_v6  ;;  %8084 = vmatprep.subr.mxu0 %v11017_v33 }
 0x549   :  { %8127 = vmatprep.subr.mxu1 %v11057_v51  ;;  %8085 = vmatpush3.msra.mxu0 %v11017_v33 }
 0x54a   :  { %8128 = vmatpush3.msra.mxu1 %v11057_v51  ;;  %8086 = vmatprep.subr.mxu0 %v11032_v56 }
 0x54b   :  { %8129 = vmatprep.subr.mxu1 %v11075_v22  ;;  %8087 = vmatpush3.msra.mxu0 %v11032_v56 }
 0x54c   :  { %8130 = vmatpush3.msra.mxu1 %v11075_v22  ;;  %8088 = vmatprep.subr.mxu0 %v11055_v31 }
 0x54d   :  { %8131 = vmatprep.subr.mxu1 %v11090_v27  ;;  %8089 = vmatpush3.msra.mxu0 %v11055_v31 }
 0x54e   :  { %8132 = vmatpush3.msra.mxu1 %v11090_v27  ;;  %8090 = vmatprep.subr.mxu0 %v11073_v28 }
 0x54f   :  { %8133 = vmatprep.subr.mxu1 %v11105_v19  ;;  %8091 = vmatpush3.msra.mxu0 %v11073_v28 }
 0x550   :  { %8134 = vmatpush3.msra.mxu1 %v11105_v19  ;;  %8092 = vmatprep.subr.mxu0 %v11088_v44 }
 0x551   :  { %8135 = vmatprep.subr.mxu1 %v11120_v18  ;;  %8093 = vmatpush3.msra.mxu0 %v11088_v44 }
 0x552   :  { %8136 = vmatpush3.msra.mxu1 %v11120_v18  ;;  %8094 = vmatprep.subr.mxu0 %v11103_v10 }
 0x553   :  { %8137 = vmatprep.subr.mxu1 %v11132_v4  ;;  %8095 = vmatpush3.msra.mxu0 %v11103_v10 }
 0x554   :  { %8138 = vmatpush3.msra.mxu1 %v11132_v4  ;;  %8096 = vmatprep.subr.mxu0 %v11118_v25 }
 0x555   :  { %8140 = vmatmul.mubr.f32.vlgmr.msra.gmra.mxu1 %v5005_v53  ;;  %8177 = vmatprep.subr.mxu1 %v10898_v12 }
 0x556   :  { %8097 = vmatpush3.msra.mxu0 %v11118_v25  ;;  %8178 = vmatpush3.msra.mxu1 %v10898_v12  ;;  %v7616_v12 = vpop.f32.mrf.mxu0 }
 0x557   :  { %8209 = vmatprep.mubr.f32.mxu1 %v10960_v0  ;;  %8098 = vmatprep.subr.mxu0 %v11130_v15 }
 0x558   :  { %8179 = vmatprep.subr.mxu1 %v10912_v46  ;;  %8099 = vmatpush3.msra.mxu0 %v11130_v15  ;;  %v3612_v23 = vpop.f32.mrf.mxu0 }
 0x559   :  { %8180 = vmatpush3.msra.mxu1 %v10912_v46  ;;  %8100 = vmatprep.subr.mxu0 %v11142_v30  ;;  %v7651_v46 = vpop.f32.mrf.mxu1 }
 0x55a   :  { %8181 = vmatprep.subr.mxu1 %v10924_v43  ;;  %8101 = vmatpush3.msra.mxu0 %v11142_v30 }
 0x55b   :  { %8182 = vmatpush3.msra.mxu1 %v10924_v43  ;;  %8102 = vmatprep.subr.mxu0 %v11152_v1  ;;  %v7686_v43 = vpop.f32.mrf.mxu0  ;;  %v3773_v54 = vpop.f32.mrf.mxu1 }
 0x55c   :  { %8183 = vmatprep.subr.mxu1 %v10936_v29  ;;  %8103 = vmatpush3.msra.mxu0 %v11152_v1 }
 0x55d   :  { %8184 = vmatpush3.msra.mxu1 %v10936_v29  ;;  %8105 = vmatmul.mubr.f32.vlgmr.msra.gmra.mxu0 %v11183_v57  ;;  %v7721_v29 = vpop.f32.mrf.mxu1 }
 0x55e   :  { %8142 = vmatprep.subr.mxu0 %v10941_v24  ;;  %8185 = vmatprep.subr.mxu1 %v10948_v21 }
 0x55f   :  { %8143 = vmatpush3.msra.mxu0 %v10941_v24  ;;  %8174 = vmatprep.mubr.f32.mxu0 %v10960_v0  ;;  %v3883_v24 = vpop.f32.mrf.mxu0 }
 0x560   :  { %8186 = vmatpush3.msra.mxu1 %v10948_v21  ;;  %8144 = vmatprep.subr.mxu0 %v10963_v3  ;;  %v3979_v21 = vpop.f32.mrf.mxu1 }
 0x561   :  { %8187 = vmatprep.subr.mxu1 %v10972_v34  ;;  %8145 = vmatpush3.msra.mxu0 %v10963_v3 }
 0x562   :  { %8188 = vmatpush3.msra.mxu1 %v10972_v34  ;;  %8146 = vmatprep.subr.mxu0 %v10980_v62 }
 0x563   :  { %8189 = vmatprep.subr.mxu1 %v10985_v14  ;;  %8147 = vmatpush3.msra.mxu0 %v10980_v62 }
 0x564   :  { %8190 = vmatpush3.msra.mxu1 %v10985_v14  ;;  %8148 = vmatprep.subr.mxu0 %v10994_v35 }
 0x565   :  { %8191 = vmatprep.subr.mxu1 %v10999_v50  ;;  %8149 = vmatpush3.msra.mxu0 %v10994_v35  ;;  %v3780_v35 = vadd.f32 %v7651_v46, %v7616_v12 }
 0x566   :  { %8192 = vmatpush3.msra.mxu1 %v10999_v50  ;;  %8150 = vmatprep.subr.mxu0 %v11014_v20  ;;  %v3774_v50 = vadd.f32 %v3773_v54, %v3612_v23  ;;  %v5679_v23 = vld [vmem:[%s11352_s1 + $0x3] ss:$0 sm:$0xff] }
 0x567   :  { %8193 = vmatprep.subr.mxu1 %v11024_v8  ;;  %8151 = vmatpush3.msra.mxu0 %v11014_v20  ;;  %v3891_v2 = vadd.f32 %v7686_v43, %v3780_v35 }
 0x568   :  { %8194 = vmatpush3.msra.mxu1 %v11024_v8  ;;  %8152 = vmatprep.subr.mxu0 %v11039_v55  ;;  %v3884_v8 = vadd.f32 %v3883_v24, %v3774_v50 }
 0x569   :  { %8195 = vmatprep.subr.mxu1 %v11041_v6  ;;  %8153 = vmatpush3.msra.mxu0 %v11039_v55  ;;  %v3988_v55 = vadd.f32 %v7721_v29, %v3891_v2 }
 0x56a   :  { %8196 = vmatpush3.msra.mxu1 %v11041_v6  ;;  %8154 = vmatprep.subr.mxu0 %v11047_v41  ;;  %v3980_v31 = vadd.f32 %v3979_v21, %v3884_v8 }
 0x56b   :  { %8197 = vmatprep.subr.mxu1 %v11057_v51  ;;  %8155 = vmatpush3.msra.mxu0 %v11047_v41  ;;  %v7791_v0 = vpop.f32.mrf.mxu1 }
 0x56c   :  { %8198 = vmatpush3.msra.mxu1 %v11057_v51  ;;  %8156 = vmatprep.subr.mxu0 %v11064_v59 }
 0x56d   :  { %8199 = vmatprep.subr.mxu1 %v11075_v22  ;;  %8157 = vmatpush3.msra.mxu0 %v11064_v59  ;;  %v4199_v34 = vpop.f32.mrf.mxu1 }
 0x56e   :  { %8200 = vmatpush3.msra.mxu1 %v11075_v22  ;;  %8158 = vmatprep.subr.mxu0 %v11085_v7 }
 0x56f   :  { %8201 = vmatprep.subr.mxu1 %v11090_v27  ;;  %8159 = vmatpush3.msra.mxu0 %v11085_v7 }
 0x570   :  { %8202 = vmatpush3.msra.mxu1 %v11090_v27  ;;  %8160 = vmatprep.subr.mxu0 %v11100_v36 }
 0x571   :  { %8203 = vmatprep.subr.mxu1 %v11105_v19  ;;  %8161 = vmatpush3.msra.mxu0 %v11100_v36 }
 0x572   :  { %8204 = vmatpush3.msra.mxu1 %v11105_v19  ;;  %8162 = vmatprep.subr.mxu0 %v11115_v49 }
 0x573   :  { %8205 = vmatprep.subr.mxu1 %v11120_v18  ;;  %8163 = vmatpush3.msra.mxu0 %v11115_v49  ;;  %v7756_v9 = vpop.f32.mrf.mxu0 }
 0x574   :  { %8206 = vmatpush3.msra.mxu1 %v11120_v18  ;;  %8164 = vmatprep.subr.mxu0 %v11127_v38  ;;  %v4113_v41 = vadd.f32 %v7756_v9, %v3988_v55 }
 0x575   :  { %8207 = vmatprep.subr.mxu1 %v11132_v4  ;;  %8165 = vmatpush3.msra.mxu0 %v11127_v38  ;;  %v4106_v3 = vpop.f32.mrf.mxu0 }
 0x576   :  { %8208 = vmatpush3.msra.mxu1 %v11132_v4  ;;  %8166 = vmatprep.subr.mxu0 %v11139_v45  ;;  %v4107_v28 = vadd.f32 %v4106_v3, %v3980_v31  ;;  %v4206_v7 = vadd.f32 %v7791_v0, %v4113_v41 }
 0x577   :  { %8210 = vmatmul.mubr.f32.vlgmr.msra.gmra.mxu1 %v11176_v40  ;;  %8167 = vmatpush3.msra.mxu0 %v11139_v45 }
 0x578   :  { %8168 = vmatprep.subr.mxu0 %v11149_v47  ;;  %v4200_v36 = vadd.f32 %v4199_v34, %v4107_v28 }
 0x579   :  { %8169 = vmatpush3.msra.mxu0 %v11149_v47 }
 0x57a   :  { %8170 = vmatprep.subr.mxu0 %v11159_v63 }
 0x57b   :  { %8171 = vmatpush3.msra.mxu0 %v11159_v63 }
 0x57c   :  { %8172 = vmatprep.subr.mxu0 %v11166_v5 }
 0x57d   :  { %8173 = vmatpush3.msra.mxu0 %v11166_v5 }
 0x57e   :  { %8175 = vmatmul.mubr.f32.vlgmr.msra.gmra.mxu0 %v11176_v40 }
 0x58d   :  { %v7861_v62 = vpop.f32.mrf.mxu1 }
 0x58f   :  { %v4457_v13 = vpop.f32.mrf.mxu1 }
 0x595   :  { %v7826_v26 = vpop.f32.mrf.mxu0 }
 0x596   :  { %v4307_v27 = vadd.f32 %v7826_v26, %v4206_v7 }
 0x597   :  { %v4296_v42 = vpop.f32.mrf.mxu0 }
 0x598   :  { %v4297_v49 = vadd.f32 %v4296_v42, %v4200_v36  ;;  %v4464_v18 = vadd.f32 %v7861_v62, %v4307_v27 }
 0x59a   :  { %v4458_v4 = vadd.f32 %v4457_v13, %v4297_v49 }
 0x5af   :  { %v7931_v20 = vpop.f32.mrf.mxu1 }
 0x5b1   :  { %v4663_v6 = vpop.f32.mrf.mxu1 }
 0x5b7   :  { %v7896_v14 = vpop.f32.mrf.mxu0 }
 0x5b8   :  { %v4575_v15 = vadd.f32 %v7896_v14, %v4464_v18 }
 0x5b9   :  { %v4567_v33 = vpop.f32.mrf.mxu0 }
 0x5ba   :  { %v4568_v1 = vadd.f32 %v4567_v33, %v4458_v4  ;;  %v4672_v58 = vadd.f32 %v7931_v20, %v4575_v15 }
 0x5bc   :  { %v4664_v39 = vadd.f32 %v4663_v6, %v4568_v1 }
 0x5d1   :  { %v8001_v51 = vpop.f32.mrf.mxu1 }
 0x5d3   :  { %v4883_v44 = vpop.f32.mrf.mxu1 }
 0x5d9   :  { %v7966_v56 = vpop.f32.mrf.mxu0 }
 0x5da   :  { %v4797_v16 = vadd.f32 %v7966_v56, %v4672_v58 }
 0x5db   :  { %v4790_v59 = vpop.f32.mrf.mxu0 }
 0x5dc   :  { %v4791_v52 = vadd.f32 %v4790_v59, %v4664_v39  ;;  %v4890_v32 = vadd.f32 %v8001_v51, %v4797_v16 }
 0x5de   :  { %v4884_v43 = vadd.f32 %v4883_v44, %v4791_v52 }
 0x5f3   :  { %v8071_v10 = vpop.f32.mrf.mxu1 }
 0x5f5   :  { %v5160_v38 = vpop.f32.mrf.mxu1 }
 0x5fb   :  { %v8036_v22 = vpop.f32.mrf.mxu0 }
 0x5fc   :  { %v5167_v45 = vadd.f32 %v8071_v10, %v8036_v22 }
 0x5fd   :  { %v4999_v19 = vpop.f32.mrf.mxu0 }
 0x5fe   :  { %v5161_v63 = vadd.f32 %v5160_v38, %v4999_v19 }
 0x615   :  { %v8141_v30 = vpop.f32.mrf.mxu1 }
 0x617   :  { %v5366_v11 = vpop.f32.mrf.mxu1 }
 0x61d   :  { %v8106_v25 = vpop.f32.mrf.mxu0 }
 0x61e   :  { %v5278_v17 = vadd.f32 %v8106_v25, %v5167_v45 }
 0x61f   :  { %v5270_v47 = vpop.f32.mrf.mxu0 }
 0x620   :  { %v5271_v5 = vadd.f32 %v5270_v47, %v5161_v63  ;;  %v5375_v60 = vadd.f32 %v8141_v30, %v5278_v17 }
 0x622   :  { %v5367_v57 = vadd.f32 %v5366_v11, %v5271_v5 }
 0x637   :  { %v8211_v48 = vpop.f32.mrf.mxu1 }
 0x639   :  { %v5586_v46 = vpop.f32.mrf.mxu1 }
 0x63e   :  { %v8176_v40 = vpop.f32.mrf.mxu0 }
 0x63f   :  { %v5500_v37 = vadd.f32 %v8176_v40, %v5375_v60 }
 0x640   :  { %v5493_v53 = vpop.f32.mrf.mxu0 }
 0x641   :  { %v5593_v61 = vadd.f32 %v8211_v48, %v5500_v37  ;;  %v5494_v12 = vadd.f32 %v5493_v53, %v5367_v57 }
 0x643   :  { %v5597_v54 = vadd.f32 %v5593_v61, %v4890_v32  ;;  %v5587_v29 = vadd.f32 %v5586_v46, %v5494_v12 }
 0x645   :  { %v5604_v24 = vadd.f32 %v5679_v23, %v5597_v54  ;;  %v5596_v9 = vadd.f32 %v5587_v29, %v4884_v43 }
 0x647   :  { %8220 = vtanh.f32 %v5604_v24  ;;  %v5603_v21 = vadd.f32 %v5679_v23, %v5596_v9 }
 0x649   :  { %8222 = vtanh.f32 %v5603_v21 }
 0x654   :  { %v8221_v0 = vpop.eup %8220 }
 0x655   :  { %5608 = vst [vmem:[%s11354_s5 + $0x8] sm:$0xff] %v8221_v0 }
 0x656   :  { %v8223_v3 = vpop.eup %8222 }
 0x657   :  { %5607 = vst [vmem:[%s11354_s5] sm:$0xff] %v8223_v3 }

</bundles_post_ra>
